<compile_context>
chip_gen: v6e
topology: v6e:2x2x1
jax: 0.10.0
libtpu: 0.0.40
codegen_flags: <defaults>
</compile_context>

<pallas_src>
import math
import jax
import jax.numpy as jnp
from jax.experimental import pallas as pl
from jax.experimental.pallas import tpu as pltpu

HIDDEN_DIM = 32
INPUT_DIM = 1
NUM_LAYERS = 5
OUTPUT_DIM = 1


def lstm_kernel(g0_ref, wih_ref, whh_ref, b_ref, wfc_ref, bfc_ref, out_ref):
    """All inputs are full VMEM-resident arrays:
      g0_ref : (T, B, 4H)    layer-0 input->gate contribution incl. bias
      wih_ref: (L-1, H, 4H)  input->gate weights for layers 1..L-1 (transposed)
      whh_ref: (L, H, 4H)    hidden->gate weights (transposed)
      b_ref  : (L-1, 1, 4H)  combined b_ih + b_hh for layers 1..L-1
      wfc_ref: (1, H)        final linear weight
      bfc_ref: (1, 1)        final linear bias
      out_ref: (B, 1)
    """
    T, B, G = g0_ref.shape
    H = G // 4
    L = whh_ref.shape[0]

    # Input->gate contributions (bias included) for the current layer, one
    # (B, 4H) value per timestep, kept as vreg-resident values.
    gates_in = [g0_ref[t] for t in range(T)]

    h = None
    for l in range(L):
        whh_l = whh_ref[l]                        # (H, 4H): loaded once per layer
        h = jnp.zeros((B, H), dtype=jnp.float32)  # h/c stay in vregs
        c = jnp.zeros((B, H), dtype=jnp.float32)
        h_seq = []
        # Serial recurrence: only the h @ W_hh matmul is on the dependency chain.
        # T*L is small and static, so full Python unroll is fine.
        # TODO(synk): if T or L ever becomes large/dynamic, switch to
        # lax.fori_loop(..., unroll=True) carrying (h, c) to bound live ranges.
        for t in range(T):
            gates = gates_in[t] + jnp.dot(h, whh_l,
                                          preferred_element_type=jnp.float32)
            sig = jax.nn.sigmoid(gates)           # one full-width EUP pass
            th = jnp.tanh(gates)                  # one full-width EUP pass
            i_g = sig[:, 0 * H:1 * H]
            f_g = sig[:, 1 * H:2 * H]
            g_g = th[:, 2 * H:3 * H]
            o_g = sig[:, 3 * H:4 * H]
            c = f_g * c + i_g * g_g
            h = o_g * jnp.tanh(c)
            h_seq.append(h)

        # Precompute next layer's input->gate contribution OFF the serial chain:
        # T independent small matmuls that the MXU pipelines back-to-back
        # (avoids sublane-unaligned concat/reshape while keeping the recurrence
        # down to a single matmul per cell).
        if l + 1 < L:
            wih_next = wih_ref[l]                 # weights of layer l+1, (H, 4H)
            b_next = b_ref[l]                     # (1, 4H)
            gates_in = [
                jnp.dot(h_seq[t], wih_next, preferred_element_type=jnp.float32)
                + b_next
                for t in range(T)
            ]

    # Final fc (output_dim == 1): VPU multiply + lane reduce instead of MXU.
    out_ref[...] = (
        jnp.sum(h * wfc_ref[...], axis=-1, keepdims=True) + bfc_ref[...]
    )


def lstm_forward(x, packed):
    """x: (B, T, INPUT_DIM) float32 -> (B, OUTPUT_DIM) float32."""
    wih0_row, b0, wih_rest, b_rest, whh, wfc, bfc = packed
    B, T, _ = x.shape

    # Layer-0 input->gate precompute in the wrapper: input_dim == 1, so the
    # matmul against W_ih[0] is a scalar * row broadcast.  No zero-padded x.
    x_tm = jnp.transpose(x, (1, 0, 2))                            # (T, B, 1)
    gates0 = x_tm * wih0_row[None, None, :] + b0[None, None, :]   # (T, B, 4H)

    vmem = pltpu.MemorySpace.VMEM
    return pl.pallas_call(
        lstm_kernel,
        out_shape=jax.ShapeDtypeStruct((B, OUTPUT_DIM), jnp.float32),
        in_specs=[pl.BlockSpec(memory_space=vmem)] * 6,
        out_specs=pl.BlockSpec(memory_space=vmem),
    )(gates0, wih_rest, whh, b_rest, wfc, bfc)


def init_torch_params(key):
    """Per-layer (W_ih, W_hh, b_ih, b_hh) + (W_fc, b_fc) in PyTorch layout."""
    H, L, IN, OUT = HIDDEN_DIM, NUM_LAYERS, INPUT_DIM, OUTPUT_DIM
    bound = 1.0 / math.sqrt(H)
    keys = jax.random.split(key, 4 * L + 2)
    layers = []
    for l in range(L):
        in_dim = IN if l == 0 else H
        w_ih = jax.random.uniform(keys[4 * l + 0], (4 * H, in_dim),
                                  minval=-bound, maxval=bound, dtype=jnp.float32)
        w_hh = jax.random.uniform(keys[4 * l + 1], (4 * H, H),
                                  minval=-bound, maxval=bound, dtype=jnp.float32)
        b_ih = jax.random.uniform(keys[4 * l + 2], (4 * H,),
                                  minval=-bound, maxval=bound, dtype=jnp.float32)
        b_hh = jax.random.uniform(keys[4 * l + 3], (4 * H,),
                                  minval=-bound, maxval=bound, dtype=jnp.float32)
        layers.append((w_ih, w_hh, b_ih, b_hh))
    w_fc = jax.random.uniform(keys[-2], (OUT, H), minval=-bound, maxval=bound,
                              dtype=jnp.float32)
    b_fc = jax.random.uniform(keys[-1], (OUT,), minval=-bound, maxval=bound,
                              dtype=jnp.float32)
    return layers, w_fc, b_fc


def pack_params(layers, w_fc, b_fc):
    """Repack PyTorch-layout params into the kernel layout."""
    L = NUM_LAYERS
    wih0_row = layers[0][0][:, 0]                    # (4H,)  since input_dim == 1
    b0 = layers[0][2] + layers[0][3]                 # (4H,)  combined bias, layer 0
    wih_rest = jnp.stack([layers[l][0].T for l in range(1, L)])   # (L-1, H, 4H)
    b_rest = jnp.stack([(layers[l][2] + layers[l][3])[None, :]
                        for l in range(1, L)])                    # (L-1, 1, 4H)
    whh = jnp.stack([layers[l][1].T for l in range(L)])           # (L, H, 4H)
    return (wih0_row, b0, wih_rest, b_rest, whh, w_fc, b_fc[None, :])


def reference_forward(x, layers, w_fc, b_fc):
    """Pure-JAX reference of the PyTorch forward (time-major inner loop)."""
    B, T, _ = x.shape
    H, L = HIDDEN_DIM, NUM_LAYERS
    h = [jnp.zeros((B, H), jnp.float32) for _ in range(L)]
    c = [jnp.zeros((B, H), jnp.float32) for _ in range(L)]
    for t in range(T):
        inp = x[:, t, :]
        for l in range(L):
            w_ih, w_hh, b_ih, b_hh = layers[l]
            gates = inp @ w_ih.T + h[l] @ w_hh.T + b_ih + b_hh
            i_g = jax.nn.sigmoid(gates[:, 0 * H:1 * H])
            f_g = jax.nn.sigmoid(gates[:, 1 * H:2 * H])
            g_g = jnp.tanh(gates[:, 2 * H:3 * H])
            o_g = jax.nn.sigmoid(gates[:, 3 * H:4 * H])
            c[l] = f_g * c[l] + i_g * g_g
            h[l] = o_g * jnp.tanh(c[l])
            inp = h[l]
    return h[L - 1] @ w_fc.T + b_fc


if __name__ == "__main__":
    key = jax.random.PRNGKey(0)
    k_param, k_x = jax.random.split(key)
    layers, w_fc, b_fc = init_torch_params(k_param)
    packed = pack_params(layers, w_fc, b_fc)

    B, T = 2, 8
    x = jax.random.normal(k_x, (B, T, INPUT_DIM), dtype=jnp.float32)

    out = jax.block_until_ready(lstm_forward(x, packed))
    ref = reference_forward(x, layers, w_fc, b_fc)
    assert out.shape == (B, OUTPUT_DIM)
    assert jnp.allclose(out, ref, atol=1e-5, rtol=1e-5)
    print("KERNEL_OK")
</pallas_src>

<mosaic_0001>
module attributes {stable_mosaic.version = 11 : i64} {
  func.func @lstm_kernel(%arg0: memref<8x2x128xf32, #tpu.memory_space<vmem>>, %arg1: memref<4x32x128xf32, #tpu.memory_space<vmem>>, %arg2: memref<5x32x128xf32, #tpu.memory_space<vmem>>, %arg3: memref<4x1x128xf32, #tpu.memory_space<vmem>>, %arg4: memref<1x32xf32, #tpu.memory_space<vmem>>, %arg5: memref<1x1xf32, #tpu.memory_space<vmem>>, %arg6: memref<2x1xf32, #tpu.memory_space<vmem>>) attributes {dimension_semantics = [], scalar_prefetch = 0 : i64, scratch_operands = 0 : i64, tpu.core_type = #tpu.core_type<tc>} {
    %c0 = arith.constant 0 : index
    %c0_0 = arith.constant 0 : index
    %c0_1 = arith.constant 0 : index
    %0 = vector.load %arg0[%c0, %c0_0, %c0_1] : memref<8x2x128xf32, #tpu.memory_space<vmem>>, vector<1x2x128xf32>
    %1 = vector.shape_cast %0 : vector<1x2x128xf32> to vector<2x128xf32>
    %c1 = arith.constant 1 : index
    %c0_2 = arith.constant 0 : index
    %c0_3 = arith.constant 0 : index
    %2 = vector.load %arg0[%c1, %c0_2, %c0_3] : memref<8x2x128xf32, #tpu.memory_space<vmem>>, vector<1x2x128xf32>
    %3 = vector.shape_cast %2 : vector<1x2x128xf32> to vector<2x128xf32>
    %c2 = arith.constant 2 : index
    %c0_4 = arith.constant 0 : index
    %c0_5 = arith.constant 0 : index
    %4 = vector.load %arg0[%c2, %c0_4, %c0_5] : memref<8x2x128xf32, #tpu.memory_space<vmem>>, vector<1x2x128xf32>
    %5 = vector.shape_cast %4 : vector<1x2x128xf32> to vector<2x128xf32>
    %c3 = arith.constant 3 : index
    %c0_6 = arith.constant 0 : index
    %c0_7 = arith.constant 0 : index
    %6 = vector.load %arg0[%c3, %c0_6, %c0_7] : memref<8x2x128xf32, #tpu.memory_space<vmem>>, vector<1x2x128xf32>
    %7 = vector.shape_cast %6 : vector<1x2x128xf32> to vector<2x128xf32>
    %c4 = arith.constant 4 : index
    %c0_8 = arith.constant 0 : index
    %c0_9 = arith.constant 0 : index
    %8 = vector.load %arg0[%c4, %c0_8, %c0_9] : memref<8x2x128xf32, #tpu.memory_space<vmem>>, vector<1x2x128xf32>
    %9 = vector.shape_cast %8 : vector<1x2x128xf32> to vector<2x128xf32>
    %c5 = arith.constant 5 : index
    %c0_10 = arith.constant 0 : index
    %c0_11 = arith.constant 0 : index
    %10 = vector.load %arg0[%c5, %c0_10, %c0_11] : memref<8x2x128xf32, #tpu.memory_space<vmem>>, vector<1x2x128xf32>
    %11 = vector.shape_cast %10 : vector<1x2x128xf32> to vector<2x128xf32>
    %c6 = arith.constant 6 : index
    %c0_12 = arith.constant 0 : index
    %c0_13 = arith.constant 0 : index
    %12 = vector.load %arg0[%c6, %c0_12, %c0_13] : memref<8x2x128xf32, #tpu.memory_space<vmem>>, vector<1x2x128xf32>
    %13 = vector.shape_cast %12 : vector<1x2x128xf32> to vector<2x128xf32>
    %c7 = arith.constant 7 : index
    %c0_14 = arith.constant 0 : index
    %c0_15 = arith.constant 0 : index
    %14 = vector.load %arg0[%c7, %c0_14, %c0_15] : memref<8x2x128xf32, #tpu.memory_space<vmem>>, vector<1x2x128xf32>
    %15 = vector.shape_cast %14 : vector<1x2x128xf32> to vector<2x128xf32>
    %c0_16 = arith.constant 0 : index
    %c0_17 = arith.constant 0 : index
    %c0_18 = arith.constant 0 : index
    %16 = vector.load %arg2[%c0_16, %c0_17, %c0_18] : memref<5x32x128xf32, #tpu.memory_space<vmem>>, vector<1x32x128xf32>
    %17 = vector.shape_cast %16 : vector<1x32x128xf32> to vector<32x128xf32>
    %cst = arith.constant 0.000000e+00 : f32
    %18 = vector.broadcast %cst : f32 to vector<2x32xf32>
    %cst_19 = arith.constant 0.000000e+00 : f32
    %19 = vector.broadcast %cst_19 : f32 to vector<2x32xf32>
    %cst_20 = arith.constant dense<0.000000e+00> : vector<2x128xf32>
    %20 = tpu.matmul %18, %17, %cst_20 {dimension_numbers = #tpu.dot_dimension_numbers<[1], [0], [0], [1], [0, 0, 1, 1], [], []>} : vector<2x32xf32>, vector<32x128xf32>, vector<2x128xf32> -> vector<2x128xf32>
    %21 = arith.addf %1, %20 : vector<2x128xf32>
    %22 = arith.negf %21 : vector<2x128xf32>
    %23 = math.exp %22 : vector<2x128xf32>
    %cst_21 = arith.constant 1.000000e+00 : f32
    %24 = vector.broadcast %cst_21 : f32 to vector<2x128xf32>
    %25 = arith.addf %24, %23 : vector<2x128xf32>
    %26 = arith.divf %24, %25 : vector<2x128xf32>
    %27 = math.tanh %21 : vector<2x128xf32>
    %28 = vector.extract_strided_slice %26 {offsets = [0, 0], sizes = [2, 32], strides = [1, 1]} : vector<2x128xf32> to vector<2x32xf32>
    %29 = vector.extract_strided_slice %26 {offsets = [0, 32], sizes = [2, 32], strides = [1, 1]} : vector<2x128xf32> to vector<2x32xf32>
    %30 = vector.extract_strided_slice %27 {offsets = [0, 64], sizes = [2, 32], strides = [1, 1]} : vector<2x128xf32> to vector<2x32xf32>
    %31 = vector.extract_strided_slice %26 {offsets = [0, 96], sizes = [2, 32], strides = [1, 1]} : vector<2x128xf32> to vector<2x32xf32>
    %32 = arith.mulf %29, %19 : vector<2x32xf32>
    %33 = arith.mulf %28, %30 : vector<2x32xf32>
    %34 = arith.addf %32, %33 : vector<2x32xf32>
    %35 = math.tanh %34 : vector<2x32xf32>
    %36 = arith.mulf %31, %35 : vector<2x32xf32>
    %cst_22 = arith.constant dense<0.000000e+00> : vector<2x128xf32>
    %37 = tpu.matmul %36, %17, %cst_22 {dimension_numbers = #tpu.dot_dimension_numbers<[1], [0], [0], [1], [0, 0, 1, 1], [], []>} : vector<2x32xf32>, vector<32x128xf32>, vector<2x128xf32> -> vector<2x128xf32>
    %38 = arith.addf %3, %37 : vector<2x128xf32>
    %39 = arith.negf %38 : vector<2x128xf32>
    %40 = math.exp %39 : vector<2x128xf32>
    %cst_23 = arith.constant 1.000000e+00 : f32
    %41 = vector.broadcast %cst_23 : f32 to vector<2x128xf32>
    %42 = arith.addf %41, %40 : vector<2x128xf32>
    %43 = arith.divf %41, %42 : vector<2x128xf32>
    %44 = math.tanh %38 : vector<2x128xf32>
    %45 = vector.extract_strided_slice %43 {offsets = [0, 0], sizes = [2, 32], strides = [1, 1]} : vector<2x128xf32> to vector<2x32xf32>
    %46 = vector.extract_strided_slice %43 {offsets = [0, 32], sizes = [2, 32], strides = [1, 1]} : vector<2x128xf32> to vector<2x32xf32>
    %47 = vector.extract_strided_slice %44 {offsets = [0, 64], sizes = [2, 32], strides = [1, 1]} : vector<2x128xf32> to vector<2x32xf32>
    %48 = vector.extract_strided_slice %43 {offsets = [0, 96], sizes = [2, 32], strides = [1, 1]} : vector<2x128xf32> to vector<2x32xf32>
    %49 = arith.mulf %46, %34 : vector<2x32xf32>
    %50 = arith.mulf %45, %47 : vector<2x32xf32>
    %51 = arith.addf %49, %50 : vector<2x32xf32>
    %52 = math.tanh %51 : vector<2x32xf32>
    %53 = arith.mulf %48, %52 : vector<2x32xf32>
    %cst_24 = arith.constant dense<0.000000e+00> : vector<2x128xf32>
    %54 = tpu.matmul %53, %17, %cst_24 {dimension_numbers = #tpu.dot_dimension_numbers<[1], [0], [0], [1], [0, 0, 1, 1], [], []>} : vector<2x32xf32>, vector<32x128xf32>, vector<2x128xf32> -> vector<2x128xf32>
    %55 = arith.addf %5, %54 : vector<2x128xf32>
    %56 = arith.negf %55 : vector<2x128xf32>
    %57 = math.exp %56 : vector<2x128xf32>
    %cst_25 = arith.constant 1.000000e+00 : f32
    %58 = vector.broadcast %cst_25 : f32 to vector<2x128xf32>
    %59 = arith.addf %58, %57 : vector<2x128xf32>
    %60 = arith.divf %58, %59 : vector<2x128xf32>
    %61 = math.tanh %55 : vector<2x128xf32>
    %62 = vector.extract_strided_slice %60 {offsets = [0, 0], sizes = [2, 32], strides = [1, 1]} : vector<2x128xf32> to vector<2x32xf32>
    %63 = vector.extract_strided_slice %60 {offsets = [0, 32], sizes = [2, 32], strides = [1, 1]} : vector<2x128xf32> to vector<2x32xf32>
    %64 = vector.extract_strided_slice %61 {offsets = [0, 64], sizes = [2, 32], strides = [1, 1]} : vector<2x128xf32> to vector<2x32xf32>
    %65 = vector.extract_strided_slice %60 {offsets = [0, 96], sizes = [2, 32], strides = [1, 1]} : vector<2x128xf32> to vector<2x32xf32>
    %66 = arith.mulf %63, %51 : vector<2x32xf32>
    %67 = arith.mulf %62, %64 : vector<2x32xf32>
    %68 = arith.addf %66, %67 : vector<2x32xf32>
    %69 = math.tanh %68 : vector<2x32xf32>
    %70 = arith.mulf %65, %69 : vector<2x32xf32>
    %cst_26 = arith.constant dense<0.000000e+00> : vector<2x128xf32>
    %71 = tpu.matmul %70, %17, %cst_26 {dimension_numbers = #tpu.dot_dimension_numbers<[1], [0], [0], [1], [0, 0, 1, 1], [], []>} : vector<2x32xf32>, vector<32x128xf32>, vector<2x128xf32> -> vector<2x128xf32>
    %72 = arith.addf %7, %71 : vector<2x128xf32>
    %73 = arith.negf %72 : vector<2x128xf32>
    %74 = math.exp %73 : vector<2x128xf32>
    %cst_27 = arith.constant 1.000000e+00 : f32
    %75 = vector.broadcast %cst_27 : f32 to vector<2x128xf32>
    %76 = arith.addf %75, %74 : vector<2x128xf32>
    %77 = arith.divf %75, %76 : vector<2x128xf32>
    %78 = math.tanh %72 : vector<2x128xf32>
    %79 = vector.extract_strided_slice %77 {offsets = [0, 0], sizes = [2, 32], strides = [1, 1]} : vector<2x128xf32> to vector<2x32xf32>
    %80 = vector.extract_strided_slice %77 {offsets = [0, 32], sizes = [2, 32], strides = [1, 1]} : vector<2x128xf32> to vector<2x32xf32>
    %81 = vector.extract_strided_slice %78 {offsets = [0, 64], sizes = [2, 32], strides = [1, 1]} : vector<2x128xf32> to vector<2x32xf32>
    %82 = vector.extract_strided_slice %77 {offsets = [0, 96], sizes = [2, 32], strides = [1, 1]} : vector<2x128xf32> to vector<2x32xf32>
    %83 = arith.mulf %80, %68 : vector<2x32xf32>
    %84 = arith.mulf %79, %81 : vector<2x32xf32>
    %85 = arith.addf %83, %84 : vector<2x32xf32>
    %86 = math.tanh %85 : vector<2x32xf32>
    %87 = arith.mulf %82, %86 : vector<2x32xf32>
    %cst_28 = arith.constant dense<0.000000e+00> : vector<2x128xf32>
    %88 = tpu.matmul %87, %17, %cst_28 {dimension_numbers = #tpu.dot_dimension_numbers<[1], [0], [0], [1], [0, 0, 1, 1], [], []>} : vector<2x32xf32>, vector<32x128xf32>, vector<2x128xf32> -> vector<2x128xf32>
    %89 = arith.addf %9, %88 : vector<2x128xf32>
    %90 = arith.negf %89 : vector<2x128xf32>
    %91 = math.exp %90 : vector<2x128xf32>
    %cst_29 = arith.constant 1.000000e+00 : f32
    %92 = vector.broadcast %cst_29 : f32 to vector<2x128xf32>
    %93 = arith.addf %92, %91 : vector<2x128xf32>
    %94 = arith.divf %92, %93 : vector<2x128xf32>
    %95 = math.tanh %89 : vector<2x128xf32>
    %96 = vector.extract_strided_slice %94 {offsets = [0, 0], sizes = [2, 32], strides = [1, 1]} : vector<2x128xf32> to vector<2x32xf32>
    %97 = vector.extract_strided_slice %94 {offsets = [0, 32], sizes = [2, 32], strides = [1, 1]} : vector<2x128xf32> to vector<2x32xf32>
    %98 = vector.extract_strided_slice %95 {offsets = [0, 64], sizes = [2, 32], strides = [1, 1]} : vector<2x128xf32> to vector<2x32xf32>
    %99 = vector.extract_strided_slice %94 {offsets = [0, 96], sizes = [2, 32], strides = [1, 1]} : vector<2x128xf32> to vector<2x32xf32>
    %100 = arith.mulf %97, %85 : vector<2x32xf32>
    %101 = arith.mulf %96, %98 : vector<2x32xf32>
    %102 = arith.addf %100, %101 : vector<2x32xf32>
    %103 = math.tanh %102 : vector<2x32xf32>
    %104 = arith.mulf %99, %103 : vector<2x32xf32>
    %cst_30 = arith.constant dense<0.000000e+00> : vector<2x128xf32>
    %105 = tpu.matmul %104, %17, %cst_30 {dimension_numbers = #tpu.dot_dimension_numbers<[1], [0], [0], [1], [0, 0, 1, 1], [], []>} : vector<2x32xf32>, vector<32x128xf32>, vector<2x128xf32> -> vector<2x128xf32>
    %106 = arith.addf %11, %105 : vector<2x128xf32>
    %107 = arith.negf %106 : vector<2x128xf32>
    %108 = math.exp %107 : vector<2x128xf32>
    %cst_31 = arith.constant 1.000000e+00 : f32
    %109 = vector.broadcast %cst_31 : f32 to vector<2x128xf32>
    %110 = arith.addf %109, %108 : vector<2x128xf32>
    %111 = arith.divf %109, %110 : vector<2x128xf32>
    %112 = math.tanh %106 : vector<2x128xf32>
    %113 = vector.extract_strided_slice %111 {offsets = [0, 0], sizes = [2, 32], strides = [1, 1]} : vector<2x128xf32> to vector<2x32xf32>
    %114 = vector.extract_strided_slice %111 {offsets = [0, 32], sizes = [2, 32], strides = [1, 1]} : vector<2x128xf32> to vector<2x32xf32>
    %115 = vector.extract_strided_slice %112 {offsets = [0, 64], sizes = [2, 32], strides = [1, 1]} : vector<2x128xf32> to vector<2x32xf32>
    %116 = vector.extract_strided_slice %111 {offsets = [0, 96], sizes = [2, 32], strides = [1, 1]} : vector<2x128xf32> to vector<2x32xf32>
    %117 = arith.mulf %114, %102 : vector<2x32xf32>
    %118 = arith.mulf %113, %115 : vector<2x32xf32>
    %119 = arith.addf %117, %118 : vector<2x32xf32>
    %120 = math.tanh %119 : vector<2x32xf32>
    %121 = arith.mulf %116, %120 : vector<2x32xf32>
    %cst_32 = arith.constant dense<0.000000e+00> : vector<2x128xf32>
    %122 = tpu.matmul %121, %17, %cst_32 {dimension_numbers = #tpu.dot_dimension_numbers<[1], [0], [0], [1], [0, 0, 1, 1], [], []>} : vector<2x32xf32>, vector<32x128xf32>, vector<2x128xf32> -> vector<2x128xf32>
    %123 = arith.addf %13, %122 : vector<2x128xf32>
    %124 = arith.negf %123 : vector<2x128xf32>
    %125 = math.exp %124 : vector<2x128xf32>
    %cst_33 = arith.constant 1.000000e+00 : f32
    %126 = vector.broadcast %cst_33 : f32 to vector<2x128xf32>
    %127 = arith.addf %126, %125 : vector<2x128xf32>
    %128 = arith.divf %126, %127 : vector<2x128xf32>
    %129 = math.tanh %123 : vector<2x128xf32>
    %130 = vector.extract_strided_slice %128 {offsets = [0, 0], sizes = [2, 32], strides = [1, 1]} : vector<2x128xf32> to vector<2x32xf32>
    %131 = vector.extract_strided_slice %128 {offsets = [0, 32], sizes = [2, 32], strides = [1, 1]} : vector<2x128xf32> to vector<2x32xf32>
    %132 = vector.extract_strided_slice %129 {offsets = [0, 64], sizes = [2, 32], strides = [1, 1]} : vector<2x128xf32> to vector<2x32xf32>
    %133 = vector.extract_strided_slice %128 {offsets = [0, 96], sizes = [2, 32], strides = [1, 1]} : vector<2x128xf32> to vector<2x32xf32>
    %134 = arith.mulf %131, %119 : vector<2x32xf32>
    %135 = arith.mulf %130, %132 : vector<2x32xf32>
    %136 = arith.addf %134, %135 : vector<2x32xf32>
    %137 = math.tanh %136 : vector<2x32xf32>
    %138 = arith.mulf %133, %137 : vector<2x32xf32>
    %cst_34 = arith.constant dense<0.000000e+00> : vector<2x128xf32>
    %139 = tpu.matmul %138, %17, %cst_34 {dimension_numbers = #tpu.dot_dimension_numbers<[1], [0], [0], [1], [0, 0, 1, 1], [], []>} : vector<2x32xf32>, vector<32x128xf32>, vector<2x128xf32> -> vector<2x128xf32>
    %140 = arith.addf %15, %139 : vector<2x128xf32>
    %141 = arith.negf %140 : vector<2x128xf32>
    %142 = math.exp %141 : vector<2x128xf32>
    %cst_35 = arith.constant 1.000000e+00 : f32
    %143 = vector.broadcast %cst_35 : f32 to vector<2x128xf32>
    %144 = arith.addf %143, %142 : vector<2x128xf32>
    %145 = arith.divf %143, %144 : vector<2x128xf32>
    %146 = math.tanh %140 : vector<2x128xf32>
    %147 = vector.extract_strided_slice %145 {offsets = [0, 0], sizes = [2, 32], strides = [1, 1]} : vector<2x128xf32> to vector<2x32xf32>
    %148 = vector.extract_strided_slice %145 {offsets = [0, 32], sizes = [2, 32], strides = [1, 1]} : vector<2x128xf32> to vector<2x32xf32>
    %149 = vector.extract_strided_slice %146 {offsets = [0, 64], sizes = [2, 32], strides = [1, 1]} : vector<2x128xf32> to vector<2x32xf32>
    %150 = vector.extract_strided_slice %145 {offsets = [0, 96], sizes = [2, 32], strides = [1, 1]} : vector<2x128xf32> to vector<2x32xf32>
    %151 = arith.mulf %148, %136 : vector<2x32xf32>
    %152 = arith.mulf %147, %149 : vector<2x32xf32>
    %153 = arith.addf %151, %152 : vector<2x32xf32>
    %154 = math.tanh %153 : vector<2x32xf32>
    %155 = arith.mulf %150, %154 : vector<2x32xf32>
    %c0_36 = arith.constant 0 : index
    %c0_37 = arith.constant 0 : index
    %c0_38 = arith.constant 0 : index
    %156 = vector.load %arg1[%c0_36, %c0_37, %c0_38] : memref<4x32x128xf32, #tpu.memory_space<vmem>>, vector<1x32x128xf32>
    %157 = vector.shape_cast %156 : vector<1x32x128xf32> to vector<32x128xf32>
    %c0_39 = arith.constant 0 : index
    %c0_40 = arith.constant 0 : index
    %c0_41 = arith.constant 0 : index
    %158 = vector.load %arg3[%c0_39, %c0_40, %c0_41] : memref<4x1x128xf32, #tpu.memory_space<vmem>>, vector<1x1x128xf32>
    %159 = vector.shape_cast %158 : vector<1x1x128xf32> to vector<1x128xf32>
    %cst_42 = arith.constant dense<0.000000e+00> : vector<2x128xf32>
    %160 = tpu.matmul %36, %157, %cst_42 {dimension_numbers = #tpu.dot_dimension_numbers<[1], [0], [0], [1], [0, 0, 1, 1], [], []>} : vector<2x32xf32>, vector<32x128xf32>, vector<2x128xf32> -> vector<2x128xf32>
    %161 = vector.broadcast %159 : vector<1x128xf32> to vector<2x128xf32>
    %162 = arith.addf %160, %161 : vector<2x128xf32>
    %cst_43 = arith.constant dense<0.000000e+00> : vector<2x128xf32>
    %163 = tpu.matmul %53, %157, %cst_43 {dimension_numbers = #tpu.dot_dimension_numbers<[1], [0], [0], [1], [0, 0, 1, 1], [], []>} : vector<2x32xf32>, vector<32x128xf32>, vector<2x128xf32> -> vector<2x128xf32>
    %164 = vector.broadcast %159 : vector<1x128xf32> to vector<2x128xf32>
    %165 = arith.addf %163, %164 : vector<2x128xf32>
    %cst_44 = arith.constant dense<0.000000e+00> : vector<2x128xf32>
    %166 = tpu.matmul %70, %157, %cst_44 {dimension_numbers = #tpu.dot_dimension_numbers<[1], [0], [0], [1], [0, 0, 1, 1], [], []>} : vector<2x32xf32>, vector<32x128xf32>, vector<2x128xf32> -> vector<2x128xf32>
    %167 = vector.broadcast %159 : vector<1x128xf32> to vector<2x128xf32>
    %168 = arith.addf %166, %167 : vector<2x128xf32>
    %cst_45 = arith.constant dense<0.000000e+00> : vector<2x128xf32>
    %169 = tpu.matmul %87, %157, %cst_45 {dimension_numbers = #tpu.dot_dimension_numbers<[1], [0], [0], [1], [0, 0, 1, 1], [], []>} : vector<2x32xf32>, vector<32x128xf32>, vector<2x128xf32> -> vector<2x128xf32>
    %170 = vector.broadcast %159 : vector<1x128xf32> to vector<2x128xf32>
    %171 = arith.addf %169, %170 : vector<2x128xf32>
    %cst_46 = arith.constant dense<0.000000e+00> : vector<2x128xf32>
    %172 = tpu.matmul %104, %157, %cst_46 {dimension_numbers = #tpu.dot_dimension_numbers<[1], [0], [0], [1], [0, 0, 1, 1], [], []>} : vector<2x32xf32>, vector<32x128xf32>, vector<2x128xf32> -> vector<2x128xf32>
    %173 = vector.broadcast %159 : vector<1x128xf32> to vector<2x128xf32>
    %174 = arith.addf %172, %173 : vector<2x128xf32>
    %cst_47 = arith.constant dense<0.000000e+00> : vector<2x128xf32>
    %175 = tpu.matmul %121, %157, %cst_47 {dimension_numbers = #tpu.dot_dimension_numbers<[1], [0], [0], [1], [0, 0, 1, 1], [], []>} : vector<2x32xf32>, vector<32x128xf32>, vector<2x128xf32> -> vector<2x128xf32>
    %176 = vector.broadcast %159 : vector<1x128xf32> to vector<2x128xf32>
    %177 = arith.addf %175, %176 : vector<2x128xf32>
    %cst_48 = arith.constant dense<0.000000e+00> : vector<2x128xf32>
    %178 = tpu.matmul %138, %157, %cst_48 {dimension_numbers = #tpu.dot_dimension_numbers<[1], [0], [0], [1], [0, 0, 1, 1], [], []>} : vector<2x32xf32>, vector<32x128xf32>, vector<2x128xf32> -> vector<2x128xf32>
    %179 = vector.broadcast %159 : vector<1x128xf32> to vector<2x128xf32>
    %180 = arith.addf %178, %179 : vector<2x128xf32>
    %cst_49 = arith.constant dense<0.000000e+00> : vector<2x128xf32>
    %181 = tpu.matmul %155, %157, %cst_49 {dimension_numbers = #tpu.dot_dimension_numbers<[1], [0], [0], [1], [0, 0, 1, 1], [], []>} : vector<2x32xf32>, vector<32x128xf32>, vector<2x128xf32> -> vector<2x128xf32>
    %182 = vector.broadcast %159 : vector<1x128xf32> to vector<2x128xf32>
    %183 = arith.addf %181, %182 : vector<2x128xf32>
    %c1_50 = arith.constant 1 : index
    %c0_51 = arith.constant 0 : index
    %c0_52 = arith.constant 0 : index
    %184 = vector.load %arg2[%c1_50, %c0_51, %c0_52] : memref<5x32x128xf32, #tpu.memory_space<vmem>>, vector<1x32x128xf32>
    %185 = vector.shape_cast %184 : vector<1x32x128xf32> to vector<32x128xf32>
    %cst_53 = arith.constant 0.000000e+00 : f32
    %186 = vector.broadcast %cst_53 : f32 to vector<2x32xf32>
    %cst_54 = arith.constant 0.000000e+00 : f32
    %187 = vector.broadcast %cst_54 : f32 to vector<2x32xf32>
    %cst_55 = arith.constant dense<0.000000e+00> : vector<2x128xf32>
    %188 = tpu.matmul %186, %185, %cst_55 {dimension_numbers = #tpu.dot_dimension_numbers<[1], [0], [0], [1], [0, 0, 1, 1], [], []>} : vector<2x32xf32>, vector<32x128xf32>, vector<2x128xf32> -> vector<2x128xf32>
    %189 = arith.addf %162, %188 : vector<2x128xf32>
    %190 = arith.negf %189 : vector<2x128xf32>
    %191 = math.exp %190 : vector<2x128xf32>
    %cst_56 = arith.constant 1.000000e+00 : f32
    %192 = vector.broadcast %cst_56 : f32 to vector<2x128xf32>
    %193 = arith.addf %192, %191 : vector<2x128xf32>
    %194 = arith.divf %192, %193 : vector<2x128xf32>
    %195 = math.tanh %189 : vector<2x128xf32>
    %196 = vector.extract_strided_slice %194 {offsets = [0, 0], sizes = [2, 32], strides = [1, 1]} : vector<2x128xf32> to vector<2x32xf32>
    %197 = vector.extract_strided_slice %194 {offsets = [0, 32], sizes = [2, 32], strides = [1, 1]} : vector<2x128xf32> to vector<2x32xf32>
    %198 = vector.extract_strided_slice %195 {offsets = [0, 64], sizes = [2, 32], strides = [1, 1]} : vector<2x128xf32> to vector<2x32xf32>
    %199 = vector.extract_strided_slice %194 {offsets = [0, 96], sizes = [2, 32], strides = [1, 1]} : vector<2x128xf32> to vector<2x32xf32>
    %200 = arith.mulf %197, %187 : vector<2x32xf32>
    %201 = arith.mulf %196, %198 : vector<2x32xf32>
    %202 = arith.addf %200, %201 : vector<2x32xf32>
    %203 = math.tanh %202 : vector<2x32xf32>
    %204 = arith.mulf %199, %203 : vector<2x32xf32>
    %cst_57 = arith.constant dense<0.000000e+00> : vector<2x128xf32>
    %205 = tpu.matmul %204, %185, %cst_57 {dimension_numbers = #tpu.dot_dimension_numbers<[1], [0], [0], [1], [0, 0, 1, 1], [], []>} : vector<2x32xf32>, vector<32x128xf32>, vector<2x128xf32> -> vector<2x128xf32>
    %206 = arith.addf %165, %205 : vector<2x128xf32>
    %207 = arith.negf %206 : vector<2x128xf32>
    %208 = math.exp %207 : vector<2x128xf32>
    %cst_58 = arith.constant 1.000000e+00 : f32
    %209 = vector.broadcast %cst_58 : f32 to vector<2x128xf32>
    %210 = arith.addf %209, %208 : vector<2x128xf32>
    %211 = arith.divf %209, %210 : vector<2x128xf32>
    %212 = math.tanh %206 : vector<2x128xf32>
    %213 = vector.extract_strided_slice %211 {offsets = [0, 0], sizes = [2, 32], strides = [1, 1]} : vector<2x128xf32> to vector<2x32xf32>
    %214 = vector.extract_strided_slice %211 {offsets = [0, 32], sizes = [2, 32], strides = [1, 1]} : vector<2x128xf32> to vector<2x32xf32>
    %215 = vector.extract_strided_slice %212 {offsets = [0, 64], sizes = [2, 32], strides = [1, 1]} : vector<2x128xf32> to vector<2x32xf32>
    %216 = vector.extract_strided_slice %211 {offsets = [0, 96], sizes = [2, 32], strides = [1, 1]} : vector<2x128xf32> to vector<2x32xf32>
    %217 = arith.mulf %214, %202 : vector<2x32xf32>
    %218 = arith.mulf %213, %215 : vector<2x32xf32>
    %219 = arith.addf %217, %218 : vector<2x32xf32>
    %220 = math.tanh %219 : vector<2x32xf32>
    %221 = arith.mulf %216, %220 : vector<2x32xf32>
    %cst_59 = arith.constant dense<0.000000e+00> : vector<2x128xf32>
    %222 = tpu.matmul %221, %185, %cst_59 {dimension_numbers = #tpu.dot_dimension_numbers<[1], [0], [0], [1], [0, 0, 1, 1], [], []>} : vector<2x32xf32>, vector<32x128xf32>, vector<2x128xf32> -> vector<2x128xf32>
    %223 = arith.addf %168, %222 : vector<2x128xf32>
    %224 = arith.negf %223 : vector<2x128xf32>
    %225 = math.exp %224 : vector<2x128xf32>
    %cst_60 = arith.constant 1.000000e+00 : f32
    %226 = vector.broadcast %cst_60 : f32 to vector<2x128xf32>
    %227 = arith.addf %226, %225 : vector<2x128xf32>
    %228 = arith.divf %226, %227 : vector<2x128xf32>
    %229 = math.tanh %223 : vector<2x128xf32>
    %230 = vector.extract_strided_slice %228 {offsets = [0, 0], sizes = [2, 32], strides = [1, 1]} : vector<2x128xf32> to vector<2x32xf32>
    %231 = vector.extract_strided_slice %228 {offsets = [0, 32], sizes = [2, 32], strides = [1, 1]} : vector<2x128xf32> to vector<2x32xf32>
    %232 = vector.extract_strided_slice %229 {offsets = [0, 64], sizes = [2, 32], strides = [1, 1]} : vector<2x128xf32> to vector<2x32xf32>
    %233 = vector.extract_strided_slice %228 {offsets = [0, 96], sizes = [2, 32], strides = [1, 1]} : vector<2x128xf32> to vector<2x32xf32>
    %234 = arith.mulf %231, %219 : vector<2x32xf32>
    %235 = arith.mulf %230, %232 : vector<2x32xf32>
    %236 = arith.addf %234, %235 : vector<2x32xf32>
    %237 = math.tanh %236 : vector<2x32xf32>
    %238 = arith.mulf %233, %237 : vector<2x32xf32>
    %cst_61 = arith.constant dense<0.000000e+00> : vector<2x128xf32>
    %239 = tpu.matmul %238, %185, %cst_61 {dimension_numbers = #tpu.dot_dimension_numbers<[1], [0], [0], [1], [0, 0, 1, 1], [], []>} : vector<2x32xf32>, vector<32x128xf32>, vector<2x128xf32> -> vector<2x128xf32>
    %240 = arith.addf %171, %239 : vector<2x128xf32>
    %241 = arith.negf %240 : vector<2x128xf32>
    %242 = math.exp %241 : vector<2x128xf32>
    %cst_62 = arith.constant 1.000000e+00 : f32
    %243 = vector.broadcast %cst_62 : f32 to vector<2x128xf32>
    %244 = arith.addf %243, %242 : vector<2x128xf32>
    %245 = arith.divf %243, %244 : vector<2x128xf32>
    %246 = math.tanh %240 : vector<2x128xf32>
    %247 = vector.extract_strided_slice %245 {offsets = [0, 0], sizes = [2, 32], strides = [1, 1]} : vector<2x128xf32> to vector<2x32xf32>
    %248 = vector.extract_strided_slice %245 {offsets = [0, 32], sizes = [2, 32], strides = [1, 1]} : vector<2x128xf32> to vector<2x32xf32>
    %249 = vector.extract_strided_slice %246 {offsets = [0, 64], sizes = [2, 32], strides = [1, 1]} : vector<2x128xf32> to vector<2x32xf32>
    %250 = vector.extract_strided_slice %245 {offsets = [0, 96], sizes = [2, 32], strides = [1, 1]} : vector<2x128xf32> to vector<2x32xf32>
    %251 = arith.mulf %248, %236 : vector<2x32xf32>
    %252 = arith.mulf %247, %249 : vector<2x32xf32>
    %253 = arith.addf %251, %252 : vector<2x32xf32>
    %254 = math.tanh %253 : vector<2x32xf32>
    %255 = arith.mulf %250, %254 : vector<2x32xf32>
    %cst_63 = arith.constant dense<0.000000e+00> : vector<2x128xf32>
    %256 = tpu.matmul %255, %185, %cst_63 {dimension_numbers = #tpu.dot_dimension_numbers<[1], [0], [0], [1], [0, 0, 1, 1], [], []>} : vector<2x32xf32>, vector<32x128xf32>, vector<2x128xf32> -> vector<2x128xf32>
    %257 = arith.addf %174, %256 : vector<2x128xf32>
    %258 = arith.negf %257 : vector<2x128xf32>
    %259 = math.exp %258 : vector<2x128xf32>
    %cst_64 = arith.constant 1.000000e+00 : f32
    %260 = vector.broadcast %cst_64 : f32 to vector<2x128xf32>
    %261 = arith.addf %260, %259 : vector<2x128xf32>
    %262 = arith.divf %260, %261 : vector<2x128xf32>
    %263 = math.tanh %257 : vector<2x128xf32>
    %264 = vector.extract_strided_slice %262 {offsets = [0, 0], sizes = [2, 32], strides = [1, 1]} : vector<2x128xf32> to vector<2x32xf32>
    %265 = vector.extract_strided_slice %262 {offsets = [0, 32], sizes = [2, 32], strides = [1, 1]} : vector<2x128xf32> to vector<2x32xf32>
    %266 = vector.extract_strided_slice %263 {offsets = [0, 64], sizes = [2, 32], strides = [1, 1]} : vector<2x128xf32> to vector<2x32xf32>
    %267 = vector.extract_strided_slice %262 {offsets = [0, 96], sizes = [2, 32], strides = [1, 1]} : vector<2x128xf32> to vector<2x32xf32>
    %268 = arith.mulf %265, %253 : vector<2x32xf32>
    %269 = arith.mulf %264, %266 : vector<2x32xf32>
    %270 = arith.addf %268, %269 : vector<2x32xf32>
    %271 = math.tanh %270 : vector<2x32xf32>
    %272 = arith.mulf %267, %271 : vector<2x32xf32>
    %cst_65 = arith.constant dense<0.000000e+00> : vector<2x128xf32>
    %273 = tpu.matmul %272, %185, %cst_65 {dimension_numbers = #tpu.dot_dimension_numbers<[1], [0], [0], [1], [0, 0, 1, 1], [], []>} : vector<2x32xf32>, vector<32x128xf32>, vector<2x128xf32> -> vector<2x128xf32>
    %274 = arith.addf %177, %273 : vector<2x128xf32>
    %275 = arith.negf %274 : vector<2x128xf32>
    %276 = math.exp %275 : vector<2x128xf32>
    %cst_66 = arith.constant 1.000000e+00 : f32
    %277 = vector.broadcast %cst_66 : f32 to vector<2x128xf32>
    %278 = arith.addf %277, %276 : vector<2x128xf32>
    %279 = arith.divf %277, %278 : vector<2x128xf32>
    %280 = math.tanh %274 : vector<2x128xf32>
    %281 = vector.extract_strided_slice %279 {offsets = [0, 0], sizes = [2, 32], strides = [1, 1]} : vector<2x128xf32> to vector<2x32xf32>
    %282 = vector.extract_strided_slice %279 {offsets = [0, 32], sizes = [2, 32], strides = [1, 1]} : vector<2x128xf32> to vector<2x32xf32>
    %283 = vector.extract_strided_slice %280 {offsets = [0, 64], sizes = [2, 32], strides = [1, 1]} : vector<2x128xf32> to vector<2x32xf32>
    %284 = vector.extract_strided_slice %279 {offsets = [0, 96], sizes = [2, 32], strides = [1, 1]} : vector<2x128xf32> to vector<2x32xf32>
    %285 = arith.mulf %282, %270 : vector<2x32xf32>
    %286 = arith.mulf %281, %283 : vector<2x32xf32>
    %287 = arith.addf %285, %286 : vector<2x32xf32>
    %288 = math.tanh %287 : vector<2x32xf32>
    %289 = arith.mulf %284, %288 : vector<2x32xf32>
    %cst_67 = arith.constant dense<0.000000e+00> : vector<2x128xf32>
    %290 = tpu.matmul %289, %185, %cst_67 {dimension_numbers = #tpu.dot_dimension_numbers<[1], [0], [0], [1], [0, 0, 1, 1], [], []>} : vector<2x32xf32>, vector<32x128xf32>, vector<2x128xf32> -> vector<2x128xf32>
    %291 = arith.addf %180, %290 : vector<2x128xf32>
    %292 = arith.negf %291 : vector<2x128xf32>
    %293 = math.exp %292 : vector<2x128xf32>
    %cst_68 = arith.constant 1.000000e+00 : f32
    %294 = vector.broadcast %cst_68 : f32 to vector<2x128xf32>
    %295 = arith.addf %294, %293 : vector<2x128xf32>
    %296 = arith.divf %294, %295 : vector<2x128xf32>
    %297 = math.tanh %291 : vector<2x128xf32>
    %298 = vector.extract_strided_slice %296 {offsets = [0, 0], sizes = [2, 32], strides = [1, 1]} : vector<2x128xf32> to vector<2x32xf32>
    %299 = vector.extract_strided_slice %296 {offsets = [0, 32], sizes = [2, 32], strides = [1, 1]} : vector<2x128xf32> to vector<2x32xf32>
    %300 = vector.extract_strided_slice %297 {offsets = [0, 64], sizes = [2, 32], strides = [1, 1]} : vector<2x128xf32> to vector<2x32xf32>
    %301 = vector.extract_strided_slice %296 {offsets = [0, 96], sizes = [2, 32], strides = [1, 1]} : vector<2x128xf32> to vector<2x32xf32>
    %302 = arith.mulf %299, %287 : vector<2x32xf32>
    %303 = arith.mulf %298, %300 : vector<2x32xf32>
    %304 = arith.addf %302, %303 : vector<2x32xf32>
    %305 = math.tanh %304 : vector<2x32xf32>
    %306 = arith.mulf %301, %305 : vector<2x32xf32>
    %cst_69 = arith.constant dense<0.000000e+00> : vector<2x128xf32>
    %307 = tpu.matmul %306, %185, %cst_69 {dimension_numbers = #tpu.dot_dimension_numbers<[1], [0], [0], [1], [0, 0, 1, 1], [], []>} : vector<2x32xf32>, vector<32x128xf32>, vector<2x128xf32> -> vector<2x128xf32>
    %308 = arith.addf %183, %307 : vector<2x128xf32>
    %309 = arith.negf %308 : vector<2x128xf32>
    %310 = math.exp %309 : vector<2x128xf32>
    %cst_70 = arith.constant 1.000000e+00 : f32
    %311 = vector.broadcast %cst_70 : f32 to vector<2x128xf32>
    %312 = arith.addf %311, %310 : vector<2x128xf32>
    %313 = arith.divf %311, %312 : vector<2x128xf32>
    %314 = math.tanh %308 : vector<2x128xf32>
    %315 = vector.extract_strided_slice %313 {offsets = [0, 0], sizes = [2, 32], strides = [1, 1]} : vector<2x128xf32> to vector<2x32xf32>
    %316 = vector.extract_strided_slice %313 {offsets = [0, 32], sizes = [2, 32], strides = [1, 1]} : vector<2x128xf32> to vector<2x32xf32>
    %317 = vector.extract_strided_slice %314 {offsets = [0, 64], sizes = [2, 32], strides = [1, 1]} : vector<2x128xf32> to vector<2x32xf32>
    %318 = vector.extract_strided_slice %313 {offsets = [0, 96], sizes = [2, 32], strides = [1, 1]} : vector<2x128xf32> to vector<2x32xf32>
    %319 = arith.mulf %316, %304 : vector<2x32xf32>
    %320 = arith.mulf %315, %317 : vector<2x32xf32>
    %321 = arith.addf %319, %320 : vector<2x32xf32>
    %322 = math.tanh %321 : vector<2x32xf32>
    %323 = arith.mulf %318, %322 : vector<2x32xf32>
    %c1_71 = arith.constant 1 : index
    %c0_72 = arith.constant 0 : index
    %c0_73 = arith.constant 0 : index
    %324 = vector.load %arg1[%c1_71, %c0_72, %c0_73] : memref<4x32x128xf32, #tpu.memory_space<vmem>>, vector<1x32x128xf32>
    %325 = vector.shape_cast %324 : vector<1x32x128xf32> to vector<32x128xf32>
    %c1_74 = arith.constant 1 : index
    %c0_75 = arith.constant 0 : index
    %c0_76 = arith.constant 0 : index
    %326 = vector.load %arg3[%c1_74, %c0_75, %c0_76] : memref<4x1x128xf32, #tpu.memory_space<vmem>>, vector<1x1x128xf32>
    %327 = vector.shape_cast %326 : vector<1x1x128xf32> to vector<1x128xf32>
    %cst_77 = arith.constant dense<0.000000e+00> : vector<2x128xf32>
    %328 = tpu.matmul %204, %325, %cst_77 {dimension_numbers = #tpu.dot_dimension_numbers<[1], [0], [0], [1], [0, 0, 1, 1], [], []>} : vector<2x32xf32>, vector<32x128xf32>, vector<2x128xf32> -> vector<2x128xf32>
    %329 = vector.broadcast %327 : vector<1x128xf32> to vector<2x128xf32>
    %330 = arith.addf %328, %329 : vector<2x128xf32>
    %cst_78 = arith.constant dense<0.000000e+00> : vector<2x128xf32>
    %331 = tpu.matmul %221, %325, %cst_78 {dimension_numbers = #tpu.dot_dimension_numbers<[1], [0], [0], [1], [0, 0, 1, 1], [], []>} : vector<2x32xf32>, vector<32x128xf32>, vector<2x128xf32> -> vector<2x128xf32>
    %332 = vector.broadcast %327 : vector<1x128xf32> to vector<2x128xf32>
    %333 = arith.addf %331, %332 : vector<2x128xf32>
    %cst_79 = arith.constant dense<0.000000e+00> : vector<2x128xf32>
    %334 = tpu.matmul %238, %325, %cst_79 {dimension_numbers = #tpu.dot_dimension_numbers<[1], [0], [0], [1], [0, 0, 1, 1], [], []>} : vector<2x32xf32>, vector<32x128xf32>, vector<2x128xf32> -> vector<2x128xf32>
    %335 = vector.broadcast %327 : vector<1x128xf32> to vector<2x128xf32>
    %336 = arith.addf %334, %335 : vector<2x128xf32>
    %cst_80 = arith.constant dense<0.000000e+00> : vector<2x128xf32>
    %337 = tpu.matmul %255, %325, %cst_80 {dimension_numbers = #tpu.dot_dimension_numbers<[1], [0], [0], [1], [0, 0, 1, 1], [], []>} : vector<2x32xf32>, vector<32x128xf32>, vector<2x128xf32> -> vector<2x128xf32>
    %338 = vector.broadcast %327 : vector<1x128xf32> to vector<2x128xf32>
    %339 = arith.addf %337, %338 : vector<2x128xf32>
    %cst_81 = arith.constant dense<0.000000e+00> : vector<2x128xf32>
    %340 = tpu.matmul %272, %325, %cst_81 {dimension_numbers = #tpu.dot_dimension_numbers<[1], [0], [0], [1], [0, 0, 1, 1], [], []>} : vector<2x32xf32>, vector<32x128xf32>, vector<2x128xf32> -> vector<2x128xf32>
    %341 = vector.broadcast %327 : vector<1x128xf32> to vector<2x128xf32>
    %342 = arith.addf %340, %341 : vector<2x128xf32>
    %cst_82 = arith.constant dense<0.000000e+00> : vector<2x128xf32>
    %343 = tpu.matmul %289, %325, %cst_82 {dimension_numbers = #tpu.dot_dimension_numbers<[1], [0], [0], [1], [0, 0, 1, 1], [], []>} : vector<2x32xf32>, vector<32x128xf32>, vector<2x128xf32> -> vector<2x128xf32>
    %344 = vector.broadcast %327 : vector<1x128xf32> to vector<2x128xf32>
    %345 = arith.addf %343, %344 : vector<2x128xf32>
    %cst_83 = arith.constant dense<0.000000e+00> : vector<2x128xf32>
    %346 = tpu.matmul %306, %325, %cst_83 {dimension_numbers = #tpu.dot_dimension_numbers<[1], [0], [0], [1], [0, 0, 1, 1], [], []>} : vector<2x32xf32>, vector<32x128xf32>, vector<2x128xf32> -> vector<2x128xf32>
    %347 = vector.broadcast %327 : vector<1x128xf32> to vector<2x128xf32>
    %348 = arith.addf %346, %347 : vector<2x128xf32>
    %cst_84 = arith.constant dense<0.000000e+00> : vector<2x128xf32>
    %349 = tpu.matmul %323, %325, %cst_84 {dimension_numbers = #tpu.dot_dimension_numbers<[1], [0], [0], [1], [0, 0, 1, 1], [], []>} : vector<2x32xf32>, vector<32x128xf32>, vector<2x128xf32> -> vector<2x128xf32>
    %350 = vector.broadcast %327 : vector<1x128xf32> to vector<2x128xf32>
    %351 = arith.addf %349, %350 : vector<2x128xf32>
    %c2_85 = arith.constant 2 : index
    %c0_86 = arith.constant 0 : index
    %c0_87 = arith.constant 0 : index
    %352 = vector.load %arg2[%c2_85, %c0_86, %c0_87] : memref<5x32x128xf32, #tpu.memory_space<vmem>>, vector<1x32x128xf32>
    %353 = vector.shape_cast %352 : vector<1x32x128xf32> to vector<32x128xf32>
    %cst_88 = arith.constant 0.000000e+00 : f32
    %354 = vector.broadcast %cst_88 : f32 to vector<2x32xf32>
    %cst_89 = arith.constant 0.000000e+00 : f32
    %355 = vector.broadcast %cst_89 : f32 to vector<2x32xf32>
    %cst_90 = arith.constant dense<0.000000e+00> : vector<2x128xf32>
    %356 = tpu.matmul %354, %353, %cst_90 {dimension_numbers = #tpu.dot_dimension_numbers<[1], [0], [0], [1], [0, 0, 1, 1], [], []>} : vector<2x32xf32>, vector<32x128xf32>, vector<2x128xf32> -> vector<2x128xf32>
    %357 = arith.addf %330, %356 : vector<2x128xf32>
    %358 = arith.negf %357 : vector<2x128xf32>
    %359 = math.exp %358 : vector<2x128xf32>
    %cst_91 = arith.constant 1.000000e+00 : f32
    %360 = vector.broadcast %cst_91 : f32 to vector<2x128xf32>
    %361 = arith.addf %360, %359 : vector<2x128xf32>
    %362 = arith.divf %360, %361 : vector<2x128xf32>
    %363 = math.tanh %357 : vector<2x128xf32>
    %364 = vector.extract_strided_slice %362 {offsets = [0, 0], sizes = [2, 32], strides = [1, 1]} : vector<2x128xf32> to vector<2x32xf32>
    %365 = vector.extract_strided_slice %362 {offsets = [0, 32], sizes = [2, 32], strides = [1, 1]} : vector<2x128xf32> to vector<2x32xf32>
    %366 = vector.extract_strided_slice %363 {offsets = [0, 64], sizes = [2, 32], strides = [1, 1]} : vector<2x128xf32> to vector<2x32xf32>
    %367 = vector.extract_strided_slice %362 {offsets = [0, 96], sizes = [2, 32], strides = [1, 1]} : vector<2x128xf32> to vector<2x32xf32>
    %368 = arith.mulf %365, %355 : vector<2x32xf32>
    %369 = arith.mulf %364, %366 : vector<2x32xf32>
    %370 = arith.addf %368, %369 : vector<2x32xf32>
    %371 = math.tanh %370 : vector<2x32xf32>
    %372 = arith.mulf %367, %371 : vector<2x32xf32>
    %cst_92 = arith.constant dense<0.000000e+00> : vector<2x128xf32>
    %373 = tpu.matmul %372, %353, %cst_92 {dimension_numbers = #tpu.dot_dimension_numbers<[1], [0], [0], [1], [0, 0, 1, 1], [], []>} : vector<2x32xf32>, vector<32x128xf32>, vector<2x128xf32> -> vector<2x128xf32>
    %374 = arith.addf %333, %373 : vector<2x128xf32>
    %375 = arith.negf %374 : vector<2x128xf32>
    %376 = math.exp %375 : vector<2x128xf32>
    %cst_93 = arith.constant 1.000000e+00 : f32
    %377 = vector.broadcast %cst_93 : f32 to vector<2x128xf32>
    %378 = arith.addf %377, %376 : vector<2x128xf32>
    %379 = arith.divf %377, %378 : vector<2x128xf32>
    %380 = math.tanh %374 : vector<2x128xf32>
    %381 = vector.extract_strided_slice %379 {offsets = [0, 0], sizes = [2, 32], strides = [1, 1]} : vector<2x128xf32> to vector<2x32xf32>
    %382 = vector.extract_strided_slice %379 {offsets = [0, 32], sizes = [2, 32], strides = [1, 1]} : vector<2x128xf32> to vector<2x32xf32>
    %383 = vector.extract_strided_slice %380 {offsets = [0, 64], sizes = [2, 32], strides = [1, 1]} : vector<2x128xf32> to vector<2x32xf32>
    %384 = vector.extract_strided_slice %379 {offsets = [0, 96], sizes = [2, 32], strides = [1, 1]} : vector<2x128xf32> to vector<2x32xf32>
    %385 = arith.mulf %382, %370 : vector<2x32xf32>
    %386 = arith.mulf %381, %383 : vector<2x32xf32>
    %387 = arith.addf %385, %386 : vector<2x32xf32>
    %388 = math.tanh %387 : vector<2x32xf32>
    %389 = arith.mulf %384, %388 : vector<2x32xf32>
    %cst_94 = arith.constant dense<0.000000e+00> : vector<2x128xf32>
    %390 = tpu.matmul %389, %353, %cst_94 {dimension_numbers = #tpu.dot_dimension_numbers<[1], [0], [0], [1], [0, 0, 1, 1], [], []>} : vector<2x32xf32>, vector<32x128xf32>, vector<2x128xf32> -> vector<2x128xf32>
    %391 = arith.addf %336, %390 : vector<2x128xf32>
    %392 = arith.negf %391 : vector<2x128xf32>
    %393 = math.exp %392 : vector<2x128xf32>
    %cst_95 = arith.constant 1.000000e+00 : f32
    %394 = vector.broadcast %cst_95 : f32 to vector<2x128xf32>
    %395 = arith.addf %394, %393 : vector<2x128xf32>
    %396 = arith.divf %394, %395 : vector<2x128xf32>
    %397 = math.tanh %391 : vector<2x128xf32>
    %398 = vector.extract_strided_slice %396 {offsets = [0, 0], sizes = [2, 32], strides = [1, 1]} : vector<2x128xf32> to vector<2x32xf32>
    %399 = vector.extract_strided_slice %396 {offsets = [0, 32], sizes = [2, 32], strides = [1, 1]} : vector<2x128xf32> to vector<2x32xf32>
    %400 = vector.extract_strided_slice %397 {offsets = [0, 64], sizes = [2, 32], strides = [1, 1]} : vector<2x128xf32> to vector<2x32xf32>
    %401 = vector.extract_strided_slice %396 {offsets = [0, 96], sizes = [2, 32], strides = [1, 1]} : vector<2x128xf32> to vector<2x32xf32>
    %402 = arith.mulf %399, %387 : vector<2x32xf32>
    %403 = arith.mulf %398, %400 : vector<2x32xf32>
    %404 = arith.addf %402, %403 : vector<2x32xf32>
    %405 = math.tanh %404 : vector<2x32xf32>
    %406 = arith.mulf %401, %405 : vector<2x32xf32>
    %cst_96 = arith.constant dense<0.000000e+00> : vector<2x128xf32>
    %407 = tpu.matmul %406, %353, %cst_96 {dimension_numbers = #tpu.dot_dimension_numbers<[1], [0], [0], [1], [0, 0, 1, 1], [], []>} : vector<2x32xf32>, vector<32x128xf32>, vector<2x128xf32> -> vector<2x128xf32>
    %408 = arith.addf %339, %407 : vector<2x128xf32>
    %409 = arith.negf %408 : vector<2x128xf32>
    %410 = math.exp %409 : vector<2x128xf32>
    %cst_97 = arith.constant 1.000000e+00 : f32
    %411 = vector.broadcast %cst_97 : f32 to vector<2x128xf32>
    %412 = arith.addf %411, %410 : vector<2x128xf32>
    %413 = arith.divf %411, %412 : vector<2x128xf32>
    %414 = math.tanh %408 : vector<2x128xf32>
    %415 = vector.extract_strided_slice %413 {offsets = [0, 0], sizes = [2, 32], strides = [1, 1]} : vector<2x128xf32> to vector<2x32xf32>
    %416 = vector.extract_strided_slice %413 {offsets = [0, 32], sizes = [2, 32], strides = [1, 1]} : vector<2x128xf32> to vector<2x32xf32>
    %417 = vector.extract_strided_slice %414 {offsets = [0, 64], sizes = [2, 32], strides = [1, 1]} : vector<2x128xf32> to vector<2x32xf32>
    %418 = vector.extract_strided_slice %413 {offsets = [0, 96], sizes = [2, 32], strides = [1, 1]} : vector<2x128xf32> to vector<2x32xf32>
    %419 = arith.mulf %416, %404 : vector<2x32xf32>
    %420 = arith.mulf %415, %417 : vector<2x32xf32>
    %421 = arith.addf %419, %420 : vector<2x32xf32>
    %422 = math.tanh %421 : vector<2x32xf32>
    %423 = arith.mulf %418, %422 : vector<2x32xf32>
    %cst_98 = arith.constant dense<0.000000e+00> : vector<2x128xf32>
    %424 = tpu.matmul %423, %353, %cst_98 {dimension_numbers = #tpu.dot_dimension_numbers<[1], [0], [0], [1], [0, 0, 1, 1], [], []>} : vector<2x32xf32>, vector<32x128xf32>, vector<2x128xf32> -> vector<2x128xf32>
    %425 = arith.addf %342, %424 : vector<2x128xf32>
    %426 = arith.negf %425 : vector<2x128xf32>
    %427 = math.exp %426 : vector<2x128xf32>
    %cst_99 = arith.constant 1.000000e+00 : f32
    %428 = vector.broadcast %cst_99 : f32 to vector<2x128xf32>
    %429 = arith.addf %428, %427 : vector<2x128xf32>
    %430 = arith.divf %428, %429 : vector<2x128xf32>
    %431 = math.tanh %425 : vector<2x128xf32>
    %432 = vector.extract_strided_slice %430 {offsets = [0, 0], sizes = [2, 32], strides = [1, 1]} : vector<2x128xf32> to vector<2x32xf32>
    %433 = vector.extract_strided_slice %430 {offsets = [0, 32], sizes = [2, 32], strides = [1, 1]} : vector<2x128xf32> to vector<2x32xf32>
    %434 = vector.extract_strided_slice %431 {offsets = [0, 64], sizes = [2, 32], strides = [1, 1]} : vector<2x128xf32> to vector<2x32xf32>
    %435 = vector.extract_strided_slice %430 {offsets = [0, 96], sizes = [2, 32], strides = [1, 1]} : vector<2x128xf32> to vector<2x32xf32>
    %436 = arith.mulf %433, %421 : vector<2x32xf32>
    %437 = arith.mulf %432, %434 : vector<2x32xf32>
    %438 = arith.addf %436, %437 : vector<2x32xf32>
    %439 = math.tanh %438 : vector<2x32xf32>
    %440 = arith.mulf %435, %439 : vector<2x32xf32>
    %cst_100 = arith.constant dense<0.000000e+00> : vector<2x128xf32>
    %441 = tpu.matmul %440, %353, %cst_100 {dimension_numbers = #tpu.dot_dimension_numbers<[1], [0], [0], [1], [0, 0, 1, 1], [], []>} : vector<2x32xf32>, vector<32x128xf32>, vector<2x128xf32> -> vector<2x128xf32>
    %442 = arith.addf %345, %441 : vector<2x128xf32>
    %443 = arith.negf %442 : vector<2x128xf32>
    %444 = math.exp %443 : vector<2x128xf32>
    %cst_101 = arith.constant 1.000000e+00 : f32
    %445 = vector.broadcast %cst_101 : f32 to vector<2x128xf32>
    %446 = arith.addf %445, %444 : vector<2x128xf32>
    %447 = arith.divf %445, %446 : vector<2x128xf32>
    %448 = math.tanh %442 : vector<2x128xf32>
    %449 = vector.extract_strided_slice %447 {offsets = [0, 0], sizes = [2, 32], strides = [1, 1]} : vector<2x128xf32> to vector<2x32xf32>
    %450 = vector.extract_strided_slice %447 {offsets = [0, 32], sizes = [2, 32], strides = [1, 1]} : vector<2x128xf32> to vector<2x32xf32>
    %451 = vector.extract_strided_slice %448 {offsets = [0, 64], sizes = [2, 32], strides = [1, 1]} : vector<2x128xf32> to vector<2x32xf32>
    %452 = vector.extract_strided_slice %447 {offsets = [0, 96], sizes = [2, 32], strides = [1, 1]} : vector<2x128xf32> to vector<2x32xf32>
    %453 = arith.mulf %450, %438 : vector<2x32xf32>
    %454 = arith.mulf %449, %451 : vector<2x32xf32>
    %455 = arith.addf %453, %454 : vector<2x32xf32>
    %456 = math.tanh %455 : vector<2x32xf32>
    %457 = arith.mulf %452, %456 : vector<2x32xf32>
    %cst_102 = arith.constant dense<0.000000e+00> : vector<2x128xf32>
    %458 = tpu.matmul %457, %353, %cst_102 {dimension_numbers = #tpu.dot_dimension_numbers<[1], [0], [0], [1], [0, 0, 1, 1], [], []>} : vector<2x32xf32>, vector<32x128xf32>, vector<2x128xf32> -> vector<2x128xf32>
    %459 = arith.addf %348, %458 : vector<2x128xf32>
    %460 = arith.negf %459 : vector<2x128xf32>
    %461 = math.exp %460 : vector<2x128xf32>
    %cst_103 = arith.constant 1.000000e+00 : f32
    %462 = vector.broadcast %cst_103 : f32 to vector<2x128xf32>
    %463 = arith.addf %462, %461 : vector<2x128xf32>
    %464 = arith.divf %462, %463 : vector<2x128xf32>
    %465 = math.tanh %459 : vector<2x128xf32>
    %466 = vector.extract_strided_slice %464 {offsets = [0, 0], sizes = [2, 32], strides = [1, 1]} : vector<2x128xf32> to vector<2x32xf32>
    %467 = vector.extract_strided_slice %464 {offsets = [0, 32], sizes = [2, 32], strides = [1, 1]} : vector<2x128xf32> to vector<2x32xf32>
    %468 = vector.extract_strided_slice %465 {offsets = [0, 64], sizes = [2, 32], strides = [1, 1]} : vector<2x128xf32> to vector<2x32xf32>
    %469 = vector.extract_strided_slice %464 {offsets = [0, 96], sizes = [2, 32], strides = [1, 1]} : vector<2x128xf32> to vector<2x32xf32>
    %470 = arith.mulf %467, %455 : vector<2x32xf32>
    %471 = arith.mulf %466, %468 : vector<2x32xf32>
    %472 = arith.addf %470, %471 : vector<2x32xf32>
    %473 = math.tanh %472 : vector<2x32xf32>
    %474 = arith.mulf %469, %473 : vector<2x32xf32>
    %cst_104 = arith.constant dense<0.000000e+00> : vector<2x128xf32>
    %475 = tpu.matmul %474, %353, %cst_104 {dimension_numbers = #tpu.dot_dimension_numbers<[1], [0], [0], [1], [0, 0, 1, 1], [], []>} : vector<2x32xf32>, vector<32x128xf32>, vector<2x128xf32> -> vector<2x128xf32>
    %476 = arith.addf %351, %475 : vector<2x128xf32>
    %477 = arith.negf %476 : vector<2x128xf32>
    %478 = math.exp %477 : vector<2x128xf32>
    %cst_105 = arith.constant 1.000000e+00 : f32
    %479 = vector.broadcast %cst_105 : f32 to vector<2x128xf32>
    %480 = arith.addf %479, %478 : vector<2x128xf32>
    %481 = arith.divf %479, %480 : vector<2x128xf32>
    %482 = math.tanh %476 : vector<2x128xf32>
    %483 = vector.extract_strided_slice %481 {offsets = [0, 0], sizes = [2, 32], strides = [1, 1]} : vector<2x128xf32> to vector<2x32xf32>
    %484 = vector.extract_strided_slice %481 {offsets = [0, 32], sizes = [2, 32], strides = [1, 1]} : vector<2x128xf32> to vector<2x32xf32>
    %485 = vector.extract_strided_slice %482 {offsets = [0, 64], sizes = [2, 32], strides = [1, 1]} : vector<2x128xf32> to vector<2x32xf32>
    %486 = vector.extract_strided_slice %481 {offsets = [0, 96], sizes = [2, 32], strides = [1, 1]} : vector<2x128xf32> to vector<2x32xf32>
    %487 = arith.mulf %484, %472 : vector<2x32xf32>
    %488 = arith.mulf %483, %485 : vector<2x32xf32>
    %489 = arith.addf %487, %488 : vector<2x32xf32>
    %490 = math.tanh %489 : vector<2x32xf32>
    %491 = arith.mulf %486, %490 : vector<2x32xf32>
    %c2_106 = arith.constant 2 : index
    %c0_107 = arith.constant 0 : index
    %c0_108 = arith.constant 0 : index
    %492 = vector.load %arg1[%c2_106, %c0_107, %c0_108] : memref<4x32x128xf32, #tpu.memory_space<vmem>>, vector<1x32x128xf32>
    %493 = vector.shape_cast %492 : vector<1x32x128xf32> to vector<32x128xf32>
    %c2_109 = arith.constant 2 : index
    %c0_110 = arith.constant 0 : index
    %c0_111 = arith.constant 0 : index
    %494 = vector.load %arg3[%c2_109, %c0_110, %c0_111] : memref<4x1x128xf32, #tpu.memory_space<vmem>>, vector<1x1x128xf32>
    %495 = vector.shape_cast %494 : vector<1x1x128xf32> to vector<1x128xf32>
    %cst_112 = arith.constant dense<0.000000e+00> : vector<2x128xf32>
    %496 = tpu.matmul %372, %493, %cst_112 {dimension_numbers = #tpu.dot_dimension_numbers<[1], [0], [0], [1], [0, 0, 1, 1], [], []>} : vector<2x32xf32>, vector<32x128xf32>, vector<2x128xf32> -> vector<2x128xf32>
    %497 = vector.broadcast %495 : vector<1x128xf32> to vector<2x128xf32>
    %498 = arith.addf %496, %497 : vector<2x128xf32>
    %cst_113 = arith.constant dense<0.000000e+00> : vector<2x128xf32>
    %499 = tpu.matmul %389, %493, %cst_113 {dimension_numbers = #tpu.dot_dimension_numbers<[1], [0], [0], [1], [0, 0, 1, 1], [], []>} : vector<2x32xf32>, vector<32x128xf32>, vector<2x128xf32> -> vector<2x128xf32>
    %500 = vector.broadcast %495 : vector<1x128xf32> to vector<2x128xf32>
    %501 = arith.addf %499, %500 : vector<2x128xf32>
    %cst_114 = arith.constant dense<0.000000e+00> : vector<2x128xf32>
    %502 = tpu.matmul %406, %493, %cst_114 {dimension_numbers = #tpu.dot_dimension_numbers<[1], [0], [0], [1], [0, 0, 1, 1], [], []>} : vector<2x32xf32>, vector<32x128xf32>, vector<2x128xf32> -> vector<2x128xf32>
    %503 = vector.broadcast %495 : vector<1x128xf32> to vector<2x128xf32>
    %504 = arith.addf %502, %503 : vector<2x128xf32>
    %cst_115 = arith.constant dense<0.000000e+00> : vector<2x128xf32>
    %505 = tpu.matmul %423, %493, %cst_115 {dimension_numbers = #tpu.dot_dimension_numbers<[1], [0], [0], [1], [0, 0, 1, 1], [], []>} : vector<2x32xf32>, vector<32x128xf32>, vector<2x128xf32> -> vector<2x128xf32>
    %506 = vector.broadcast %495 : vector<1x128xf32> to vector<2x128xf32>
    %507 = arith.addf %505, %506 : vector<2x128xf32>
    %cst_116 = arith.constant dense<0.000000e+00> : vector<2x128xf32>
    %508 = tpu.matmul %440, %493, %cst_116 {dimension_numbers = #tpu.dot_dimension_numbers<[1], [0], [0], [1], [0, 0, 1, 1], [], []>} : vector<2x32xf32>, vector<32x128xf32>, vector<2x128xf32> -> vector<2x128xf32>
    %509 = vector.broadcast %495 : vector<1x128xf32> to vector<2x128xf32>
    %510 = arith.addf %508, %509 : vector<2x128xf32>
    %cst_117 = arith.constant dense<0.000000e+00> : vector<2x128xf32>
    %511 = tpu.matmul %457, %493, %cst_117 {dimension_numbers = #tpu.dot_dimension_numbers<[1], [0], [0], [1], [0, 0, 1, 1], [], []>} : vector<2x32xf32>, vector<32x128xf32>, vector<2x128xf32> -> vector<2x128xf32>
    %512 = vector.broadcast %495 : vector<1x128xf32> to vector<2x128xf32>
    %513 = arith.addf %511, %512 : vector<2x128xf32>
    %cst_118 = arith.constant dense<0.000000e+00> : vector<2x128xf32>
    %514 = tpu.matmul %474, %493, %cst_118 {dimension_numbers = #tpu.dot_dimension_numbers<[1], [0], [0], [1], [0, 0, 1, 1], [], []>} : vector<2x32xf32>, vector<32x128xf32>, vector<2x128xf32> -> vector<2x128xf32>
    %515 = vector.broadcast %495 : vector<1x128xf32> to vector<2x128xf32>
    %516 = arith.addf %514, %515 : vector<2x128xf32>
    %cst_119 = arith.constant dense<0.000000e+00> : vector<2x128xf32>
    %517 = tpu.matmul %491, %493, %cst_119 {dimension_numbers = #tpu.dot_dimension_numbers<[1], [0], [0], [1], [0, 0, 1, 1], [], []>} : vector<2x32xf32>, vector<32x128xf32>, vector<2x128xf32> -> vector<2x128xf32>
    %518 = vector.broadcast %495 : vector<1x128xf32> to vector<2x128xf32>
    %519 = arith.addf %517, %518 : vector<2x128xf32>
    %c3_120 = arith.constant 3 : index
    %c0_121 = arith.constant 0 : index
    %c0_122 = arith.constant 0 : index
    %520 = vector.load %arg2[%c3_120, %c0_121, %c0_122] : memref<5x32x128xf32, #tpu.memory_space<vmem>>, vector<1x32x128xf32>
    %521 = vector.shape_cast %520 : vector<1x32x128xf32> to vector<32x128xf32>
    %cst_123 = arith.constant 0.000000e+00 : f32
    %522 = vector.broadcast %cst_123 : f32 to vector<2x32xf32>
    %cst_124 = arith.constant 0.000000e+00 : f32
    %523 = vector.broadcast %cst_124 : f32 to vector<2x32xf32>
    %cst_125 = arith.constant dense<0.000000e+00> : vector<2x128xf32>
    %524 = tpu.matmul %522, %521, %cst_125 {dimension_numbers = #tpu.dot_dimension_numbers<[1], [0], [0], [1], [0, 0, 1, 1], [], []>} : vector<2x32xf32>, vector<32x128xf32>, vector<2x128xf32> -> vector<2x128xf32>
    %525 = arith.addf %498, %524 : vector<2x128xf32>
    %526 = arith.negf %525 : vector<2x128xf32>
    %527 = math.exp %526 : vector<2x128xf32>
    %cst_126 = arith.constant 1.000000e+00 : f32
    %528 = vector.broadcast %cst_126 : f32 to vector<2x128xf32>
    %529 = arith.addf %528, %527 : vector<2x128xf32>
    %530 = arith.divf %528, %529 : vector<2x128xf32>
    %531 = math.tanh %525 : vector<2x128xf32>
    %532 = vector.extract_strided_slice %530 {offsets = [0, 0], sizes = [2, 32], strides = [1, 1]} : vector<2x128xf32> to vector<2x32xf32>
    %533 = vector.extract_strided_slice %530 {offsets = [0, 32], sizes = [2, 32], strides = [1, 1]} : vector<2x128xf32> to vector<2x32xf32>
    %534 = vector.extract_strided_slice %531 {offsets = [0, 64], sizes = [2, 32], strides = [1, 1]} : vector<2x128xf32> to vector<2x32xf32>
    %535 = vector.extract_strided_slice %530 {offsets = [0, 96], sizes = [2, 32], strides = [1, 1]} : vector<2x128xf32> to vector<2x32xf32>
    %536 = arith.mulf %533, %523 : vector<2x32xf32>
    %537 = arith.mulf %532, %534 : vector<2x32xf32>
    %538 = arith.addf %536, %537 : vector<2x32xf32>
    %539 = math.tanh %538 : vector<2x32xf32>
    %540 = arith.mulf %535, %539 : vector<2x32xf32>
    %cst_127 = arith.constant dense<0.000000e+00> : vector<2x128xf32>
    %541 = tpu.matmul %540, %521, %cst_127 {dimension_numbers = #tpu.dot_dimension_numbers<[1], [0], [0], [1], [0, 0, 1, 1], [], []>} : vector<2x32xf32>, vector<32x128xf32>, vector<2x128xf32> -> vector<2x128xf32>
    %542 = arith.addf %501, %541 : vector<2x128xf32>
    %543 = arith.negf %542 : vector<2x128xf32>
    %544 = math.exp %543 : vector<2x128xf32>
    %cst_128 = arith.constant 1.000000e+00 : f32
    %545 = vector.broadcast %cst_128 : f32 to vector<2x128xf32>
    %546 = arith.addf %545, %544 : vector<2x128xf32>
    %547 = arith.divf %545, %546 : vector<2x128xf32>
    %548 = math.tanh %542 : vector<2x128xf32>
    %549 = vector.extract_strided_slice %547 {offsets = [0, 0], sizes = [2, 32], strides = [1, 1]} : vector<2x128xf32> to vector<2x32xf32>
    %550 = vector.extract_strided_slice %547 {offsets = [0, 32], sizes = [2, 32], strides = [1, 1]} : vector<2x128xf32> to vector<2x32xf32>
    %551 = vector.extract_strided_slice %548 {offsets = [0, 64], sizes = [2, 32], strides = [1, 1]} : vector<2x128xf32> to vector<2x32xf32>
    %552 = vector.extract_strided_slice %547 {offsets = [0, 96], sizes = [2, 32], strides = [1, 1]} : vector<2x128xf32> to vector<2x32xf32>
    %553 = arith.mulf %550, %538 : vector<2x32xf32>
    %554 = arith.mulf %549, %551 : vector<2x32xf32>
    %555 = arith.addf %553, %554 : vector<2x32xf32>
    %556 = math.tanh %555 : vector<2x32xf32>
    %557 = arith.mulf %552, %556 : vector<2x32xf32>
    %cst_129 = arith.constant dense<0.000000e+00> : vector<2x128xf32>
    %558 = tpu.matmul %557, %521, %cst_129 {dimension_numbers = #tpu.dot_dimension_numbers<[1], [0], [0], [1], [0, 0, 1, 1], [], []>} : vector<2x32xf32>, vector<32x128xf32>, vector<2x128xf32> -> vector<2x128xf32>
    %559 = arith.addf %504, %558 : vector<2x128xf32>
    %560 = arith.negf %559 : vector<2x128xf32>
    %561 = math.exp %560 : vector<2x128xf32>
    %cst_130 = arith.constant 1.000000e+00 : f32
    %562 = vector.broadcast %cst_130 : f32 to vector<2x128xf32>
    %563 = arith.addf %562, %561 : vector<2x128xf32>
    %564 = arith.divf %562, %563 : vector<2x128xf32>
    %565 = math.tanh %559 : vector<2x128xf32>
    %566 = vector.extract_strided_slice %564 {offsets = [0, 0], sizes = [2, 32], strides = [1, 1]} : vector<2x128xf32> to vector<2x32xf32>
    %567 = vector.extract_strided_slice %564 {offsets = [0, 32], sizes = [2, 32], strides = [1, 1]} : vector<2x128xf32> to vector<2x32xf32>
    %568 = vector.extract_strided_slice %565 {offsets = [0, 64], sizes = [2, 32], strides = [1, 1]} : vector<2x128xf32> to vector<2x32xf32>
    %569 = vector.extract_strided_slice %564 {offsets = [0, 96], sizes = [2, 32], strides = [1, 1]} : vector<2x128xf32> to vector<2x32xf32>
    %570 = arith.mulf %567, %555 : vector<2x32xf32>
    %571 = arith.mulf %566, %568 : vector<2x32xf32>
    %572 = arith.addf %570, %571 : vector<2x32xf32>
    %573 = math.tanh %572 : vector<2x32xf32>
    %574 = arith.mulf %569, %573 : vector<2x32xf32>
    %cst_131 = arith.constant dense<0.000000e+00> : vector<2x128xf32>
    %575 = tpu.matmul %574, %521, %cst_131 {dimension_numbers = #tpu.dot_dimension_numbers<[1], [0], [0], [1], [0, 0, 1, 1], [], []>} : vector<2x32xf32>, vector<32x128xf32>, vector<2x128xf32> -> vector<2x128xf32>
    %576 = arith.addf %507, %575 : vector<2x128xf32>
    %577 = arith.negf %576 : vector<2x128xf32>
    %578 = math.exp %577 : vector<2x128xf32>
    %cst_132 = arith.constant 1.000000e+00 : f32
    %579 = vector.broadcast %cst_132 : f32 to vector<2x128xf32>
    %580 = arith.addf %579, %578 : vector<2x128xf32>
    %581 = arith.divf %579, %580 : vector<2x128xf32>
    %582 = math.tanh %576 : vector<2x128xf32>
    %583 = vector.extract_strided_slice %581 {offsets = [0, 0], sizes = [2, 32], strides = [1, 1]} : vector<2x128xf32> to vector<2x32xf32>
    %584 = vector.extract_strided_slice %581 {offsets = [0, 32], sizes = [2, 32], strides = [1, 1]} : vector<2x128xf32> to vector<2x32xf32>
    %585 = vector.extract_strided_slice %582 {offsets = [0, 64], sizes = [2, 32], strides = [1, 1]} : vector<2x128xf32> to vector<2x32xf32>
    %586 = vector.extract_strided_slice %581 {offsets = [0, 96], sizes = [2, 32], strides = [1, 1]} : vector<2x128xf32> to vector<2x32xf32>
    %587 = arith.mulf %584, %572 : vector<2x32xf32>
    %588 = arith.mulf %583, %585 : vector<2x32xf32>
    %589 = arith.addf %587, %588 : vector<2x32xf32>
    %590 = math.tanh %589 : vector<2x32xf32>
    %591 = arith.mulf %586, %590 : vector<2x32xf32>
    %cst_133 = arith.constant dense<0.000000e+00> : vector<2x128xf32>
    %592 = tpu.matmul %591, %521, %cst_133 {dimension_numbers = #tpu.dot_dimension_numbers<[1], [0], [0], [1], [0, 0, 1, 1], [], []>} : vector<2x32xf32>, vector<32x128xf32>, vector<2x128xf32> -> vector<2x128xf32>
    %593 = arith.addf %510, %592 : vector<2x128xf32>
    %594 = arith.negf %593 : vector<2x128xf32>
    %595 = math.exp %594 : vector<2x128xf32>
    %cst_134 = arith.constant 1.000000e+00 : f32
    %596 = vector.broadcast %cst_134 : f32 to vector<2x128xf32>
    %597 = arith.addf %596, %595 : vector<2x128xf32>
    %598 = arith.divf %596, %597 : vector<2x128xf32>
    %599 = math.tanh %593 : vector<2x128xf32>
    %600 = vector.extract_strided_slice %598 {offsets = [0, 0], sizes = [2, 32], strides = [1, 1]} : vector<2x128xf32> to vector<2x32xf32>
    %601 = vector.extract_strided_slice %598 {offsets = [0, 32], sizes = [2, 32], strides = [1, 1]} : vector<2x128xf32> to vector<2x32xf32>
    %602 = vector.extract_strided_slice %599 {offsets = [0, 64], sizes = [2, 32], strides = [1, 1]} : vector<2x128xf32> to vector<2x32xf32>
    %603 = vector.extract_strided_slice %598 {offsets = [0, 96], sizes = [2, 32], strides = [1, 1]} : vector<2x128xf32> to vector<2x32xf32>
    %604 = arith.mulf %601, %589 : vector<2x32xf32>
    %605 = arith.mulf %600, %602 : vector<2x32xf32>
    %606 = arith.addf %604, %605 : vector<2x32xf32>
    %607 = math.tanh %606 : vector<2x32xf32>
    %608 = arith.mulf %603, %607 : vector<2x32xf32>
    %cst_135 = arith.constant dense<0.000000e+00> : vector<2x128xf32>
    %609 = tpu.matmul %608, %521, %cst_135 {dimension_numbers = #tpu.dot_dimension_numbers<[1], [0], [0], [1], [0, 0, 1, 1], [], []>} : vector<2x32xf32>, vector<32x128xf32>, vector<2x128xf32> -> vector<2x128xf32>
    %610 = arith.addf %513, %609 : vector<2x128xf32>
    %611 = arith.negf %610 : vector<2x128xf32>
    %612 = math.exp %611 : vector<2x128xf32>
    %cst_136 = arith.constant 1.000000e+00 : f32
    %613 = vector.broadcast %cst_136 : f32 to vector<2x128xf32>
    %614 = arith.addf %613, %612 : vector<2x128xf32>
    %615 = arith.divf %613, %614 : vector<2x128xf32>
    %616 = math.tanh %610 : vector<2x128xf32>
    %617 = vector.extract_strided_slice %615 {offsets = [0, 0], sizes = [2, 32], strides = [1, 1]} : vector<2x128xf32> to vector<2x32xf32>
    %618 = vector.extract_strided_slice %615 {offsets = [0, 32], sizes = [2, 32], strides = [1, 1]} : vector<2x128xf32> to vector<2x32xf32>
    %619 = vector.extract_strided_slice %616 {offsets = [0, 64], sizes = [2, 32], strides = [1, 1]} : vector<2x128xf32> to vector<2x32xf32>
    %620 = vector.extract_strided_slice %615 {offsets = [0, 96], sizes = [2, 32], strides = [1, 1]} : vector<2x128xf32> to vector<2x32xf32>
    %621 = arith.mulf %618, %606 : vector<2x32xf32>
    %622 = arith.mulf %617, %619 : vector<2x32xf32>
    %623 = arith.addf %621, %622 : vector<2x32xf32>
    %624 = math.tanh %623 : vector<2x32xf32>
    %625 = arith.mulf %620, %624 : vector<2x32xf32>
    %cst_137 = arith.constant dense<0.000000e+00> : vector<2x128xf32>
    %626 = tpu.matmul %625, %521, %cst_137 {dimension_numbers = #tpu.dot_dimension_numbers<[1], [0], [0], [1], [0, 0, 1, 1], [], []>} : vector<2x32xf32>, vector<32x128xf32>, vector<2x128xf32> -> vector<2x128xf32>
    %627 = arith.addf %516, %626 : vector<2x128xf32>
    %628 = arith.negf %627 : vector<2x128xf32>
    %629 = math.exp %628 : vector<2x128xf32>
    %cst_138 = arith.constant 1.000000e+00 : f32
    %630 = vector.broadcast %cst_138 : f32 to vector<2x128xf32>
    %631 = arith.addf %630, %629 : vector<2x128xf32>
    %632 = arith.divf %630, %631 : vector<2x128xf32>
    %633 = math.tanh %627 : vector<2x128xf32>
    %634 = vector.extract_strided_slice %632 {offsets = [0, 0], sizes = [2, 32], strides = [1, 1]} : vector<2x128xf32> to vector<2x32xf32>
    %635 = vector.extract_strided_slice %632 {offsets = [0, 32], sizes = [2, 32], strides = [1, 1]} : vector<2x128xf32> to vector<2x32xf32>
    %636 = vector.extract_strided_slice %633 {offsets = [0, 64], sizes = [2, 32], strides = [1, 1]} : vector<2x128xf32> to vector<2x32xf32>
    %637 = vector.extract_strided_slice %632 {offsets = [0, 96], sizes = [2, 32], strides = [1, 1]} : vector<2x128xf32> to vector<2x32xf32>
    %638 = arith.mulf %635, %623 : vector<2x32xf32>
    %639 = arith.mulf %634, %636 : vector<2x32xf32>
    %640 = arith.addf %638, %639 : vector<2x32xf32>
    %641 = math.tanh %640 : vector<2x32xf32>
    %642 = arith.mulf %637, %641 : vector<2x32xf32>
    %cst_139 = arith.constant dense<0.000000e+00> : vector<2x128xf32>
    %643 = tpu.matmul %642, %521, %cst_139 {dimension_numbers = #tpu.dot_dimension_numbers<[1], [0], [0], [1], [0, 0, 1, 1], [], []>} : vector<2x32xf32>, vector<32x128xf32>, vector<2x128xf32> -> vector<2x128xf32>
    %644 = arith.addf %519, %643 : vector<2x128xf32>
    %645 = arith.negf %644 : vector<2x128xf32>
    %646 = math.exp %645 : vector<2x128xf32>
    %cst_140 = arith.constant 1.000000e+00 : f32
    %647 = vector.broadcast %cst_140 : f32 to vector<2x128xf32>
    %648 = arith.addf %647, %646 : vector<2x128xf32>
    %649 = arith.divf %647, %648 : vector<2x128xf32>
    %650 = math.tanh %644 : vector<2x128xf32>
    %651 = vector.extract_strided_slice %649 {offsets = [0, 0], sizes = [2, 32], strides = [1, 1]} : vector<2x128xf32> to vector<2x32xf32>
    %652 = vector.extract_strided_slice %649 {offsets = [0, 32], sizes = [2, 32], strides = [1, 1]} : vector<2x128xf32> to vector<2x32xf32>
    %653 = vector.extract_strided_slice %650 {offsets = [0, 64], sizes = [2, 32], strides = [1, 1]} : vector<2x128xf32> to vector<2x32xf32>
    %654 = vector.extract_strided_slice %649 {offsets = [0, 96], sizes = [2, 32], strides = [1, 1]} : vector<2x128xf32> to vector<2x32xf32>
    %655 = arith.mulf %652, %640 : vector<2x32xf32>
    %656 = arith.mulf %651, %653 : vector<2x32xf32>
    %657 = arith.addf %655, %656 : vector<2x32xf32>
    %658 = math.tanh %657 : vector<2x32xf32>
    %659 = arith.mulf %654, %658 : vector<2x32xf32>
    %c3_141 = arith.constant 3 : index
    %c0_142 = arith.constant 0 : index
    %c0_143 = arith.constant 0 : index
    %660 = vector.load %arg1[%c3_141, %c0_142, %c0_143] : memref<4x32x128xf32, #tpu.memory_space<vmem>>, vector<1x32x128xf32>
    %661 = vector.shape_cast %660 : vector<1x32x128xf32> to vector<32x128xf32>
    %c3_144 = arith.constant 3 : index
    %c0_145 = arith.constant 0 : index
    %c0_146 = arith.constant 0 : index
    %662 = vector.load %arg3[%c3_144, %c0_145, %c0_146] : memref<4x1x128xf32, #tpu.memory_space<vmem>>, vector<1x1x128xf32>
    %663 = vector.shape_cast %662 : vector<1x1x128xf32> to vector<1x128xf32>
    %cst_147 = arith.constant dense<0.000000e+00> : vector<2x128xf32>
    %664 = tpu.matmul %540, %661, %cst_147 {dimension_numbers = #tpu.dot_dimension_numbers<[1], [0], [0], [1], [0, 0, 1, 1], [], []>} : vector<2x32xf32>, vector<32x128xf32>, vector<2x128xf32> -> vector<2x128xf32>
    %665 = vector.broadcast %663 : vector<1x128xf32> to vector<2x128xf32>
    %666 = arith.addf %664, %665 : vector<2x128xf32>
    %cst_148 = arith.constant dense<0.000000e+00> : vector<2x128xf32>
    %667 = tpu.matmul %557, %661, %cst_148 {dimension_numbers = #tpu.dot_dimension_numbers<[1], [0], [0], [1], [0, 0, 1, 1], [], []>} : vector<2x32xf32>, vector<32x128xf32>, vector<2x128xf32> -> vector<2x128xf32>
    %668 = vector.broadcast %663 : vector<1x128xf32> to vector<2x128xf32>
    %669 = arith.addf %667, %668 : vector<2x128xf32>
    %cst_149 = arith.constant dense<0.000000e+00> : vector<2x128xf32>
    %670 = tpu.matmul %574, %661, %cst_149 {dimension_numbers = #tpu.dot_dimension_numbers<[1], [0], [0], [1], [0, 0, 1, 1], [], []>} : vector<2x32xf32>, vector<32x128xf32>, vector<2x128xf32> -> vector<2x128xf32>
    %671 = vector.broadcast %663 : vector<1x128xf32> to vector<2x128xf32>
    %672 = arith.addf %670, %671 : vector<2x128xf32>
    %cst_150 = arith.constant dense<0.000000e+00> : vector<2x128xf32>
    %673 = tpu.matmul %591, %661, %cst_150 {dimension_numbers = #tpu.dot_dimension_numbers<[1], [0], [0], [1], [0, 0, 1, 1], [], []>} : vector<2x32xf32>, vector<32x128xf32>, vector<2x128xf32> -> vector<2x128xf32>
    %674 = vector.broadcast %663 : vector<1x128xf32> to vector<2x128xf32>
    %675 = arith.addf %673, %674 : vector<2x128xf32>
    %cst_151 = arith.constant dense<0.000000e+00> : vector<2x128xf32>
    %676 = tpu.matmul %608, %661, %cst_151 {dimension_numbers = #tpu.dot_dimension_numbers<[1], [0], [0], [1], [0, 0, 1, 1], [], []>} : vector<2x32xf32>, vector<32x128xf32>, vector<2x128xf32> -> vector<2x128xf32>
    %677 = vector.broadcast %663 : vector<1x128xf32> to vector<2x128xf32>
    %678 = arith.addf %676, %677 : vector<2x128xf32>
    %cst_152 = arith.constant dense<0.000000e+00> : vector<2x128xf32>
    %679 = tpu.matmul %625, %661, %cst_152 {dimension_numbers = #tpu.dot_dimension_numbers<[1], [0], [0], [1], [0, 0, 1, 1], [], []>} : vector<2x32xf32>, vector<32x128xf32>, vector<2x128xf32> -> vector<2x128xf32>
    %680 = vector.broadcast %663 : vector<1x128xf32> to vector<2x128xf32>
    %681 = arith.addf %679, %680 : vector<2x128xf32>
    %cst_153 = arith.constant dense<0.000000e+00> : vector<2x128xf32>
    %682 = tpu.matmul %642, %661, %cst_153 {dimension_numbers = #tpu.dot_dimension_numbers<[1], [0], [0], [1], [0, 0, 1, 1], [], []>} : vector<2x32xf32>, vector<32x128xf32>, vector<2x128xf32> -> vector<2x128xf32>
    %683 = vector.broadcast %663 : vector<1x128xf32> to vector<2x128xf32>
    %684 = arith.addf %682, %683 : vector<2x128xf32>
    %cst_154 = arith.constant dense<0.000000e+00> : vector<2x128xf32>
    %685 = tpu.matmul %659, %661, %cst_154 {dimension_numbers = #tpu.dot_dimension_numbers<[1], [0], [0], [1], [0, 0, 1, 1], [], []>} : vector<2x32xf32>, vector<32x128xf32>, vector<2x128xf32> -> vector<2x128xf32>
    %686 = vector.broadcast %663 : vector<1x128xf32> to vector<2x128xf32>
    %687 = arith.addf %685, %686 : vector<2x128xf32>
    %c4_155 = arith.constant 4 : index
    %c0_156 = arith.constant 0 : index
    %c0_157 = arith.constant 0 : index
    %688 = vector.load %arg2[%c4_155, %c0_156, %c0_157] : memref<5x32x128xf32, #tpu.memory_space<vmem>>, vector<1x32x128xf32>
    %689 = vector.shape_cast %688 : vector<1x32x128xf32> to vector<32x128xf32>
    %cst_158 = arith.constant 0.000000e+00 : f32
    %690 = vector.broadcast %cst_158 : f32 to vector<2x32xf32>
    %cst_159 = arith.constant 0.000000e+00 : f32
    %691 = vector.broadcast %cst_159 : f32 to vector<2x32xf32>
    %cst_160 = arith.constant dense<0.000000e+00> : vector<2x128xf32>
    %692 = tpu.matmul %690, %689, %cst_160 {dimension_numbers = #tpu.dot_dimension_numbers<[1], [0], [0], [1], [0, 0, 1, 1], [], []>} : vector<2x32xf32>, vector<32x128xf32>, vector<2x128xf32> -> vector<2x128xf32>
    %693 = arith.addf %666, %692 : vector<2x128xf32>
    %694 = arith.negf %693 : vector<2x128xf32>
    %695 = math.exp %694 : vector<2x128xf32>
    %cst_161 = arith.constant 1.000000e+00 : f32
    %696 = vector.broadcast %cst_161 : f32 to vector<2x128xf32>
    %697 = arith.addf %696, %695 : vector<2x128xf32>
    %698 = arith.divf %696, %697 : vector<2x128xf32>
    %699 = math.tanh %693 : vector<2x128xf32>
    %700 = vector.extract_strided_slice %698 {offsets = [0, 0], sizes = [2, 32], strides = [1, 1]} : vector<2x128xf32> to vector<2x32xf32>
    %701 = vector.extract_strided_slice %698 {offsets = [0, 32], sizes = [2, 32], strides = [1, 1]} : vector<2x128xf32> to vector<2x32xf32>
    %702 = vector.extract_strided_slice %699 {offsets = [0, 64], sizes = [2, 32], strides = [1, 1]} : vector<2x128xf32> to vector<2x32xf32>
    %703 = vector.extract_strided_slice %698 {offsets = [0, 96], sizes = [2, 32], strides = [1, 1]} : vector<2x128xf32> to vector<2x32xf32>
    %704 = arith.mulf %701, %691 : vector<2x32xf32>
    %705 = arith.mulf %700, %702 : vector<2x32xf32>
    %706 = arith.addf %704, %705 : vector<2x32xf32>
    %707 = math.tanh %706 : vector<2x32xf32>
    %708 = arith.mulf %703, %707 : vector<2x32xf32>
    %cst_162 = arith.constant dense<0.000000e+00> : vector<2x128xf32>
    %709 = tpu.matmul %708, %689, %cst_162 {dimension_numbers = #tpu.dot_dimension_numbers<[1], [0], [0], [1], [0, 0, 1, 1], [], []>} : vector<2x32xf32>, vector<32x128xf32>, vector<2x128xf32> -> vector<2x128xf32>
    %710 = arith.addf %669, %709 : vector<2x128xf32>
    %711 = arith.negf %710 : vector<2x128xf32>
    %712 = math.exp %711 : vector<2x128xf32>
    %cst_163 = arith.constant 1.000000e+00 : f32
    %713 = vector.broadcast %cst_163 : f32 to vector<2x128xf32>
    %714 = arith.addf %713, %712 : vector<2x128xf32>
    %715 = arith.divf %713, %714 : vector<2x128xf32>
    %716 = math.tanh %710 : vector<2x128xf32>
    %717 = vector.extract_strided_slice %715 {offsets = [0, 0], sizes = [2, 32], strides = [1, 1]} : vector<2x128xf32> to vector<2x32xf32>
    %718 = vector.extract_strided_slice %715 {offsets = [0, 32], sizes = [2, 32], strides = [1, 1]} : vector<2x128xf32> to vector<2x32xf32>
    %719 = vector.extract_strided_slice %716 {offsets = [0, 64], sizes = [2, 32], strides = [1, 1]} : vector<2x128xf32> to vector<2x32xf32>
    %720 = vector.extract_strided_slice %715 {offsets = [0, 96], sizes = [2, 32], strides = [1, 1]} : vector<2x128xf32> to vector<2x32xf32>
    %721 = arith.mulf %718, %706 : vector<2x32xf32>
    %722 = arith.mulf %717, %719 : vector<2x32xf32>
    %723 = arith.addf %721, %722 : vector<2x32xf32>
    %724 = math.tanh %723 : vector<2x32xf32>
    %725 = arith.mulf %720, %724 : vector<2x32xf32>
    %cst_164 = arith.constant dense<0.000000e+00> : vector<2x128xf32>
    %726 = tpu.matmul %725, %689, %cst_164 {dimension_numbers = #tpu.dot_dimension_numbers<[1], [0], [0], [1], [0, 0, 1, 1], [], []>} : vector<2x32xf32>, vector<32x128xf32>, vector<2x128xf32> -> vector<2x128xf32>
    %727 = arith.addf %672, %726 : vector<2x128xf32>
    %728 = arith.negf %727 : vector<2x128xf32>
    %729 = math.exp %728 : vector<2x128xf32>
    %cst_165 = arith.constant 1.000000e+00 : f32
    %730 = vector.broadcast %cst_165 : f32 to vector<2x128xf32>
    %731 = arith.addf %730, %729 : vector<2x128xf32>
    %732 = arith.divf %730, %731 : vector<2x128xf32>
    %733 = math.tanh %727 : vector<2x128xf32>
    %734 = vector.extract_strided_slice %732 {offsets = [0, 0], sizes = [2, 32], strides = [1, 1]} : vector<2x128xf32> to vector<2x32xf32>
    %735 = vector.extract_strided_slice %732 {offsets = [0, 32], sizes = [2, 32], strides = [1, 1]} : vector<2x128xf32> to vector<2x32xf32>
    %736 = vector.extract_strided_slice %733 {offsets = [0, 64], sizes = [2, 32], strides = [1, 1]} : vector<2x128xf32> to vector<2x32xf32>
    %737 = vector.extract_strided_slice %732 {offsets = [0, 96], sizes = [2, 32], strides = [1, 1]} : vector<2x128xf32> to vector<2x32xf32>
    %738 = arith.mulf %735, %723 : vector<2x32xf32>
    %739 = arith.mulf %734, %736 : vector<2x32xf32>
    %740 = arith.addf %738, %739 : vector<2x32xf32>
    %741 = math.tanh %740 : vector<2x32xf32>
    %742 = arith.mulf %737, %741 : vector<2x32xf32>
    %cst_166 = arith.constant dense<0.000000e+00> : vector<2x128xf32>
    %743 = tpu.matmul %742, %689, %cst_166 {dimension_numbers = #tpu.dot_dimension_numbers<[1], [0], [0], [1], [0, 0, 1, 1], [], []>} : vector<2x32xf32>, vector<32x128xf32>, vector<2x128xf32> -> vector<2x128xf32>
    %744 = arith.addf %675, %743 : vector<2x128xf32>
    %745 = arith.negf %744 : vector<2x128xf32>
    %746 = math.exp %745 : vector<2x128xf32>
    %cst_167 = arith.constant 1.000000e+00 : f32
    %747 = vector.broadcast %cst_167 : f32 to vector<2x128xf32>
    %748 = arith.addf %747, %746 : vector<2x128xf32>
    %749 = arith.divf %747, %748 : vector<2x128xf32>
    %750 = math.tanh %744 : vector<2x128xf32>
    %751 = vector.extract_strided_slice %749 {offsets = [0, 0], sizes = [2, 32], strides = [1, 1]} : vector<2x128xf32> to vector<2x32xf32>
    %752 = vector.extract_strided_slice %749 {offsets = [0, 32], sizes = [2, 32], strides = [1, 1]} : vector<2x128xf32> to vector<2x32xf32>
    %753 = vector.extract_strided_slice %750 {offsets = [0, 64], sizes = [2, 32], strides = [1, 1]} : vector<2x128xf32> to vector<2x32xf32>
    %754 = vector.extract_strided_slice %749 {offsets = [0, 96], sizes = [2, 32], strides = [1, 1]} : vector<2x128xf32> to vector<2x32xf32>
    %755 = arith.mulf %752, %740 : vector<2x32xf32>
    %756 = arith.mulf %751, %753 : vector<2x32xf32>
    %757 = arith.addf %755, %756 : vector<2x32xf32>
    %758 = math.tanh %757 : vector<2x32xf32>
    %759 = arith.mulf %754, %758 : vector<2x32xf32>
    %cst_168 = arith.constant dense<0.000000e+00> : vector<2x128xf32>
    %760 = tpu.matmul %759, %689, %cst_168 {dimension_numbers = #tpu.dot_dimension_numbers<[1], [0], [0], [1], [0, 0, 1, 1], [], []>} : vector<2x32xf32>, vector<32x128xf32>, vector<2x128xf32> -> vector<2x128xf32>
    %761 = arith.addf %678, %760 : vector<2x128xf32>
    %762 = arith.negf %761 : vector<2x128xf32>
    %763 = math.exp %762 : vector<2x128xf32>
    %cst_169 = arith.constant 1.000000e+00 : f32
    %764 = vector.broadcast %cst_169 : f32 to vector<2x128xf32>
    %765 = arith.addf %764, %763 : vector<2x128xf32>
    %766 = arith.divf %764, %765 : vector<2x128xf32>
    %767 = math.tanh %761 : vector<2x128xf32>
    %768 = vector.extract_strided_slice %766 {offsets = [0, 0], sizes = [2, 32], strides = [1, 1]} : vector<2x128xf32> to vector<2x32xf32>
    %769 = vector.extract_strided_slice %766 {offsets = [0, 32], sizes = [2, 32], strides = [1, 1]} : vector<2x128xf32> to vector<2x32xf32>
    %770 = vector.extract_strided_slice %767 {offsets = [0, 64], sizes = [2, 32], strides = [1, 1]} : vector<2x128xf32> to vector<2x32xf32>
    %771 = vector.extract_strided_slice %766 {offsets = [0, 96], sizes = [2, 32], strides = [1, 1]} : vector<2x128xf32> to vector<2x32xf32>
    %772 = arith.mulf %769, %757 : vector<2x32xf32>
    %773 = arith.mulf %768, %770 : vector<2x32xf32>
    %774 = arith.addf %772, %773 : vector<2x32xf32>
    %775 = math.tanh %774 : vector<2x32xf32>
    %776 = arith.mulf %771, %775 : vector<2x32xf32>
    %cst_170 = arith.constant dense<0.000000e+00> : vector<2x128xf32>
    %777 = tpu.matmul %776, %689, %cst_170 {dimension_numbers = #tpu.dot_dimension_numbers<[1], [0], [0], [1], [0, 0, 1, 1], [], []>} : vector<2x32xf32>, vector<32x128xf32>, vector<2x128xf32> -> vector<2x128xf32>
    %778 = arith.addf %681, %777 : vector<2x128xf32>
    %779 = arith.negf %778 : vector<2x128xf32>
    %780 = math.exp %779 : vector<2x128xf32>
    %cst_171 = arith.constant 1.000000e+00 : f32
    %781 = vector.broadcast %cst_171 : f32 to vector<2x128xf32>
    %782 = arith.addf %781, %780 : vector<2x128xf32>
    %783 = arith.divf %781, %782 : vector<2x128xf32>
    %784 = math.tanh %778 : vector<2x128xf32>
    %785 = vector.extract_strided_slice %783 {offsets = [0, 0], sizes = [2, 32], strides = [1, 1]} : vector<2x128xf32> to vector<2x32xf32>
    %786 = vector.extract_strided_slice %783 {offsets = [0, 32], sizes = [2, 32], strides = [1, 1]} : vector<2x128xf32> to vector<2x32xf32>
    %787 = vector.extract_strided_slice %784 {offsets = [0, 64], sizes = [2, 32], strides = [1, 1]} : vector<2x128xf32> to vector<2x32xf32>
    %788 = vector.extract_strided_slice %783 {offsets = [0, 96], sizes = [2, 32], strides = [1, 1]} : vector<2x128xf32> to vector<2x32xf32>
    %789 = arith.mulf %786, %774 : vector<2x32xf32>
    %790 = arith.mulf %785, %787 : vector<2x32xf32>
    %791 = arith.addf %789, %790 : vector<2x32xf32>
    %792 = math.tanh %791 : vector<2x32xf32>
    %793 = arith.mulf %788, %792 : vector<2x32xf32>
    %cst_172 = arith.constant dense<0.000000e+00> : vector<2x128xf32>
    %794 = tpu.matmul %793, %689, %cst_172 {dimension_numbers = #tpu.dot_dimension_numbers<[1], [0], [0], [1], [0, 0, 1, 1], [], []>} : vector<2x32xf32>, vector<32x128xf32>, vector<2x128xf32> -> vector<2x128xf32>
    %795 = arith.addf %684, %794 : vector<2x128xf32>
    %796 = arith.negf %795 : vector<2x128xf32>
    %797 = math.exp %796 : vector<2x128xf32>
    %cst_173 = arith.constant 1.000000e+00 : f32
    %798 = vector.broadcast %cst_173 : f32 to vector<2x128xf32>
    %799 = arith.addf %798, %797 : vector<2x128xf32>
    %800 = arith.divf %798, %799 : vector<2x128xf32>
    %801 = math.tanh %795 : vector<2x128xf32>
    %802 = vector.extract_strided_slice %800 {offsets = [0, 0], sizes = [2, 32], strides = [1, 1]} : vector<2x128xf32> to vector<2x32xf32>
    %803 = vector.extract_strided_slice %800 {offsets = [0, 32], sizes = [2, 32], strides = [1, 1]} : vector<2x128xf32> to vector<2x32xf32>
    %804 = vector.extract_strided_slice %801 {offsets = [0, 64], sizes = [2, 32], strides = [1, 1]} : vector<2x128xf32> to vector<2x32xf32>
    %805 = vector.extract_strided_slice %800 {offsets = [0, 96], sizes = [2, 32], strides = [1, 1]} : vector<2x128xf32> to vector<2x32xf32>
    %806 = arith.mulf %803, %791 : vector<2x32xf32>
    %807 = arith.mulf %802, %804 : vector<2x32xf32>
    %808 = arith.addf %806, %807 : vector<2x32xf32>
    %809 = math.tanh %808 : vector<2x32xf32>
    %810 = arith.mulf %805, %809 : vector<2x32xf32>
    %cst_174 = arith.constant dense<0.000000e+00> : vector<2x128xf32>
    %811 = tpu.matmul %810, %689, %cst_174 {dimension_numbers = #tpu.dot_dimension_numbers<[1], [0], [0], [1], [0, 0, 1, 1], [], []>} : vector<2x32xf32>, vector<32x128xf32>, vector<2x128xf32> -> vector<2x128xf32>
    %812 = arith.addf %687, %811 : vector<2x128xf32>
    %813 = arith.negf %812 : vector<2x128xf32>
    %814 = math.exp %813 : vector<2x128xf32>
    %cst_175 = arith.constant 1.000000e+00 : f32
    %815 = vector.broadcast %cst_175 : f32 to vector<2x128xf32>
    %816 = arith.addf %815, %814 : vector<2x128xf32>
    %817 = arith.divf %815, %816 : vector<2x128xf32>
    %818 = math.tanh %812 : vector<2x128xf32>
    %819 = vector.extract_strided_slice %817 {offsets = [0, 0], sizes = [2, 32], strides = [1, 1]} : vector<2x128xf32> to vector<2x32xf32>
    %820 = vector.extract_strided_slice %817 {offsets = [0, 32], sizes = [2, 32], strides = [1, 1]} : vector<2x128xf32> to vector<2x32xf32>
    %821 = vector.extract_strided_slice %818 {offsets = [0, 64], sizes = [2, 32], strides = [1, 1]} : vector<2x128xf32> to vector<2x32xf32>
    %822 = vector.extract_strided_slice %817 {offsets = [0, 96], sizes = [2, 32], strides = [1, 1]} : vector<2x128xf32> to vector<2x32xf32>
    %823 = arith.mulf %820, %808 : vector<2x32xf32>
    %824 = arith.mulf %819, %821 : vector<2x32xf32>
    %825 = arith.addf %823, %824 : vector<2x32xf32>
    %826 = math.tanh %825 : vector<2x32xf32>
    %827 = arith.mulf %822, %826 : vector<2x32xf32>
    %c0_176 = arith.constant 0 : index
    %c0_177 = arith.constant 0 : index
    %828 = vector.load %arg4[%c0_176, %c0_177] : memref<1x32xf32, #tpu.memory_space<vmem>>, vector<1x32xf32>
    %829 = vector.broadcast %828 : vector<1x32xf32> to vector<2x32xf32>
    %830 = arith.mulf %827, %829 : vector<2x32xf32>
    %cst_178 = arith.constant dense<0.000000e+00> : vector<2xf32>
    %831 = vector.multi_reduction <add>, %830, %cst_178 [1] : vector<2x32xf32> to vector<2xf32>
    %832 = vector.shape_cast %831 : vector<2xf32> to vector<2x1xf32>
    %c0_179 = arith.constant 0 : index
    %c0_180 = arith.constant 0 : index
    %833 = vector.load %arg5[%c0_179, %c0_180] : memref<1x1xf32, #tpu.memory_space<vmem>>, vector<1x1xf32>
    %834 = vector.broadcast %833 : vector<1x1xf32> to vector<2x1xf32>
    %835 = arith.addf %832, %834 : vector<2x1xf32>
    %c0_181 = arith.constant 0 : index
    %c0_182 = arith.constant 0 : index
    %836 = vector.load %arg6[%c0_181, %c0_182] : memref<2x1xf32, #tpu.memory_space<vmem>>, vector<2x1xf32>
    tpu.vector_store %arg6[%c0_181, %c0_182], %835 {strides = array<i32>} : memref<2x1xf32, #tpu.memory_space<vmem>>, vector<2x1xf32>,
    return
  }
}

</mosaic_0001>

<bundles_post_ra>
// kernel: tpu_custom_call.1
= control target key start
LH: loop header
LB: loop body
LE: loop exit
PB: predicated region body
PF: predicated region fallthrough
CT: control target
= control target key end

     0   :  { %s9457_s0 = inlined_call_operand.hbm [shape: f32[8,2,128], index: 0, kind: input, shape index: {}]   ;;  %s9458_s1 = inlined_call_operand.hbm [shape: f32[4,32,128], index: 1, kind: input, shape index: {}]   ;;  %s9459_s2 = inlined_call_operand.hbm [shape: f32[5,32,128], index: 2, kind: input, shape index: {}]   ;;  %s9460_s3 = inlined_call_operand.vmem [shape: f32[4,1,128], index: 3, kind: input, shape index: {}]   ;;  %s9461_s4 = inlined_call_operand.vmem [shape: f32[1,32], index: 4, kind: input, shape index: {}]   ;;  %s9462_s5 = inlined_call_operand.<no memory space> [shape: f32[1,1], index: 5, kind: input, shape index: {}]   ;;  %s9463_s6 = inlined_call_operand.vmem [shape: f32[2,1], index: 6, kind: output, shape index: {}]  }
   0x1   :  { %v11_v0 = vstv %s9462_s5 }
   0x2   :  { %12 = vst [vmem:[#allocation2] sm:$0x1] %v11_v0 }
   0x3   :  { %13 = vsyncpa [#allocation4], 0 }
   0x4   :  { %14 = vsyncpa [#allocation6], 0  ;;  %s8091_s23 = smov [#allocation5]  }
   0x5   :  { %s32_s24 = sshll.u32 %s8091_s23, 4  ;;  %s33_s24 = int_to_ptr.vmem [resolvable:$true] %s32_s24 }
   0x6   :  { %s8035_s25 = scalar_lea.vmem %s33_s24, 2048  ;;  %p8040_p1 = scmp.lt.s32.totalorder %s33_s24, %s33_s24 }
   0x7   :  { %p8036_p0 = scmp.ne.s32.totalorder %s33_s24, %s8035_s25  ;;  %p8041_p2 = scmp.lt.s32.totalorder %s8035_s25, %s8035_s25 }
   0x9   :  { %p8042_p3 = por %p8041_p2, %p8040_p1 }
   0xb   :  { %p8043_p4 = pnand %p8042_p3, %p8036_p0 }
   0xd   :  { %8046 = shalt.err (!%p8043_p4)
}
   0xe   :  { %s8092_s26 = smov 128   ;;  %s8093_s27 = smov 8  }
   0xf   :  { %38 = dma.hbm_to_vmem [thread:$0]  %s9458_s1, 2048, %s33_s24, [#allocation6], %s8092_s26, %s8092_s26, %s8093_s27  }
  0x10   :  { %s8094_s5 = smov [#allocation3]  }
  0x11   :  { %s20_s30 = sshll.u32 %s8094_s5, 4  ;;  %s21_s30 = int_to_ptr.vmem [resolvable:$true] %s20_s30 }
  0x12   :  { %s8055_s7 = scalar_lea.vmem %s21_s30, 256  ;;  %p8060_p6 = scmp.lt.s32.totalorder %s21_s30, %s21_s30 }
  0x13   :  { %p8056_p5 = scmp.ne.s32.totalorder %s21_s30, %s8055_s7  ;;  %p8061_p7 = scmp.lt.s32.totalorder %s8055_s7, %s8055_s7 }
  0x15   :  { %p8062_p8 = por %p8061_p7, %p8060_p6 }
  0x17   :  { %p8063_p9 = pnand %p8062_p8, %p8056_p5 }
  0x19   :  { %8066 = shalt.err (!%p8063_p9)
}
  0x1a   :  { %s8095_s8 = smov 32   ;;  %s8096_s9 = smov 2  }
  0x1b   :  { %26 = dma.hbm_to_vmem [thread:$0]  %s9457_s0, 256, %s21_s30, [#allocation4], %s8095_s8, %s8095_s8, %s8096_s9  }
  0x1c   :  { %s8097_s12 = smov [#allocation7]  }
  0x1d   :  { %s44_s1 = sshll.u32 %s8097_s12, 4  ;;  %s45_s1 = int_to_ptr.vmem [resolvable:$true] %s44_s1 }
  0x1e   :  { %s8075_s13 = scalar_lea.vmem %s45_s1, 2560  ;;  %p8080_p11 = scmp.lt.s32.totalorder %s45_s1, %s45_s1 }
  0x1f   :  { %p8076_p10 = scmp.ne.s32.totalorder %s45_s1, %s8075_s13  ;;  %p8081_p12 = scmp.lt.s32.totalorder %s8075_s13, %s8075_s13 }
  0x21   :  { %p8082_p13 = por %p8081_p12, %p8080_p11 }
  0x23   :  { %p8083_p0 = pnand %p8082_p13, %p8076_p10 }
  0x25   :  { %8086 = shalt.err (!%p8083_p0)
}
  0x26   :  { %50 = dma.hbm_to_vmem [thread:$0]  %s9459_s2, 2560, %s45_s1, [#allocation6], %s8092_s26, %s8092_s26, %s8093_s27  }
  0x27   :  { %8087 = dma.done.wait [#allocation4], 256  }
  0x28   :  { %8088 = vsyncadd [#allocation4], 4294967040 }
  0x29   :  { %8089 = dma.done.wait [#allocation6], 4608  }
  0x2a   :  { %8090 = vsyncadd [#allocation6], 4294962688  ;;  %v8098_v1 = vmov 0.0   ;;  %vm8099_vm0 = vmmov 0   ;;  %v8157_v2 = vld [vmem:[#allocation7 + $0x18] sm:$0xff]  ;;  %v8159_v3 = vld [vmem:[#allocation7 + $0x10] sm:$0xff] }
  0x2b   :  { %6904 = vmatprep.subr.mxu0 %v8098_v1  ;;  %6912 = vmatprep.mubr.msk.f32.mxu0 %vm8099_vm0, %v8098_v1  ;;  %v8164_v4 = vld [vmem:[#allocation7 + $0x8] sm:$0xff]  ;;  %v8170_v5 = vld [vmem:[#allocation7] sm:$0xff]  ;;  %v66_v6 = vld [vmem:[#allocation3] sm:$0x3]  ;;  %s8100_s0 = smov 64   ;;  %vm85_vm1 = vcmask 261120  }
  0x2c   :  { %6915 = vmatprep.subr.mxu1 %v8098_v1  ;;  %6923 = vmatprep.mubr.msk.f32.mxu1 %vm8099_vm0, %v8098_v1  ;;  %v68_v24 = vld [vmem:[#allocation3 + $0x2] sm:$0x3]  ;;  %v70_v42 = vld [vmem:[#allocation3 + $0x4] sm:$0x3]  ;;  %v72_v60 = vld [vmem:[#allocation3 + $0x6] sm:$0x3] }
  0x2d   :  { %6905 = vmatpush3.msra.mxu0 %v8157_v2  ;;  %6916 = vmatpush3.msra.mxu1 %v8157_v2  ;;  %s8101_s24 = smov 96   ;;  %vm6408_vm2 = vcmask 254976   ;;  %vm6420_vm3 = vcmask 1024  }
  0x2e   :  { %6906 = vmatprep.subr.mxu0 %v8098_v1  ;;  %6917 = vmatprep.subr.mxu1 %v8098_v1 }
  0x2f   :  { %6907 = vmatpush3.msra.mxu0 %v8159_v3  ;;  %6918 = vmatpush3.msra.mxu1 %v8159_v3 }
  0x30   :  { %6908 = vmatprep.subr.mxu0 %v8098_v1  ;;  %6919 = vmatprep.subr.mxu1 %v8098_v1 }
  0x31   :  { %6909 = vmatpush3.msra.mxu0 %v8164_v4  ;;  %6920 = vmatpush3.msra.mxu1 %v8164_v4 }
  0x32   :  { %6910 = vmatprep.subr.mxu0 %v8098_v1  ;;  %6921 = vmatprep.subr.mxu1 %v8098_v1 }
  0x33   :  { %6911 = vmatpush3.msra.mxu0 %v8170_v5  ;;  %6922 = vmatpush3.msra.mxu1 %v8170_v5 }
  0x34   :  { %6913 = vmatmul.mubr.f32.vlgmr.msra.gmra.mxu0 %v8098_v1  ;;  %6926 = vmatprep.subr.mxu0 %v8098_v1 }
  0x35   :  { %6927 = vmatpush3.msra.mxu0 %v8157_v2  ;;  %6934 = vmatprep.mubr.msk.f32.mxu0 %vm8099_vm0, %v8098_v1 }
  0x36   :  { %6928 = vmatprep.subr.mxu0 %v8098_v1  ;;  %6937 = vmatprep.subr.mxu1 %v8098_v1 }
  0x37   :  { %6929 = vmatpush3.msra.mxu0 %v8159_v3 }
  0x38   :  { %6930 = vmatprep.subr.mxu0 %v8098_v1 }
  0x39   :  { %6931 = vmatpush3.msra.mxu0 %v8164_v4 }
  0x3a   :  { %6932 = vmatprep.subr.mxu0 %v8098_v1 }
  0x3b   :  { %6933 = vmatpush3.msra.mxu0 %v8170_v5 }
  0x3c   :  { %6948 = vmatprep.subr.mxu0 %v8098_v1 }
  0xf4   :  { %v155_v7 = vpop.f32.mrf.mxu0 }
  0xf5   :  { %v159_v8 = vadd.f32 %v155_v7, %v66_v6 }
  0xf6   :  { %v6914_v9 = vpop.f32.mrf.mxu0 }
  0xf7   :  { %7707 = vtanh.f32 %v159_v8  ;;  %v6428_v11 = vmul.f32 -1.442695, %v159_v8 }
  0xf9   :  { %7709 = vpow2.f32 %v6428_v11 }
 0x104   :  { %v7708_v10 = vpop.eup %7707 }
 0x105   :  { %169 = vrot.lane.b32.xlu0 %v7708_v10, %s8100_s0 }
 0x106   :  { %v7710_v12 = vpop.eup %7709 }
 0x107   :  { %v163_v13 = vadd.f32 1.0, %v7710_v12 }
 0x109   :  { %7711 = vrcp.f32 %v163_v13 }
 0x116   :  { %v7712_v14 = vpop.eup %7711 }
 0x117   :  { %v167_v17 = vmul.f32 0.0, %v7712_v14 }
 0x177   :  { %v170_v15 = vpop.permute.xlu0 %169 }
 0x178   :  { %v172_v16 = vmul.f32 %v7712_v14, %v170_v15 }
 0x17a   :  { %174 = vrot.lane.b32.xlu0 %v172_v16, %s8095_s8 }
 0x1ec   :  { %v175_v18 = vpop.permute.xlu0 %174 }
 0x1ed   :  { %v177_v19 = vadd.f32 %v175_v18, %v167_v17 }
 0x1ef   :  { %7713 = vtanh.f32 %v177_v19 }
 0x1fc   :  { %v7714_v20 = vpop.eup %7713 }
 0x1fd   :  { %180 = vrot.lane.b32.xlu1 %v7714_v20, %s8100_s0 }
 0x26f   :  { %v181_v21 = vpop.permute.xlu1 %180 }
 0x270   :  { %v183_v22 = vmul.f32 %v7712_v14, %v181_v21 }
 0x272   :  { %185 = vrot.lane.b32.xlu1 %v183_v22, %s8095_s8 }
 0x2e4   :  { %v8196_v23 = vpop.permute.xlu1 %185 }
 0x2e5   :  { %6924 = vmatmul.mubr.msk.f32.vlgmr.msra.gmra.mxu1 %vm85_vm1, %v8196_v23 }
 0x2e6   :  { %6938 = vmatpush3.msra.mxu1 %v8157_v2  ;;  %6945 = vmatprep.mubr.msk.f32.mxu1 %vm8099_vm0, %v8098_v1 }
 0x2e7   :  { %6939 = vmatprep.subr.mxu1 %v8098_v1 }
 0x2e8   :  { %6940 = vmatpush3.msra.mxu1 %v8159_v3 }
 0x2e9   :  { %6941 = vmatprep.subr.mxu1 %v8098_v1 }
 0x2ea   :  { %6942 = vmatpush3.msra.mxu1 %v8164_v4 }
 0x2eb   :  { %6943 = vmatprep.subr.mxu1 %v8098_v1 }
 0x2ec   :  { %6944 = vmatpush3.msra.mxu1 %v8170_v5 }
 0x2ed   :  { %6959 = vmatprep.subr.mxu1 %v8098_v1 }
 0x3a5   :  { %v255_v25 = vpop.f32.mrf.mxu1 }
 0x3a6   :  { %v259_v26 = vadd.f32 %v255_v25, %v68_v24 }
 0x3a7   :  { %v6925_v27 = vpop.f32.mrf.mxu1 }
 0x3a8   :  { %7715 = vtanh.f32 %v259_v26  ;;  %v6430_v29 = vmul.f32 -1.442695, %v259_v26 }
 0x3aa   :  { %7717 = vpow2.f32 %v6430_v29 }
 0x3b5   :  { %v7716_v28 = vpop.eup %7715 }
 0x3b6   :  { %269 = vrot.lane.b32.xlu0 %v7716_v28, %s8100_s0 }
 0x3b7   :  { %v7718_v30 = vpop.eup %7717 }
 0x3b8   :  { %v263_v31 = vadd.f32 1.0, %v7718_v30 }
 0x3ba   :  { %7719 = vrcp.f32 %v263_v31 }
 0x3c7   :  { %v7720_v32 = vpop.eup %7719 }
 0x3c8   :  { %v267_v35 = vmul.f32 %v7720_v32, %v177_v19  ;;  %v74_v19 = vld [vmem:[#allocation3 + $0x8] sm:$0x3] }
 0x428   :  { %v270_v33 = vpop.permute.xlu0 %269 }
 0x429   :  { %v272_v34 = vmul.f32 %v7720_v32, %v270_v33 }
 0x42b   :  { %274 = vrot.lane.b32.xlu1 %v272_v34, %s8095_s8 }
 0x49d   :  { %v275_v36 = vpop.permute.xlu1 %274 }
 0x49e   :  { %v277_v37 = vadd.f32 %v275_v36, %v267_v35 }
 0x4a0   :  { %7721 = vtanh.f32 %v277_v37 }
 0x4ad   :  { %v7722_v38 = vpop.eup %7721 }
 0x4ae   :  { %280 = vrot.lane.b32.xlu0 %v7722_v38, %s8100_s0  ;;  %v76_v38 = vld [vmem:[#allocation3 + $0xa] sm:$0x3] }
 0x520   :  { %v281_v39 = vpop.permute.xlu0 %280 }
 0x521   :  { %v283_v40 = vmul.f32 %v7720_v32, %v281_v39 }
 0x523   :  { %285 = vrot.lane.b32.xlu1 %v283_v40, %s8095_s8 }
 0x595   :  { %v8214_v41 = vpop.permute.xlu1 %285 }
 0x596   :  { %6935 = vmatmul.mubr.msk.f32.vlgmr.msra.gmra.mxu0 %vm85_vm1, %v8214_v41 }
 0x597   :  { %6949 = vmatpush3.msra.mxu0 %v8157_v2  ;;  %6956 = vmatprep.mubr.msk.f32.mxu0 %vm8099_vm0, %v8098_v1 }
 0x598   :  { %6950 = vmatprep.subr.mxu0 %v8098_v1 }
 0x599   :  { %6951 = vmatpush3.msra.mxu0 %v8159_v3 }
 0x59a   :  { %6952 = vmatprep.subr.mxu0 %v8098_v1 }
 0x59b   :  { %6953 = vmatpush3.msra.mxu0 %v8164_v4 }
 0x59c   :  { %6954 = vmatprep.subr.mxu0 %v8098_v1 }
 0x59d   :  { %6955 = vmatpush3.msra.mxu0 %v8170_v5 }
 0x59e   :  { %6970 = vmatprep.subr.mxu0 %v8098_v1 }
 0x656   :  { %v355_v43 = vpop.f32.mrf.mxu0 }
 0x657   :  { %v359_v44 = vadd.f32 %v355_v43, %v70_v42 }
 0x658   :  { %v6936_v45 = vpop.f32.mrf.mxu0 }
 0x659   :  { %7723 = vtanh.f32 %v359_v44  ;;  %v6432_v47 = vmul.f32 -1.442695, %v359_v44 }
 0x65b   :  { %7725 = vpow2.f32 %v6432_v47 }
 0x666   :  { %v7724_v46 = vpop.eup %7723 }
 0x667   :  { %369 = vrot.lane.b32.xlu0 %v7724_v46, %s8100_s0 }
 0x668   :  { %v7726_v48 = vpop.eup %7725 }
 0x669   :  { %v363_v49 = vadd.f32 1.0, %v7726_v48 }
 0x66b   :  { %7727 = vrcp.f32 %v363_v49 }
 0x678   :  { %v7728_v50 = vpop.eup %7727 }
 0x679   :  { %v367_v53 = vmul.f32 %v7728_v50, %v277_v37 }
 0x6d9   :  { %v370_v51 = vpop.permute.xlu0 %369 }
 0x6da   :  { %v372_v52 = vmul.f32 %v7728_v50, %v370_v51 }
 0x6dc   :  { %374 = vrot.lane.b32.xlu1 %v372_v52, %s8095_s8  ;;  %v8289_v52 = vld [vmem:[#allocation5 + $0x18] sm:$0xff] }
 0x74e   :  { %v375_v54 = vpop.permute.xlu1 %374 }
 0x74f   :  { %v377_v55 = vadd.f32 %v375_v54, %v367_v53  ;;  %v8295_v54 = vld [vmem:[#allocation5 + $0x10] sm:$0xff] }
 0x751   :  { %7729 = vtanh.f32 %v377_v55 }
 0x75e   :  { %v7730_v56 = vpop.eup %7729 }
 0x75f   :  { %380 = vrot.lane.b32.xlu0 %v7730_v56, %s8100_s0  ;;  %v8305_v56 = vld [vmem:[#allocation5] sm:$0xff] }
 0x7d1   :  { %v381_v57 = vpop.permute.xlu0 %380 }
 0x7d2   :  { %v383_v58 = vmul.f32 %v7728_v50, %v381_v57 }
 0x7d4   :  { %385 = vrot.lane.b32.xlu1 %v383_v58, %s8095_s8 }
 0x846   :  { %v8232_v59 = vpop.permute.xlu1 %385 }
 0x847   :  { %6946 = vmatmul.mubr.msk.f32.vlgmr.msra.gmra.mxu1 %vm85_vm1, %v8232_v59 }
 0x848   :  { %6960 = vmatpush3.msra.mxu1 %v8157_v2  ;;  %6967 = vmatprep.mubr.msk.f32.mxu1 %vm8099_vm0, %v8098_v1 }
 0x849   :  { %6961 = vmatprep.subr.mxu1 %v8098_v1 }
 0x84a   :  { %6962 = vmatpush3.msra.mxu1 %v8159_v3 }
 0x84b   :  { %6963 = vmatprep.subr.mxu1 %v8098_v1 }
 0x84c   :  { %6964 = vmatpush3.msra.mxu1 %v8164_v4 }
 0x84d   :  { %6965 = vmatprep.subr.mxu1 %v8098_v1 }
 0x84e   :  { %6966 = vmatpush3.msra.mxu1 %v8170_v5 }
 0x84f   :  { %6981 = vmatprep.subr.mxu1 %v8098_v1 }
 0x907   :  { %v455_v61 = vpop.f32.mrf.mxu1 }
 0x908   :  { %v459_v62 = vadd.f32 %v455_v61, %v72_v60 }
 0x909   :  { %v6947_v63 = vpop.f32.mrf.mxu1 }
 0x90a   :  { %7731 = vtanh.f32 %v459_v62  ;;  %v6434_v6 = vmul.f32 -1.442695, %v459_v62 }
 0x90c   :  { %7733 = vpow2.f32 %v6434_v6 }
 0x917   :  { %v7732_v0 = vpop.eup %7731 }
 0x918   :  { %469 = vrot.lane.b32.xlu0 %v7732_v0, %s8100_s0 }
 0x919   :  { %v7734_v7 = vpop.eup %7733 }
 0x91a   :  { %v463_v8 = vadd.f32 1.0, %v7734_v7 }
 0x91c   :  { %7735 = vrcp.f32 %v463_v8 }
 0x929   :  { %v7736_v9 = vpop.eup %7735 }
 0x92a   :  { %v467_v12 = vmul.f32 %v7736_v9, %v377_v55  ;;  %v8301_v55 = vld [vmem:[#allocation5 + $0x8] sm:$0xff] }
 0x98a   :  { %v470_v10 = vpop.permute.xlu0 %469 }
 0x98b   :  { %v472_v11 = vmul.f32 %v7736_v9, %v470_v10 }
 0x98d   :  { %474 = vrot.lane.b32.xlu1 %v472_v11, %s8095_s8 }
 0x9ff   :  { %v475_v13 = vpop.permute.xlu1 %474 }
 0xa00   :  { %v477_v14 = vadd.f32 %v475_v13, %v467_v12 }
 0xa02   :  { %7737 = vtanh.f32 %v477_v14 }
 0xa0f   :  { %v7738_v15 = vpop.eup %7737 }
 0xa10   :  { %480 = vrot.lane.b32.xlu0 %v7738_v15, %s8100_s0 }
 0xa82   :  { %v481_v16 = vpop.permute.xlu0 %480 }
 0xa83   :  { %v483_v17 = vmul.f32 %v7736_v9, %v481_v16 }
 0xa85   :  { %485 = vrot.lane.b32.xlu1 %v483_v17, %s8095_s8 }
 0xaf7   :  { %v8250_v18 = vpop.permute.xlu1 %485 }
 0xaf8   :  { %6957 = vmatmul.mubr.msk.f32.vlgmr.msra.gmra.mxu0 %vm85_vm1, %v8250_v18 }
 0xaf9   :  { %6971 = vmatpush3.msra.mxu0 %v8157_v2  ;;  %6978 = vmatprep.mubr.msk.f32.mxu0 %vm8099_vm0, %v8098_v1 }
 0xafa   :  { %6972 = vmatprep.subr.mxu0 %v8098_v1 }
 0xafb   :  { %6973 = vmatpush3.msra.mxu0 %v8159_v3 }
 0xafc   :  { %6974 = vmatprep.subr.mxu0 %v8098_v1 }
 0xafd   :  { %6975 = vmatpush3.msra.mxu0 %v8164_v4 }
 0xafe   :  { %6976 = vmatprep.subr.mxu0 %v8098_v1 }
 0xaff   :  { %6977 = vmatpush3.msra.mxu0 %v8170_v5 }
 0xb00   :  { %6992 = vmatprep.subr.mxu0 %v8098_v1 }
 0xbb8   :  { %v555_v20 = vpop.f32.mrf.mxu0 }
 0xbb9   :  { %v559_v21 = vadd.f32 %v555_v20, %v74_v19 }
 0xbba   :  { %v6958_v22 = vpop.f32.mrf.mxu0 }
 0xbbb   :  { %7739 = vtanh.f32 %v559_v21  ;;  %v6436_v25 = vmul.f32 -1.442695, %v559_v21  ;;  %v8361_v21 = vld [vmem:[#allocation7 + $0x38] sm:$0xff] }
 0xbbd   :  { %7741 = vpow2.f32 %v6436_v25  ;;  %v8371_v25 = vld [vmem:[#allocation7 + $0x28] sm:$0xff] }
 0xbc8   :  { %v7740_v24 = vpop.eup %7739 }
 0xbc9   :  { %569 = vrot.lane.b32.xlu0 %v7740_v24, %s8100_s0  ;;  %v8365_v24 = vld [vmem:[#allocation7 + $0x30] sm:$0xff] }
 0xbca   :  { %v7742_v26 = vpop.eup %7741 }
 0xbcb   :  { %v563_v27 = vadd.f32 1.0, %v7742_v26  ;;  %v8379_v26 = vld [vmem:[#allocation7 + $0x20] sm:$0xff] }
 0xbcd   :  { %7743 = vrcp.f32 %v563_v27 }
 0xbda   :  { %v7744_v28 = vpop.eup %7743 }
 0xbdb   :  { %v567_v31 = vmul.f32 %v7744_v28, %v477_v14 }
 0xc3b   :  { %v570_v29 = vpop.permute.xlu0 %569 }
 0xc3c   :  { %v572_v30 = vmul.f32 %v7744_v28, %v570_v29 }
 0xc3e   :  { %574 = vrot.lane.b32.xlu1 %v572_v30, %s8095_s8 }
 0xcb0   :  { %v575_v32 = vpop.permute.xlu1 %574 }
 0xcb1   :  { %v577_v33 = vadd.f32 %v575_v32, %v567_v31  ;;  %v8443_v31 = vld [vmem:[%s9460_s3] ss:$0 sm:$0xff] }
 0xcb3   :  { %7745 = vtanh.f32 %v577_v33 }
 0xcc0   :  { %v7746_v34 = vpop.eup %7745 }
 0xcc1   :  { %580 = vrot.lane.b32.xlu0 %v7746_v34, %s8100_s0 }
 0xd33   :  { %v581_v35 = vpop.permute.xlu0 %580 }
 0xd34   :  { %v583_v36 = vmul.f32 %v7744_v28, %v581_v35 }
 0xd36   :  { %585 = vrot.lane.b32.xlu1 %v583_v36, %s8095_s8 }
 0xda8   :  { %v8268_v37 = vpop.permute.xlu1 %585 }
 0xda9   :  { %6968 = vmatmul.mubr.msk.f32.vlgmr.msra.gmra.mxu1 %vm85_vm1, %v8268_v37 }
 0xdaa   :  { %6982 = vmatpush3.msra.mxu1 %v8157_v2  ;;  %6989 = vmatprep.mubr.msk.f32.mxu1 %vm8099_vm0, %v8098_v1 }
 0xdab   :  { %6983 = vmatprep.subr.mxu1 %v8098_v1 }
 0xdac   :  { %6984 = vmatpush3.msra.mxu1 %v8159_v3 }
 0xdad   :  { %6985 = vmatprep.subr.mxu1 %v8098_v1 }
 0xdae   :  { %6986 = vmatpush3.msra.mxu1 %v8164_v4 }
 0xdaf   :  { %6987 = vmatprep.subr.mxu1 %v8098_v1 }
 0xdb0   :  { %6988 = vmatpush3.msra.mxu1 %v8170_v5 }
 0xdb1   :  { %7003 = vmatprep.subr.mxu1 %v8098_v1 }
 0xe69   :  { %v655_v39 = vpop.f32.mrf.mxu1 }
 0xe6a   :  { %v659_v2 = vadd.f32 %v655_v39, %v76_v38 }
 0xe6b   :  { %v6969_v40 = vpop.f32.mrf.mxu1 }
 0xe6c   :  { %7747 = vtanh.f32 %v659_v2  ;;  %v6438_v43 = vmul.f32 -1.442695, %v659_v2 }
 0xe6e   :  { %7749 = vpow2.f32 %v6438_v43 }
 0xe79   :  { %v7748_v42 = vpop.eup %7747 }
 0xe7a   :  { %669 = vrot.lane.b32.xlu0 %v7748_v42, %s8100_s0 }
 0xe7b   :  { %v7750_v3 = vpop.eup %7749 }
 0xe7c   :  { %v663_v44 = vadd.f32 1.0, %v7750_v3 }
 0xe7e   :  { %7751 = vrcp.f32 %v663_v44 }
 0xe8b   :  { %v7752_v4 = vpop.eup %7751 }
 0xe8c   :  { %v667_v5 = vmul.f32 %v7752_v4, %v577_v33 }
 0xeec   :  { %v670_v45 = vpop.permute.xlu0 %669 }
 0xeed   :  { %v672_v46 = vmul.f32 %v7752_v4, %v670_v45 }
 0xeef   :  { %674 = vrot.lane.b32.xlu1 %v672_v46, %s8095_s8 }
 0xf61   :  { %v675_v47 = vpop.permute.xlu1 %674 }
 0xf62   :  { %v8284_v48 = vadd.f32 %v675_v47, %v667_v5 }
 0xf64   :  { %7753 = vtanh.f32 %v8284_v48 }
 0xf71   :  { %v7754_v49 = vpop.eup %7753 }
 0xf72   :  { %680 = vrot.lane.b32.xlu0 %v7754_v49, %s8100_s0 }
 0xfe4   :  { %v681_v50 = vpop.permute.xlu0 %680 }
 0xfe5   :  { %v683_v51 = vmul.f32 %v7752_v4, %v681_v50 }
 0xfe7   :  { %685 = vrot.lane.b32.xlu1 %v683_v51, %s8095_s8 }
0x1059   :  { %v8291_v53 = vpop.permute.xlu1 %685 }
0x105a   :  { %6979 = vmatmul.mubr.msk.f32.vlgmr.msra.gmra.mxu0 %vm85_vm1, %v8291_v53 }
0x105b   :  { %6993 = vmatpush3.msra.mxu0 %v8289_v52  ;;  %7000 = vmatprep.mubr.msk.f32.mxu0 %vm8099_vm0, %v8098_v1 }
0x105c   :  { %6994 = vmatprep.subr.mxu0 %v8098_v1 }
0x105d   :  { %6995 = vmatpush3.msra.mxu0 %v8295_v54 }
0x105e   :  { %6996 = vmatprep.subr.mxu0 %v8098_v1 }
0x105f   :  { %6997 = vmatpush3.msra.mxu0 %v8301_v55 }
0x1060   :  { %6998 = vmatprep.subr.mxu0 %v8098_v1 }
0x1061   :  { %6999 = vmatpush3.msra.mxu0 %v8305_v56 }
0x1062   :  { %7001 = vmatmul.mubr.msk.f32.vlgmr.msra.gmra.mxu0 %vm85_vm1, %v8196_v23  ;;  %7014 = vmatprep.subr.mxu0 %v8098_v1  ;;  %v78_v23 = vld [vmem:[#allocation3 + $0xc] sm:$0x3] }
0x1063   :  { %7015 = vmatpush3.msra.mxu0 %v8289_v52  ;;  %7022 = vmatprep.mubr.msk.f32.mxu0 %vm8099_vm0, %v8098_v1 }
0x1064   :  { %7016 = vmatprep.subr.mxu0 %v8098_v1 }
0x1065   :  { %7017 = vmatpush3.msra.mxu0 %v8295_v54 }
0x1066   :  { %7018 = vmatprep.subr.mxu0 %v8098_v1 }
0x1067   :  { %7019 = vmatpush3.msra.mxu0 %v8301_v55 }
0x1068   :  { %7020 = vmatprep.subr.mxu0 %v8098_v1 }
0x1069   :  { %7021 = vmatpush3.msra.mxu0 %v8305_v56 }
0x106a   :  { %7023 = vmatmul.mubr.msk.f32.vlgmr.msra.gmra.mxu0 %vm85_vm1, %v8232_v59  ;;  %7036 = vmatprep.subr.mxu0 %v8098_v1 }
0x106b   :  { %7037 = vmatpush3.msra.mxu0 %v8289_v52  ;;  %7044 = vmatprep.mubr.msk.f32.mxu0 %vm8099_vm0, %v8098_v1 }
0x106c   :  { %7038 = vmatprep.subr.mxu0 %v8098_v1 }
0x106d   :  { %7039 = vmatpush3.msra.mxu0 %v8295_v54 }
0x106e   :  { %7040 = vmatprep.subr.mxu0 %v8098_v1 }
0x106f   :  { %7041 = vmatpush3.msra.mxu0 %v8301_v55 }
0x1070   :  { %7042 = vmatprep.subr.mxu0 %v8098_v1 }
0x1071   :  { %7043 = vmatpush3.msra.mxu0 %v8305_v56 }
0x1072   :  { %7045 = vmatmul.mubr.msk.f32.vlgmr.msra.gmra.mxu0 %vm85_vm1, %v8268_v37  ;;  %7058 = vmatprep.subr.mxu0 %v8098_v1 }
0x1073   :  { %7059 = vmatpush3.msra.mxu0 %v8289_v52  ;;  %7066 = vmatprep.mubr.msk.f32.mxu0 %vm8099_vm0, %v8098_v1 }
0x1074   :  { %7060 = vmatprep.subr.mxu0 %v8098_v1 }
0x1075   :  { %7061 = vmatpush3.msra.mxu0 %v8295_v54 }
0x1076   :  { %7062 = vmatprep.subr.mxu0 %v8098_v1 }
0x1077   :  { %7063 = vmatpush3.msra.mxu0 %v8301_v55 }
0x1078   :  { %7064 = vmatprep.subr.mxu0 %v8098_v1 }
0x1079   :  { %7065 = vmatpush3.msra.mxu0 %v8305_v56 }
0x107a   :  { %7080 = vmatprep.subr.mxu0 %v8098_v1 }
0x111a   :  { %v755_v57 = vpop.f32.mrf.mxu0 }
0x111b   :  { %v759_v58 = vadd.f32 %v755_v57, %v78_v23 }
0x111c   :  { %v6980_v59 = vpop.f32.mrf.mxu0 }
0x111d   :  { %7755 = vtanh.f32 %v759_v58  ;;  %v6440_v8 = vmul.f32 -1.442695, %v759_v58 }
0x111f   :  { %7757 = vpow2.f32 %v6440_v8 }
0x1122   :  { %v8347_v60 = vpop.f32.mrf.mxu0 }
0x1123   :  { %v962_v32 = vadd.f32 %v8443_v31, %v8347_v60 }
0x1124   :  { %v7002_v61 = vpop.f32.mrf.mxu0 }
0x112a   :  { %v7756_v62 = vpop.eup %7755  ;;  %v8349_v63 = vpop.f32.mrf.mxu0 }
0x112b   :  { %769 = vrot.lane.b32.xlu0 %v7756_v62, %s8100_s0 }
0x112c   :  { %v7024_v0 = vpop.f32.mrf.mxu0  ;;  %v7758_v9 = vpop.eup %7757 }
0x112d   :  { %v763_v10 = vadd.f32 1.0, %v7758_v9 }
0x112f   :  { %7759 = vrcp.f32 %v763_v10 }
0x1132   :  { %v8352_v6 = vpop.f32.mrf.mxu0 }
0x1134   :  { %v7046_v7 = vpop.f32.mrf.mxu0 }
0x113c   :  { %v7760_v11 = vpop.eup %7759 }
0x113d   :  { %v767_v14 = vmul.f32 %v7760_v11, %v8284_v48 }
0x119d   :  { %v770_v12 = vpop.permute.xlu0 %769 }
0x119e   :  { %v772_v13 = vmul.f32 %v7760_v11, %v770_v12 }
0x11a0   :  { %774 = vrot.lane.b32.xlu1 %v772_v13, %s8095_s8 }
0x1212   :  { %v775_v15 = vpop.permute.xlu1 %774 }
0x1213   :  { %v8356_v16 = vadd.f32 %v775_v15, %v767_v14 }
0x1215   :  { %7761 = vtanh.f32 %v8356_v16 }
0x1222   :  { %v7762_v17 = vpop.eup %7761 }
0x1223   :  { %780 = vrot.lane.b32.xlu0 %v7762_v17, %s8100_s0 }
0x1295   :  { %v781_v19 = vpop.permute.xlu0 %780 }
0x1296   :  { %v783_v20 = vmul.f32 %v7760_v11, %v781_v19 }
0x1298   :  { %785 = vrot.lane.b32.xlu1 %v783_v20, %s8095_s8 }
0x130a   :  { %v786_v22 = vpop.permute.xlu1 %785 }
0x130b   :  { %6990 = vmatmul.mubr.msk.f32.vlgmr.msra.gmra.mxu1 %vm85_vm1, %v786_v22  ;;  %7067 = vmatmul.mubr.msk.f32.vlgmr.msra.gmra.mxu0 %vm85_vm1, %v786_v22 }
0x130c   :  { %7004 = vmatpush3.msra.mxu1 %v8289_v52  ;;  %7081 = vmatpush3.msra.mxu0 %v8361_v21 }
0x130d   :  { %7005 = vmatprep.subr.mxu1 %v8098_v1  ;;  %7082 = vmatprep.subr.mxu0 %v8098_v1 }
0x130e   :  { %7006 = vmatpush3.msra.mxu1 %v8295_v54  ;;  %7083 = vmatpush3.msra.mxu0 %v8365_v24 }
0x130f   :  { %7007 = vmatprep.subr.mxu1 %v8098_v1  ;;  %7084 = vmatprep.subr.mxu0 %v8098_v1 }
0x1310   :  { %7008 = vmatpush3.msra.mxu1 %v8301_v55  ;;  %7085 = vmatpush3.msra.mxu0 %v8371_v25 }
0x1311   :  { %7009 = vmatprep.subr.mxu1 %v8098_v1  ;;  %7086 = vmatprep.subr.mxu0 %v8098_v1 }
0x1312   :  { %7010 = vmatpush3.msra.mxu1 %v8305_v56  ;;  %7011 = vmatprep.mubr.msk.f32.mxu1 %vm8099_vm0, %v8098_v1 }
0x1313   :  { %7087 = vmatpush3.msra.mxu0 %v8379_v26  ;;  %7088 = vmatprep.mubr.msk.f32.mxu0 %vm8099_vm0, %v8098_v1 }
0x1314   :  { %7012 = vmatmul.mubr.msk.f32.vlgmr.msra.gmra.mxu1 %vm85_vm1, %v8214_v41  ;;  %7025 = vmatprep.subr.mxu1 %v8098_v1  ;;  %v80_v41 = vld [vmem:[#allocation3 + $0xe] sm:$0x3] }
0x1315   :  { %7089 = vmatmul.mubr.f32.vlgmr.msra.gmra.mxu0 %v8098_v1  ;;  %7026 = vmatpush3.msra.mxu1 %v8289_v52 }
0x1316   :  { %7027 = vmatprep.subr.mxu1 %v8098_v1  ;;  %7033 = vmatprep.mubr.msk.f32.mxu1 %vm8099_vm0, %v8098_v1 }
0x1317   :  { %7028 = vmatpush3.msra.mxu1 %v8295_v54  ;;  %7102 = vmatprep.subr.mxu0 %v8098_v1 }
0x1318   :  { %7029 = vmatprep.subr.mxu1 %v8098_v1  ;;  %7103 = vmatpush3.msra.mxu0 %v8361_v21 }
0x1319   :  { %7030 = vmatpush3.msra.mxu1 %v8301_v55  ;;  %7104 = vmatprep.subr.mxu0 %v8098_v1 }
0x131a   :  { %7031 = vmatprep.subr.mxu1 %v8098_v1  ;;  %7105 = vmatpush3.msra.mxu0 %v8365_v24 }
0x131b   :  { %7032 = vmatpush3.msra.mxu1 %v8305_v56  ;;  %7106 = vmatprep.subr.mxu0 %v8098_v1 }
0x131c   :  { %7034 = vmatmul.mubr.msk.f32.vlgmr.msra.gmra.mxu1 %vm85_vm1, %v8250_v18  ;;  %7047 = vmatprep.subr.mxu1 %v8098_v1 }
0x131d   :  { %7048 = vmatpush3.msra.mxu1 %v8289_v52  ;;  %7055 = vmatprep.mubr.msk.f32.mxu1 %vm8099_vm0, %v8098_v1 }
0x131e   :  { %7049 = vmatprep.subr.mxu1 %v8098_v1  ;;  %7107 = vmatpush3.msra.mxu0 %v8371_v25 }
0x131f   :  { %7050 = vmatpush3.msra.mxu1 %v8295_v54  ;;  %7108 = vmatprep.subr.mxu0 %v8098_v1 }
0x1320   :  { %7051 = vmatprep.subr.mxu1 %v8098_v1  ;;  %7109 = vmatpush3.msra.mxu0 %v8379_v26 }
0x1321   :  { %7052 = vmatpush3.msra.mxu1 %v8301_v55  ;;  %7110 = vmatprep.mubr.msk.f32.mxu0 %vm8099_vm0, %v8098_v1 }
0x1322   :  { %7053 = vmatprep.subr.mxu1 %v8098_v1  ;;  %7124 = vmatprep.subr.mxu0 %v8098_v1 }
0x1323   :  { %7054 = vmatpush3.msra.mxu1 %v8305_v56 }
0x1324   :  { %7056 = vmatmul.mubr.msk.f32.vlgmr.msra.gmra.mxu1 %vm85_vm1, %v8291_v53  ;;  %7069 = vmatprep.subr.mxu1 %v8098_v1 }
0x1325   :  { %7070 = vmatpush3.msra.mxu1 %v8289_v52  ;;  %7077 = vmatprep.mubr.msk.f32.mxu1 %vm8099_vm0, %v8098_v1 }
0x1326   :  { %7071 = vmatprep.subr.mxu1 %v8098_v1 }
0x1327   :  { %7072 = vmatpush3.msra.mxu1 %v8295_v54 }
0x1328   :  { %7073 = vmatprep.subr.mxu1 %v8098_v1 }
0x1329   :  { %7074 = vmatpush3.msra.mxu1 %v8301_v55 }
0x132a   :  { %7075 = vmatprep.subr.mxu1 %v8098_v1 }
0x132b   :  { %7076 = vmatpush3.msra.mxu1 %v8305_v56 }
0x132c   :  { %7091 = vmatprep.subr.mxu1 %v8098_v1 }
0x13cb   :  { %v855_v18 = vpop.f32.mrf.mxu1  ;;  %v8438_v27 = vpop.f32.mrf.mxu0 }
0x13cc   :  { %v859_v28 = vadd.f32 %v855_v18, %v80_v41 }
0x13cd   :  { %v6991_v29 = vpop.f32.mrf.mxu1  ;;  %v7068_v30 = vpop.f32.mrf.mxu0 }
0x13ce   :  { %7763 = vtanh.f32 %v859_v28  ;;  %v6442_v3 = vmul.f32 -1.442695, %v859_v28 }
0x13d4   :  { %v8447_v33 = vpop.f32.mrf.mxu1 }
0x13d5   :  { %v1531_v34 = vpop.f32.mrf.mxu0  ;;  %v1032_v11 = vadd.f32 %v8443_v31, %v8447_v33 }
0x13d6   :  { %v1535_v35 = vadd.f32 %v1531_v34, %v962_v32  ;;  %v7013_v36 = vpop.f32.mrf.mxu1 }
0x13d7   :  { %v7090_v37 = vpop.f32.mrf.mxu0 }
0x13d8   :  { %7765 = vtanh.f32 %v1535_v35  ;;  %v6452_v44 = vmul.f32 -1.442695, %v1535_v35  ;;  %v1102_v35 = vadd.f32 %v8443_v31, %v8349_v63 }
0x13d9   :  { %7767 = vpow2.f32 %v6442_v3 }
0x13da   :  { %7769 = vpow2.f32 %v6452_v44 }
0x13db   :  { %v7764_v38 = vpop.eup %7763 }
0x13dc   :  { %v8449_v39 = vpop.f32.mrf.mxu1  ;;  %869 = vrot.lane.b32.xlu0 %v7764_v38, %s8100_s0 }
0x13de   :  { %v7035_v2 = vpop.f32.mrf.mxu1 }
0x13e4   :  { %v8452_v40 = vpop.f32.mrf.mxu1 }
0x13e5   :  { %v7766_v42 = vpop.eup %7765 }
0x13e6   :  { %1545 = vrot.lane.b32.xlu1 %v7766_v42, %s8100_s0  ;;  %v7057_v43 = vpop.f32.mrf.mxu1  ;;  %v7768_v4 = vpop.eup %7767 }
0x13e7   :  { %v863_v45 = vadd.f32 1.0, %v7768_v4  ;;  %v7770_v46 = vpop.eup %7769 }
0x13e8   :  { %v1539_v5 = vadd.f32 1.0, %v7770_v46 }
0x13e9   :  { %7771 = vrcp.f32 %v863_v45 }
0x13ea   :  { %7773 = vrcp.f32 %v1539_v5 }
0x13f6   :  { %v7772_v47 = vpop.eup %7771 }
0x13f7   :  { %v7774_v50 = vpop.eup %7773  ;;  %v867_v53 = vmul.f32 %v7772_v47, %v8356_v16 }
0x13f8   :  { %v1543_v56 = vmul.f32 0.0, %v7774_v50 }
0x144e   :  { %v870_v48 = vpop.permute.xlu0 %869 }
0x144f   :  { %v872_v49 = vmul.f32 %v7772_v47, %v870_v48 }
0x1451   :  { %874 = vrot.lane.b32.xlu0 %v872_v49, %s8095_s8 }
0x1458   :  { %v1546_v51 = vpop.permute.xlu1 %1545 }
0x1459   :  { %v1548_v52 = vmul.f32 %v7774_v50, %v1546_v51  ;;  %v1172_v51 = vadd.f32 %v8443_v31, %v8449_v39 }
0x145b   :  { %1550 = vrot.lane.b32.xlu1 %v1548_v52, %s8095_s8 }
0x14c3   :  { %v875_v54 = vpop.permute.xlu0 %874 }
0x14c4   :  { %v877_v55 = vadd.f32 %v875_v54, %v867_v53 }
0x14c6   :  { %7775 = vtanh.f32 %v877_v55 }
0x14cd   :  { %v1551_v23 = vpop.permute.xlu1 %1550 }
0x14ce   :  { %v1553_v57 = vadd.f32 %v1551_v23, %v1543_v56 }
0x14d0   :  { %7777 = vtanh.f32 %v1553_v57 }
0x14d3   :  { %v7776_v58 = vpop.eup %7775 }
0x14d4   :  { %880 = vrot.lane.b32.xlu0 %v7776_v58, %s8100_s0 }
0x14dd   :  { %v7778_v59 = vpop.eup %7777 }
0x14de   :  { %1556 = vrot.lane.b32.xlu1 %v7778_v59, %s8100_s0 }
0x1546   :  { %v881_v60 = vpop.permute.xlu0 %880 }
0x1547   :  { %v883_v61 = vmul.f32 %v7772_v47, %v881_v60 }
0x1549   :  { %1386 = vrot.lane.b32.xlu0 %v883_v61, %s8095_s8 }
0x1550   :  { %v1557_v62 = vpop.permute.xlu1 %1556 }
0x1551   :  { %v1559_v0 = vmul.f32 %v7774_v50, %v1557_v62 }
0x1553   :  { %1561 = vrot.lane.b32.xlu1 %v1559_v0, %s8095_s8 }
0x15bb   :  { %v1387_v7 = vpop.permute.xlu0 %1386 }
0x15bc   :  { %7078 = vmatmul.mubr.msk.f32.vlgmr.msra.gmra.mxu1 %vm85_vm1, %v1387_v7 }
0x15bd   :  { %7092 = vmatpush3.msra.mxu1 %v8361_v21  ;;  %7099 = vmatprep.mubr.msk.f32.mxu1 %vm8099_vm0, %v8098_v1 }
0x15be   :  { %7093 = vmatprep.subr.mxu1 %v8098_v1 }
0x15bf   :  { %7094 = vmatpush3.msra.mxu1 %v8365_v24 }
0x15c0   :  { %7095 = vmatprep.subr.mxu1 %v8098_v1 }
0x15c1   :  { %7096 = vmatpush3.msra.mxu1 %v8371_v25 }
0x15c2   :  { %7097 = vmatprep.subr.mxu1 %v8098_v1 }
0x15c3   :  { %7098 = vmatpush3.msra.mxu1 %v8379_v26 }
0x15c4   :  { %7113 = vmatprep.subr.mxu1 %v8098_v1 }
0x15c5   :  { %v8473_v8 = vpop.permute.xlu1 %1561 }
0x15c6   :  { %7100 = vmatmul.mubr.msk.f32.vlgmr.msra.gmra.mxu1 %vm85_vm1, %v8473_v8 }
0x15c7   :  { %7114 = vmatpush3.msra.mxu1 %v8361_v21  ;;  %7121 = vmatprep.mubr.msk.f32.mxu1 %vm8099_vm0, %v8098_v1 }
0x15c8   :  { %7115 = vmatprep.subr.mxu1 %v8098_v1 }
0x15c9   :  { %7116 = vmatpush3.msra.mxu1 %v8365_v24 }
0x15ca   :  { %7117 = vmatprep.subr.mxu1 %v8098_v1 }
0x15cb   :  { %7118 = vmatpush3.msra.mxu1 %v8371_v25 }
0x15cc   :  { %7119 = vmatprep.subr.mxu1 %v8098_v1 }
0x15cd   :  { %7120 = vmatpush3.msra.mxu1 %v8379_v26 }
0x15ce   :  { %7135 = vmatprep.subr.mxu1 %v8098_v1 }
0x167c   :  { %v8487_v9 = vpop.f32.mrf.mxu1 }
0x167e   :  { %v7079_v10 = vpop.f32.mrf.mxu1 }
0x1686   :  { %v1631_v12 = vpop.f32.mrf.mxu1 }
0x1687   :  { %v1635_v13 = vadd.f32 %v1631_v12, %v1032_v11  ;;  %v1242_v12 = vadd.f32 %v8443_v31, %v8352_v6 }
0x1688   :  { %v7101_v14 = vpop.f32.mrf.mxu1 }
0x1689   :  { %7779 = vtanh.f32 %v1635_v13  ;;  %v6454_v16 = vmul.f32 -1.442695, %v1635_v13 }
0x168b   :  { %7781 = vpow2.f32 %v6454_v16 }
0x1696   :  { %v7780_v15 = vpop.eup %7779 }
0x1697   :  { %1645 = vrot.lane.b32.xlu0 %v7780_v15, %s8100_s0 }
0x1698   :  { %v7782_v17 = vpop.eup %7781 }
0x1699   :  { %v1639_v19 = vadd.f32 1.0, %v7782_v17 }
0x169b   :  { %7783 = vrcp.f32 %v1639_v19 }
0x16a8   :  { %v7784_v20 = vpop.eup %7783 }
0x16a9   :  { %v1643_v18 = vmul.f32 %v7784_v20, %v1553_v57 }
0x1709   :  { %v1646_v22 = vpop.permute.xlu0 %1645 }
0x170a   :  { %v1648_v41 = vmul.f32 %v7784_v20, %v1646_v22 }
0x170c   :  { %1650 = vrot.lane.b32.xlu1 %v1648_v41, %s8095_s8 }
0x177e   :  { %v1651_v28 = vpop.permute.xlu1 %1650 }
0x177f   :  { %v1653_v29 = vadd.f32 %v1651_v28, %v1643_v18 }
0x1781   :  { %7785 = vtanh.f32 %v1653_v29 }
0x178e   :  { %v7786_v30 = vpop.eup %7785 }
0x178f   :  { %1656 = vrot.lane.b32.xlu0 %v7786_v30, %s8100_s0 }
0x1801   :  { %v1657_v32 = vpop.permute.xlu0 %1656 }
0x1802   :  { %v1659_v33 = vmul.f32 %v7784_v20, %v1657_v32 }
0x1804   :  { %1661 = vrot.lane.b32.xlu1 %v1659_v33, %s8095_s8 }
0x1876   :  { %v8495_v34 = vpop.permute.xlu1 %1661 }
0x1877   :  { %7111 = vmatmul.mubr.msk.f32.vlgmr.msra.gmra.mxu0 %vm85_vm1, %v8495_v34 }
0x1878   :  { %7125 = vmatpush3.msra.mxu0 %v8361_v21  ;;  %7132 = vmatprep.mubr.msk.f32.mxu0 %vm8099_vm0, %v8098_v1 }
0x1879   :  { %7126 = vmatprep.subr.mxu0 %v8098_v1 }
0x187a   :  { %7127 = vmatpush3.msra.mxu0 %v8365_v24 }
0x187b   :  { %7128 = vmatprep.subr.mxu0 %v8098_v1 }
0x187c   :  { %7129 = vmatpush3.msra.mxu0 %v8371_v25 }
0x187d   :  { %7130 = vmatprep.subr.mxu0 %v8098_v1 }
0x187e   :  { %7131 = vmatpush3.msra.mxu0 %v8379_v26 }
0x187f   :  { %7146 = vmatprep.subr.mxu0 %v8098_v1 }
0x1937   :  { %v1731_v36 = vpop.f32.mrf.mxu0 }
0x1938   :  { %v1735_v37 = vadd.f32 %v1731_v36, %v1102_v35 }
0x1939   :  { %v7112_v38 = vpop.f32.mrf.mxu0 }
0x193a   :  { %7787 = vtanh.f32 %v1735_v37  ;;  %v6456_v42 = vmul.f32 -1.442695, %v1735_v37 }
0x193c   :  { %7789 = vpow2.f32 %v6456_v42 }
0x1947   :  { %v7788_v2 = vpop.eup %7787 }
0x1948   :  { %1745 = vrot.lane.b32.xlu0 %v7788_v2, %s8100_s0 }
0x1949   :  { %v7790_v43 = vpop.eup %7789 }
0x194a   :  { %v1739_v3 = vadd.f32 1.0, %v7790_v43 }
0x194c   :  { %7791 = vrcp.f32 %v1739_v3 }
0x1959   :  { %v7792_v44 = vpop.eup %7791 }
0x195a   :  { %v1743_v46 = vmul.f32 %v7792_v44, %v1653_v29 }
0x19ba   :  { %v1746_v4 = vpop.permute.xlu0 %1745 }
0x19bb   :  { %v1748_v45 = vmul.f32 %v7792_v44, %v1746_v4 }
0x19bd   :  { %1750 = vrot.lane.b32.xlu1 %v1748_v45, %s8095_s8 }
0x1a2f   :  { %v1751_v5 = vpop.permute.xlu1 %1750 }
0x1a30   :  { %v1753_v63 = vadd.f32 %v1751_v5, %v1743_v46 }
0x1a32   :  { %7793 = vtanh.f32 %v1753_v63 }
0x1a3f   :  { %v7794_v47 = vpop.eup %7793 }
0x1a40   :  { %1756 = vrot.lane.b32.xlu0 %v7794_v47, %s8100_s0 }
0x1ab2   :  { %v1757_v48 = vpop.permute.xlu0 %1756 }
0x1ab3   :  { %v1759_v49 = vmul.f32 %v7792_v44, %v1757_v48  ;;  %v8584_v48 = vld [vmem:[#allocation5 + $0x30] sm:$0xff] }
0x1ab5   :  { %1761 = vrot.lane.b32.xlu1 %v1759_v49, %s8095_s8  ;;  %v8590_v49 = vld [vmem:[#allocation5 + $0x28] sm:$0xff] }
0x1b27   :  { %v8515_v50 = vpop.permute.xlu1 %1761 }
0x1b28   :  { %7122 = vmatmul.mubr.msk.f32.vlgmr.msra.gmra.mxu1 %vm85_vm1, %v8515_v50 }
0x1b29   :  { %7136 = vmatpush3.msra.mxu1 %v8361_v21  ;;  %7143 = vmatprep.mubr.msk.f32.mxu1 %vm8099_vm0, %v8098_v1 }
0x1b2a   :  { %7137 = vmatprep.subr.mxu1 %v8098_v1 }
0x1b2b   :  { %7138 = vmatpush3.msra.mxu1 %v8365_v24 }
0x1b2c   :  { %7139 = vmatprep.subr.mxu1 %v8098_v1 }
0x1b2d   :  { %7140 = vmatpush3.msra.mxu1 %v8371_v25 }
0x1b2e   :  { %7141 = vmatprep.subr.mxu1 %v8098_v1 }
0x1b2f   :  { %7142 = vmatpush3.msra.mxu1 %v8379_v26 }
0x1b30   :  { %7157 = vmatprep.subr.mxu1 %v8098_v1 }
0x1be8   :  { %v1831_v52 = vpop.f32.mrf.mxu1 }
0x1be9   :  { %v1835_v53 = vadd.f32 %v1831_v52, %v1172_v51  ;;  %v8594_v51 = vld [vmem:[#allocation5 + $0x20] sm:$0xff] }
0x1bea   :  { %v7123_v54 = vpop.f32.mrf.mxu1 }
0x1beb   :  { %7795 = vtanh.f32 %v1835_v53  ;;  %v6458_v56 = vmul.f32 -1.442695, %v1835_v53 }
0x1bed   :  { %7797 = vpow2.f32 %v6458_v56 }
0x1bf8   :  { %v7796_v55 = vpop.eup %7795 }
0x1bf9   :  { %1845 = vrot.lane.b32.xlu0 %v7796_v55, %s8100_s0 }
0x1bfa   :  { %v7798_v23 = vpop.eup %7797 }
0x1bfb   :  { %v1839_v57 = vadd.f32 1.0, %v7798_v23 }
0x1bfd   :  { %7799 = vrcp.f32 %v1839_v57 }
0x1c0a   :  { %v7800_v58 = vpop.eup %7799 }
0x1c0b   :  { %v1843_v61 = vmul.f32 %v7800_v58, %v1753_v63  ;;  %v8578_v63 = vld [vmem:[#allocation5 + $0x38] sm:$0xff] }
0x1c6b   :  { %v1846_v59 = vpop.permute.xlu0 %1845 }
0x1c6c   :  { %v1848_v60 = vmul.f32 %v7800_v58, %v1846_v59 }
0x1c6e   :  { %1850 = vrot.lane.b32.xlu1 %v1848_v60, %s8095_s8 }
0x1ce0   :  { %v1851_v62 = vpop.permute.xlu1 %1850 }
0x1ce1   :  { %v1853_v39 = vadd.f32 %v1851_v62, %v1843_v61 }
0x1ce3   :  { %7801 = vtanh.f32 %v1853_v39 }
0x1cf0   :  { %v7802_v0 = vpop.eup %7801 }
0x1cf1   :  { %1856 = vrot.lane.b32.xlu0 %v7802_v0, %s8100_s0 }
0x1d63   :  { %v1857_v7 = vpop.permute.xlu0 %1856 }
0x1d64   :  { %v1859_v10 = vmul.f32 %v7800_v58, %v1857_v7 }
0x1d66   :  { %1861 = vrot.lane.b32.xlu1 %v1859_v10, %s8095_s8 }
0x1dd8   :  { %v8535_v11 = vpop.permute.xlu1 %1861 }
0x1dd9   :  { %7133 = vmatmul.mubr.msk.f32.vlgmr.msra.gmra.mxu0 %vm85_vm1, %v8535_v11 }
0x1dda   :  { %7147 = vmatpush3.msra.mxu0 %v8361_v21  ;;  %7154 = vmatprep.mubr.msk.f32.mxu0 %vm8099_vm0, %v8098_v1 }
0x1ddb   :  { %7148 = vmatprep.subr.mxu0 %v8098_v1 }
0x1ddc   :  { %7149 = vmatpush3.msra.mxu0 %v8365_v24 }
0x1ddd   :  { %7150 = vmatprep.subr.mxu0 %v8098_v1 }
0x1dde   :  { %7151 = vmatpush3.msra.mxu0 %v8371_v25 }
0x1ddf   :  { %7152 = vmatprep.subr.mxu0 %v8098_v1 }
0x1de0   :  { %7153 = vmatpush3.msra.mxu0 %v8379_v26 }
0x1de1   :  { %7168 = vmatprep.subr.mxu0 %v8098_v1 }
0x1e99   :  { %v1931_v13 = vpop.f32.mrf.mxu0 }
0x1e9a   :  { %v1935_v14 = vadd.f32 %v1931_v13, %v1242_v12 }
0x1e9b   :  { %v7134_v15 = vpop.f32.mrf.mxu0 }
0x1e9c   :  { %7803 = vtanh.f32 %v1935_v14  ;;  %v6460_v17 = vmul.f32 -1.442695, %v1935_v14 }
0x1e9e   :  { %7805 = vpow2.f32 %v6460_v17 }
0x1ea9   :  { %v7804_v16 = vpop.eup %7803 }
0x1eaa   :  { %1945 = vrot.lane.b32.xlu0 %v7804_v16, %s8100_s0  ;;  %v8652_v16 = vld [vmem:[#allocation7 + $0x58] sm:$0xff] }
0x1eab   :  { %v7806_v19 = vpop.eup %7805 }
0x1eac   :  { %v1939_v20 = vadd.f32 1.0, %v7806_v19  ;;  %v8656_v19 = vld [vmem:[#allocation7 + $0x50] sm:$0xff] }
0x1eae   :  { %7807 = vrcp.f32 %v1939_v20  ;;  %v8662_v20 = vld [vmem:[#allocation7 + $0x48] sm:$0xff] }
0x1ebb   :  { %v7808_v22 = vpop.eup %7807 }
0x1ebc   :  { %v1943_v28 = vmul.f32 %v7808_v22, %v1853_v39 }
0x1f1c   :  { %v1946_v41 = vpop.permute.xlu0 %1945 }
0x1f1d   :  { %v1948_v18 = vmul.f32 %v7808_v22, %v1946_v41 }
0x1f1f   :  { %1950 = vrot.lane.b32.xlu1 %v1948_v18, %s8095_s8 }
0x1f91   :  { %v1951_v29 = vpop.permute.xlu1 %1950 }
0x1f92   :  { %v1953_v6 = vadd.f32 %v1951_v29, %v1943_v28 }
0x1f94   :  { %7809 = vtanh.f32 %v1953_v6 }
0x1fa1   :  { %v7810_v30 = vpop.eup %7809 }
0x1fa2   :  { %1956 = vrot.lane.b32.xlu0 %v7810_v30, %s8100_s0 }
0x2014   :  { %v1957_v32 = vpop.permute.xlu0 %1956 }
0x2015   :  { %v1959_v33 = vmul.f32 %v7808_v22, %v1957_v32  ;;  %v8670_v22 = vld [vmem:[#allocation7 + $0x40] sm:$0xff] }
0x2017   :  { %1961 = vrot.lane.b32.xlu1 %v1959_v33, %s8095_s8 }
0x2089   :  { %v8555_v35 = vpop.permute.xlu1 %1961 }
0x208a   :  { %7144 = vmatmul.mubr.msk.f32.vlgmr.msra.gmra.mxu1 %vm85_vm1, %v8555_v35 }
0x208b   :  { %7158 = vmatpush3.msra.mxu1 %v8361_v21  ;;  %7165 = vmatprep.mubr.msk.f32.mxu1 %vm8099_vm0, %v8098_v1  ;;  %v1312_v21 = vadd.f32 %v8443_v31, %v8452_v40 }
0x208c   :  { %7159 = vmatprep.subr.mxu1 %v8098_v1 }
0x208d   :  { %7160 = vmatpush3.msra.mxu1 %v8365_v24 }
0x208e   :  { %7161 = vmatprep.subr.mxu1 %v8098_v1 }
0x208f   :  { %7162 = vmatpush3.msra.mxu1 %v8371_v25 }
0x2090   :  { %7163 = vmatprep.subr.mxu1 %v8098_v1 }
0x2091   :  { %7164 = vmatpush3.msra.mxu1 %v8379_v26 }
0x2092   :  { %7179 = vmatprep.subr.mxu1 %v8098_v1 }
0x214a   :  { %v2031_v36 = vpop.f32.mrf.mxu1 }
0x214b   :  { %v2035_v37 = vadd.f32 %v2031_v36, %v1312_v21 }
0x214c   :  { %v7145_v38 = vpop.f32.mrf.mxu1 }
0x214d   :  { %7811 = vtanh.f32 %v2035_v37  ;;  %v6462_v24 = vmul.f32 -1.442695, %v2035_v37 }
0x214f   :  { %7813 = vpow2.f32 %v6462_v24 }
0x215a   :  { %v7812_v2 = vpop.eup %7811 }
0x215b   :  { %2045 = vrot.lane.b32.xlu0 %v7812_v2, %s8100_s0 }
0x215c   :  { %v7814_v42 = vpop.eup %7813 }
0x215d   :  { %v2039_v25 = vadd.f32 1.0, %v7814_v42 }
0x215f   :  { %7815 = vrcp.f32 %v2039_v25 }
0x216c   :  { %v7816_v43 = vpop.eup %7815 }
0x216d   :  { %v2043_v44 = vmul.f32 %v7816_v43, %v1953_v6  ;;  %v8736_v6 = vld [vmem:[%s9460_s3 + $0x1] ss:$0 sm:$0xff] }
0x21cd   :  { %v2046_v3 = vpop.permute.xlu0 %2045 }
0x21ce   :  { %v2048_v26 = vmul.f32 %v7816_v43, %v2046_v3 }
0x21d0   :  { %2050 = vrot.lane.b32.xlu1 %v2048_v26, %s8095_s8 }
0x2242   :  { %v2051_v4 = vpop.permute.xlu1 %2050 }
0x2243   :  { %v8573_v40 = vadd.f32 %v2051_v4, %v2043_v44 }
0x2245   :  { %7817 = vtanh.f32 %v8573_v40 }
0x2252   :  { %v7818_v45 = vpop.eup %7817 }
0x2253   :  { %2056 = vrot.lane.b32.xlu0 %v7818_v45, %s8100_s0 }
0x22c5   :  { %v2057_v46 = vpop.permute.xlu0 %2056 }
0x22c6   :  { %v2059_v5 = vmul.f32 %v7816_v43, %v2057_v46 }
0x22c8   :  { %2061 = vrot.lane.b32.xlu1 %v2059_v5, %s8095_s8 }
0x233a   :  { %v8580_v47 = vpop.permute.xlu1 %2061 }
0x233b   :  { %7155 = vmatmul.mubr.msk.f32.vlgmr.msra.gmra.mxu0 %vm85_vm1, %v8580_v47 }
0x233c   :  { %7169 = vmatpush3.msra.mxu0 %v8578_v63  ;;  %7176 = vmatprep.mubr.msk.f32.mxu0 %vm8099_vm0, %v8098_v1 }
0x233d   :  { %7170 = vmatprep.subr.mxu0 %v8098_v1 }
0x233e   :  { %7171 = vmatpush3.msra.mxu0 %v8584_v48 }
0x233f   :  { %7172 = vmatprep.subr.mxu0 %v8098_v1 }
0x2340   :  { %7173 = vmatpush3.msra.mxu0 %v8590_v49 }
0x2341   :  { %7174 = vmatprep.subr.mxu0 %v8098_v1 }
0x2342   :  { %7175 = vmatpush3.msra.mxu0 %v8594_v51 }
0x2343   :  { %7177 = vmatmul.mubr.msk.f32.vlgmr.msra.gmra.mxu0 %vm85_vm1, %v8473_v8  ;;  %7190 = vmatprep.subr.mxu0 %v8098_v1  ;;  %v1382_v8 = vadd.f32 %v8443_v31, %v8438_v27 }
0x2344   :  { %7191 = vmatpush3.msra.mxu0 %v8578_v63  ;;  %7198 = vmatprep.mubr.msk.f32.mxu0 %vm8099_vm0, %v8098_v1 }
0x2345   :  { %7192 = vmatprep.subr.mxu0 %v8098_v1 }
0x2346   :  { %7193 = vmatpush3.msra.mxu0 %v8584_v48 }
0x2347   :  { %7194 = vmatprep.subr.mxu0 %v8098_v1 }
0x2348   :  { %7195 = vmatpush3.msra.mxu0 %v8590_v49 }
0x2349   :  { %7196 = vmatprep.subr.mxu0 %v8098_v1 }
0x234a   :  { %7197 = vmatpush3.msra.mxu0 %v8594_v51 }
0x234b   :  { %7199 = vmatmul.mubr.msk.f32.vlgmr.msra.gmra.mxu0 %vm85_vm1, %v8515_v50  ;;  %7212 = vmatprep.subr.mxu0 %v8098_v1 }
0x234c   :  { %7213 = vmatpush3.msra.mxu0 %v8578_v63  ;;  %7220 = vmatprep.mubr.msk.f32.mxu0 %vm8099_vm0, %v8098_v1 }
0x234d   :  { %7214 = vmatprep.subr.mxu0 %v8098_v1 }
0x234e   :  { %7215 = vmatpush3.msra.mxu0 %v8584_v48 }
0x234f   :  { %7216 = vmatprep.subr.mxu0 %v8098_v1 }
0x2350   :  { %7217 = vmatpush3.msra.mxu0 %v8590_v49 }
0x2351   :  { %7218 = vmatprep.subr.mxu0 %v8098_v1 }
0x2352   :  { %7219 = vmatpush3.msra.mxu0 %v8594_v51 }
0x2353   :  { %7221 = vmatmul.mubr.msk.f32.vlgmr.msra.gmra.mxu0 %vm85_vm1, %v8555_v35  ;;  %7234 = vmatprep.subr.mxu0 %v8098_v1 }
0x2354   :  { %7235 = vmatpush3.msra.mxu0 %v8578_v63  ;;  %7242 = vmatprep.mubr.msk.f32.mxu0 %vm8099_vm0, %v8098_v1 }
0x2355   :  { %7236 = vmatprep.subr.mxu0 %v8098_v1 }
0x2356   :  { %7237 = vmatpush3.msra.mxu0 %v8584_v48 }
0x2357   :  { %7238 = vmatprep.subr.mxu0 %v8098_v1 }
0x2358   :  { %7239 = vmatpush3.msra.mxu0 %v8590_v49 }
0x2359   :  { %7240 = vmatprep.subr.mxu0 %v8098_v1 }
0x235a   :  { %7241 = vmatpush3.msra.mxu0 %v8594_v51 }
0x235b   :  { %7256 = vmatprep.subr.mxu0 %v8098_v1 }
0x23fb   :  { %v2131_v50 = vpop.f32.mrf.mxu0 }
0x23fc   :  { %v2135_v52 = vadd.f32 %v2131_v50, %v1382_v8 }
0x23fd   :  { %v7156_v53 = vpop.f32.mrf.mxu0 }
0x23fe   :  { %7819 = vtanh.f32 %v2135_v52  ;;  %v6464_v60 = vmul.f32 -1.442695, %v2135_v52 }
0x2400   :  { %7821 = vpow2.f32 %v6464_v60 }
0x2403   :  { %v8638_v54 = vpop.f32.mrf.mxu0 }
0x2404   :  { %v2340_v30 = vadd.f32 %v8736_v6, %v8638_v54 }
0x2405   :  { %v7178_v55 = vpop.f32.mrf.mxu0 }
0x240b   :  { %v7820_v56 = vpop.eup %7819  ;;  %v8640_v23 = vpop.f32.mrf.mxu0 }
0x240c   :  { %2145 = vrot.lane.b32.xlu0 %v7820_v56, %s8100_s0 }
0x240d   :  { %v7200_v57 = vpop.f32.mrf.mxu0  ;;  %v7822_v61 = vpop.eup %7821 }
0x240e   :  { %v2139_v27 = vadd.f32 1.0, %v7822_v61 }
0x2410   :  { %7823 = vrcp.f32 %v2139_v27 }
0x2413   :  { %v8643_v58 = vpop.f32.mrf.mxu0 }
0x2415   :  { %v7222_v59 = vpop.f32.mrf.mxu0 }
0x241d   :  { %v7824_v62 = vpop.eup %7823 }
0x241e   :  { %v2143_v7 = vmul.f32 %v7824_v62, %v8573_v40 }
0x247e   :  { %v2146_v39 = vpop.permute.xlu0 %2145 }
0x247f   :  { %v2148_v0 = vmul.f32 %v7824_v62, %v2146_v39 }
0x2481   :  { %2150 = vrot.lane.b32.xlu1 %v2148_v0, %s8095_s8 }
0x24f3   :  { %v2151_v10 = vpop.permute.xlu1 %2150 }
0x24f4   :  { %v8647_v12 = vadd.f32 %v2151_v10, %v2143_v7 }
0x24f6   :  { %7825 = vtanh.f32 %v8647_v12 }
0x2503   :  { %v7826_v13 = vpop.eup %7825 }
0x2504   :  { %2156 = vrot.lane.b32.xlu0 %v7826_v13, %s8100_s0 }
0x2576   :  { %v2157_v14 = vpop.permute.xlu0 %2156 }
0x2577   :  { %v2159_v15 = vmul.f32 %v7824_v62, %v2157_v14 }
0x2579   :  { %2161 = vrot.lane.b32.xlu1 %v2159_v15, %s8095_s8 }
0x25eb   :  { %v2162_v17 = vpop.permute.xlu1 %2161 }
0x25ec   :  { %7166 = vmatmul.mubr.msk.f32.vlgmr.msra.gmra.mxu1 %vm85_vm1, %v2162_v17  ;;  %7243 = vmatmul.mubr.msk.f32.vlgmr.msra.gmra.mxu0 %vm85_vm1, %v2162_v17 }
0x25ed   :  { %7180 = vmatpush3.msra.mxu1 %v8578_v63  ;;  %7257 = vmatpush3.msra.mxu0 %v8652_v16 }
0x25ee   :  { %7181 = vmatprep.subr.mxu1 %v8098_v1  ;;  %7258 = vmatprep.subr.mxu0 %v8098_v1 }
0x25ef   :  { %7182 = vmatpush3.msra.mxu1 %v8584_v48  ;;  %7259 = vmatpush3.msra.mxu0 %v8656_v19 }
0x25f0   :  { %7183 = vmatprep.subr.mxu1 %v8098_v1  ;;  %7260 = vmatprep.subr.mxu0 %v8098_v1 }
0x25f1   :  { %7184 = vmatpush3.msra.mxu1 %v8590_v49  ;;  %7261 = vmatpush3.msra.mxu0 %v8662_v20 }
0x25f2   :  { %7185 = vmatprep.subr.mxu1 %v8098_v1  ;;  %7262 = vmatprep.subr.mxu0 %v8098_v1 }
0x25f3   :  { %7186 = vmatpush3.msra.mxu1 %v8594_v51  ;;  %7187 = vmatprep.mubr.msk.f32.mxu1 %vm8099_vm0, %v8098_v1 }
0x25f4   :  { %7263 = vmatpush3.msra.mxu0 %v8670_v22  ;;  %7264 = vmatprep.mubr.msk.f32.mxu0 %vm8099_vm0, %v8098_v1 }
0x25f5   :  { %7188 = vmatmul.mubr.msk.f32.vlgmr.msra.gmra.mxu1 %vm85_vm1, %v8495_v34  ;;  %7201 = vmatprep.subr.mxu1 %v8098_v1  ;;  %v1457_v34 = vadd.f32 %v8443_v31, %v8487_v9 }
0x25f6   :  { %7265 = vmatmul.mubr.f32.vlgmr.msra.gmra.mxu0 %v8098_v1  ;;  %7202 = vmatpush3.msra.mxu1 %v8578_v63 }
0x25f7   :  { %7203 = vmatprep.subr.mxu1 %v8098_v1  ;;  %7209 = vmatprep.mubr.msk.f32.mxu1 %vm8099_vm0, %v8098_v1 }
0x25f8   :  { %7204 = vmatpush3.msra.mxu1 %v8584_v48  ;;  %7278 = vmatprep.subr.mxu0 %v8098_v1 }
0x25f9   :  { %7205 = vmatprep.subr.mxu1 %v8098_v1  ;;  %7279 = vmatpush3.msra.mxu0 %v8652_v16 }
0x25fa   :  { %7206 = vmatpush3.msra.mxu1 %v8590_v49  ;;  %7280 = vmatprep.subr.mxu0 %v8098_v1 }
0x25fb   :  { %7207 = vmatprep.subr.mxu1 %v8098_v1  ;;  %7281 = vmatpush3.msra.mxu0 %v8656_v19 }
0x25fc   :  { %7208 = vmatpush3.msra.mxu1 %v8594_v51  ;;  %7282 = vmatprep.subr.mxu0 %v8098_v1 }
0x25fd   :  { %7210 = vmatmul.mubr.msk.f32.vlgmr.msra.gmra.mxu1 %vm85_vm1, %v8535_v11  ;;  %7223 = vmatprep.subr.mxu1 %v8098_v1 }
0x25fe   :  { %7224 = vmatpush3.msra.mxu1 %v8578_v63  ;;  %7231 = vmatprep.mubr.msk.f32.mxu1 %vm8099_vm0, %v8098_v1 }
0x25ff   :  { %7225 = vmatprep.subr.mxu1 %v8098_v1  ;;  %7283 = vmatpush3.msra.mxu0 %v8662_v20 }
0x2600   :  { %7226 = vmatpush3.msra.mxu1 %v8584_v48  ;;  %7284 = vmatprep.subr.mxu0 %v8098_v1 }
0x2601   :  { %7227 = vmatprep.subr.mxu1 %v8098_v1  ;;  %7285 = vmatpush3.msra.mxu0 %v8670_v22 }
0x2602   :  { %7228 = vmatpush3.msra.mxu1 %v8590_v49  ;;  %7286 = vmatprep.mubr.msk.f32.mxu0 %vm8099_vm0, %v8098_v1 }
0x2603   :  { %7229 = vmatprep.subr.mxu1 %v8098_v1  ;;  %7300 = vmatprep.subr.mxu0 %v8098_v1 }
0x2604   :  { %7230 = vmatpush3.msra.mxu1 %v8594_v51 }
0x2605   :  { %7232 = vmatmul.mubr.msk.f32.vlgmr.msra.gmra.mxu1 %vm85_vm1, %v8580_v47  ;;  %7245 = vmatprep.subr.mxu1 %v8098_v1 }
0x2606   :  { %7246 = vmatpush3.msra.mxu1 %v8578_v63  ;;  %7253 = vmatprep.mubr.msk.f32.mxu1 %vm8099_vm0, %v8098_v1 }
0x2607   :  { %7247 = vmatprep.subr.mxu1 %v8098_v1 }
0x2608   :  { %7248 = vmatpush3.msra.mxu1 %v8584_v48 }
0x2609   :  { %7249 = vmatprep.subr.mxu1 %v8098_v1 }
0x260a   :  { %7250 = vmatpush3.msra.mxu1 %v8590_v49 }
0x260b   :  { %7251 = vmatprep.subr.mxu1 %v8098_v1 }
0x260c   :  { %7252 = vmatpush3.msra.mxu1 %v8594_v51 }
0x260d   :  { %7267 = vmatprep.subr.mxu1 %v8098_v1 }
0x26ac   :  { %v2231_v11 = vpop.f32.mrf.mxu1  ;;  %v8731_v41 = vpop.f32.mrf.mxu0 }
0x26ad   :  { %v2235_v18 = vadd.f32 %v2231_v11, %v1457_v34 }
0x26ae   :  { %v7167_v28 = vpop.f32.mrf.mxu1  ;;  %v7244_v29 = vpop.f32.mrf.mxu0 }
0x26af   :  { %7827 = vtanh.f32 %v2235_v18  ;;  %v6466_v42 = vmul.f32 -1.442695, %v2235_v18 }
0x26b5   :  { %v8740_v32 = vpop.f32.mrf.mxu1 }
0x26b6   :  { %v2909_v33 = vpop.f32.mrf.mxu0  ;;  %v2410_v62 = vadd.f32 %v8736_v6, %v8740_v32 }
0x26b7   :  { %v2913_v35 = vadd.f32 %v2909_v33, %v2340_v30  ;;  %v7189_v31 = vpop.f32.mrf.mxu1 }
0x26b8   :  { %v7266_v9 = vpop.f32.mrf.mxu0 }
0x26b9   :  { %7829 = vtanh.f32 %v2913_v35  ;;  %v6477_v25 = vmul.f32 -1.442695, %v2913_v35  ;;  %v2480_v35 = vadd.f32 %v8736_v6, %v8640_v23 }
0x26ba   :  { %7831 = vpow2.f32 %v6466_v42 }
0x26bb   :  { %7833 = vpow2.f32 %v6477_v25 }
0x26bc   :  { %v7828_v21 = vpop.eup %7827 }
0x26bd   :  { %v8742_v36 = vpop.f32.mrf.mxu1  ;;  %2245 = vrot.lane.b32.xlu0 %v7828_v21, %s8100_s0 }
0x26bf   :  { %v7211_v37 = vpop.f32.mrf.mxu1 }
0x26c5   :  { %v8745_v38 = vpop.f32.mrf.mxu1 }
0x26c6   :  { %v7830_v2 = vpop.eup %7829 }
0x26c7   :  { %2923 = vrot.lane.b32.xlu1 %v7830_v2, %s8100_s0  ;;  %v7233_v24 = vpop.f32.mrf.mxu1  ;;  %v7832_v43 = vpop.eup %7831 }
0x26c8   :  { %v2239_v3 = vadd.f32 1.0, %v7832_v43  ;;  %v7834_v26 = vpop.eup %7833 }
0x26c9   :  { %v2917_v44 = vadd.f32 1.0, %v7834_v26 }
0x26ca   :  { %7835 = vrcp.f32 %v2239_v3 }
0x26cb   :  { %7837 = vrcp.f32 %v2917_v44 }
0x26d7   :  { %v7836_v4 = vpop.eup %7835 }
0x26d8   :  { %v7838_v46 = vpop.eup %7837  ;;  %v2243_v47 = vmul.f32 %v7836_v4, %v8647_v12 }
0x26d9   :  { %v2921_v51 = vmul.f32 0.0, %v7838_v46 }
0x272f   :  { %v2246_v40 = vpop.permute.xlu0 %2245 }
0x2730   :  { %v2248_v45 = vmul.f32 %v7836_v4, %v2246_v40 }
0x2732   :  { %2250 = vrot.lane.b32.xlu0 %v2248_v45, %s8095_s8 }
0x2739   :  { %v2924_v5 = vpop.permute.xlu1 %2923 }
0x273a   :  { %v2926_v63 = vmul.f32 %v7838_v46, %v2924_v5  ;;  %v2550_v5 = vadd.f32 %v8736_v6, %v8742_v36 }
0x273c   :  { %2928 = vrot.lane.b32.xlu1 %v2926_v63, %s8095_s8 }
0x27a4   :  { %v2251_v48 = vpop.permute.xlu0 %2250 }
0x27a5   :  { %v2253_v49 = vadd.f32 %v2251_v48, %v2243_v47 }
0x27a7   :  { %7839 = vtanh.f32 %v2253_v49 }
0x27ae   :  { %v2929_v8 = vpop.permute.xlu1 %2928 }
0x27af   :  { %v2931_v50 = vadd.f32 %v2929_v8, %v2921_v51 }
0x27b1   :  { %7841 = vtanh.f32 %v2931_v50 }
0x27b4   :  { %v7840_v52 = vpop.eup %7839 }
0x27b5   :  { %2256 = vrot.lane.b32.xlu0 %v7840_v52, %s8100_s0 }
0x27be   :  { %v7842_v53 = vpop.eup %7841 }
0x27bf   :  { %2934 = vrot.lane.b32.xlu1 %v7842_v53, %s8100_s0 }
0x2827   :  { %v2257_v54 = vpop.permute.xlu0 %2256 }
0x2828   :  { %v2259_v55 = vmul.f32 %v7836_v4, %v2257_v54 }
0x282a   :  { %2764 = vrot.lane.b32.xlu0 %v2259_v55, %s8095_s8 }
0x2831   :  { %v2935_v56 = vpop.permute.xlu1 %2934 }
0x2832   :  { %v2937_v57 = vmul.f32 %v7838_v46, %v2935_v56 }
0x2834   :  { %2939 = vrot.lane.b32.xlu1 %v2937_v57, %s8095_s8 }
0x289c   :  { %v2765_v59 = vpop.permute.xlu0 %2764 }
0x289d   :  { %7254 = vmatmul.mubr.msk.f32.vlgmr.msra.gmra.mxu1 %vm85_vm1, %v2765_v59 }
0x289e   :  { %7268 = vmatpush3.msra.mxu1 %v8652_v16  ;;  %7275 = vmatprep.mubr.msk.f32.mxu1 %vm8099_vm0, %v8098_v1 }
0x289f   :  { %7269 = vmatprep.subr.mxu1 %v8098_v1 }
0x28a0   :  { %7270 = vmatpush3.msra.mxu1 %v8656_v19 }
0x28a1   :  { %7271 = vmatprep.subr.mxu1 %v8098_v1 }
0x28a2   :  { %7272 = vmatpush3.msra.mxu1 %v8662_v20 }
0x28a3   :  { %7273 = vmatprep.subr.mxu1 %v8098_v1 }
0x28a4   :  { %7274 = vmatpush3.msra.mxu1 %v8670_v22 }
0x28a5   :  { %7289 = vmatprep.subr.mxu1 %v8098_v1 }
0x28a6   :  { %v8766_v60 = vpop.permute.xlu1 %2939 }
0x28a7   :  { %7276 = vmatmul.mubr.msk.f32.vlgmr.msra.gmra.mxu1 %vm85_vm1, %v8766_v60 }
0x28a8   :  { %7290 = vmatpush3.msra.mxu1 %v8652_v16  ;;  %7297 = vmatprep.mubr.msk.f32.mxu1 %vm8099_vm0, %v8098_v1 }
0x28a9   :  { %7291 = vmatprep.subr.mxu1 %v8098_v1 }
0x28aa   :  { %7292 = vmatpush3.msra.mxu1 %v8656_v19 }
0x28ab   :  { %7293 = vmatprep.subr.mxu1 %v8098_v1 }
0x28ac   :  { %7294 = vmatpush3.msra.mxu1 %v8662_v20 }
0x28ad   :  { %7295 = vmatprep.subr.mxu1 %v8098_v1 }
0x28ae   :  { %7296 = vmatpush3.msra.mxu1 %v8670_v22 }
0x28af   :  { %7311 = vmatprep.subr.mxu1 %v8098_v1 }
0x295d   :  { %v8780_v61 = vpop.f32.mrf.mxu1 }
0x295f   :  { %v7255_v27 = vpop.f32.mrf.mxu1 }
0x2967   :  { %v3009_v39 = vpop.f32.mrf.mxu1 }
0x2968   :  { %v3013_v0 = vadd.f32 %v3009_v39, %v2410_v62  ;;  %v2620_v39 = vadd.f32 %v8736_v6, %v8643_v58 }
0x2969   :  { %v7277_v7 = vpop.f32.mrf.mxu1 }
0x296a   :  { %7843 = vtanh.f32 %v3013_v0  ;;  %v6479_v12 = vmul.f32 -1.442695, %v3013_v0 }
0x296c   :  { %7845 = vpow2.f32 %v6479_v12 }
0x2977   :  { %v7844_v10 = vpop.eup %7843 }
0x2978   :  { %3023 = vrot.lane.b32.xlu0 %v7844_v10, %s8100_s0 }
0x2979   :  { %v7846_v13 = vpop.eup %7845 }
0x297a   :  { %v3017_v14 = vadd.f32 1.0, %v7846_v13 }
0x297c   :  { %7847 = vrcp.f32 %v3017_v14 }
0x2989   :  { %v7848_v15 = vpop.eup %7847 }
0x298a   :  { %v3021_v11 = vmul.f32 %v7848_v15, %v2931_v50 }
0x29ea   :  { %v3024_v17 = vpop.permute.xlu0 %3023 }
0x29eb   :  { %v3026_v34 = vmul.f32 %v7848_v15, %v3024_v17 }
0x29ed   :  { %3028 = vrot.lane.b32.xlu1 %v3026_v34, %s8095_s8 }
0x2a5f   :  { %v3029_v18 = vpop.permute.xlu1 %3028 }
0x2a60   :  { %v3031_v28 = vadd.f32 %v3029_v18, %v3021_v11 }
0x2a62   :  { %7849 = vtanh.f32 %v3031_v28 }
0x2a6f   :  { %v7850_v29 = vpop.eup %7849 }
0x2a70   :  { %3034 = vrot.lane.b32.xlu0 %v7850_v29, %s8100_s0 }
0x2ae2   :  { %v3035_v30 = vpop.permute.xlu0 %3034 }
0x2ae3   :  { %v3037_v32 = vmul.f32 %v7848_v15, %v3035_v30 }
0x2ae5   :  { %3039 = vrot.lane.b32.xlu1 %v3037_v32, %s8095_s8 }
0x2b57   :  { %v8788_v33 = vpop.permute.xlu1 %3039 }
0x2b58   :  { %7287 = vmatmul.mubr.msk.f32.vlgmr.msra.gmra.mxu0 %vm85_vm1, %v8788_v33 }
0x2b59   :  { %7301 = vmatpush3.msra.mxu0 %v8652_v16  ;;  %7308 = vmatprep.mubr.msk.f32.mxu0 %vm8099_vm0, %v8098_v1 }
0x2b5a   :  { %7302 = vmatprep.subr.mxu0 %v8098_v1 }
0x2b5b   :  { %7303 = vmatpush3.msra.mxu0 %v8656_v19 }
0x2b5c   :  { %7304 = vmatprep.subr.mxu0 %v8098_v1 }
0x2b5d   :  { %7305 = vmatpush3.msra.mxu0 %v8662_v20 }
0x2b5e   :  { %7306 = vmatprep.subr.mxu0 %v8098_v1 }
0x2b5f   :  { %7307 = vmatpush3.msra.mxu0 %v8670_v22 }
0x2b60   :  { %7322 = vmatprep.subr.mxu0 %v8098_v1 }
0x2c18   :  { %v3109_v31 = vpop.f32.mrf.mxu0 }
0x2c19   :  { %v3113_v9 = vadd.f32 %v3109_v31, %v2480_v35 }
0x2c1a   :  { %v7288_v21 = vpop.f32.mrf.mxu0 }
0x2c1b   :  { %7851 = vtanh.f32 %v3113_v9  ;;  %v6481_v2 = vmul.f32 -1.442695, %v3113_v9 }
0x2c1d   :  { %7853 = vpow2.f32 %v6481_v2 }
0x2c28   :  { %v7852_v37 = vpop.eup %7851 }
0x2c29   :  { %3123 = vrot.lane.b32.xlu0 %v7852_v37, %s8100_s0 }
0x2c2a   :  { %v7854_v24 = vpop.eup %7853 }
0x2c2b   :  { %v3117_v42 = vadd.f32 1.0, %v7854_v24 }
0x2c2d   :  { %7855 = vrcp.f32 %v3117_v42 }
0x2c3a   :  { %v7856_v25 = vpop.eup %7855 }
0x2c3b   :  { %v3121_v26 = vmul.f32 %v7856_v25, %v3031_v28 }
0x2c9b   :  { %v3124_v43 = vpop.permute.xlu0 %3123 }
0x2c9c   :  { %v3126_v3 = vmul.f32 %v7856_v25, %v3124_v43 }
0x2c9e   :  { %3128 = vrot.lane.b32.xlu1 %v3126_v3, %s8095_s8 }
0x2d10   :  { %v3129_v44 = vpop.permute.xlu1 %3128 }
0x2d11   :  { %v3131_v23 = vadd.f32 %v3129_v44, %v3121_v26 }
0x2d13   :  { %7857 = vtanh.f32 %v3131_v23 }
0x2d20   :  { %v7858_v4 = vpop.eup %7857 }
0x2d21   :  { %3134 = vrot.lane.b32.xlu0 %v7858_v4, %s8100_s0 }
0x2d93   :  { %v3135_v40 = vpop.permute.xlu0 %3134 }
0x2d94   :  { %v3137_v45 = vmul.f32 %v7856_v25, %v3135_v40  ;;  %v8877_v40 = vld [vmem:[#allocation5 + $0x50] sm:$0xff] }
0x2d96   :  { %3139 = vrot.lane.b32.xlu1 %v3137_v45, %s8095_s8  ;;  %v8883_v45 = vld [vmem:[#allocation5 + $0x48] sm:$0xff] }
0x2e08   :  { %v8808_v46 = vpop.permute.xlu1 %3139 }
0x2e09   :  { %7298 = vmatmul.mubr.msk.f32.vlgmr.msra.gmra.mxu1 %vm85_vm1, %v8808_v46 }
0x2e0a   :  { %7312 = vmatpush3.msra.mxu1 %v8652_v16  ;;  %7319 = vmatprep.mubr.msk.f32.mxu1 %vm8099_vm0, %v8098_v1 }
0x2e0b   :  { %7313 = vmatprep.subr.mxu1 %v8098_v1 }
0x2e0c   :  { %7314 = vmatpush3.msra.mxu1 %v8656_v19 }
0x2e0d   :  { %7315 = vmatprep.subr.mxu1 %v8098_v1 }
0x2e0e   :  { %7316 = vmatpush3.msra.mxu1 %v8662_v20 }
0x2e0f   :  { %7317 = vmatprep.subr.mxu1 %v8098_v1 }
0x2e10   :  { %7318 = vmatpush3.msra.mxu1 %v8670_v22 }
0x2e11   :  { %7333 = vmatprep.subr.mxu1 %v8098_v1 }
0x2ec9   :  { %v3209_v63 = vpop.f32.mrf.mxu1 }
0x2eca   :  { %v3213_v47 = vadd.f32 %v3209_v63, %v2550_v5  ;;  %v8887_v5 = vld [vmem:[#allocation5 + $0x40] sm:$0xff] }
0x2ecb   :  { %v7299_v48 = vpop.f32.mrf.mxu1 }
0x2ecc   :  { %7859 = vtanh.f32 %v3213_v47  ;;  %v6483_v51 = vmul.f32 -1.442695, %v3213_v47 }
0x2ece   :  { %7861 = vpow2.f32 %v6483_v51 }
0x2ed9   :  { %v7860_v49 = vpop.eup %7859 }
0x2eda   :  { %3223 = vrot.lane.b32.xlu0 %v7860_v49, %s8100_s0 }
0x2edb   :  { %v7862_v8 = vpop.eup %7861 }
0x2edc   :  { %v3217_v50 = vadd.f32 1.0, %v7862_v8 }
0x2ede   :  { %7863 = vrcp.f32 %v3217_v50 }
0x2eeb   :  { %v7864_v52 = vpop.eup %7863 }
0x2eec   :  { %v3221_v55 = vmul.f32 %v7864_v52, %v3131_v23  ;;  %v8871_v23 = vld [vmem:[#allocation5 + $0x58] sm:$0xff] }
0x2f4c   :  { %v3224_v53 = vpop.permute.xlu0 %3223 }
0x2f4d   :  { %v3226_v54 = vmul.f32 %v7864_v52, %v3224_v53 }
0x2f4f   :  { %3228 = vrot.lane.b32.xlu1 %v3226_v54, %s8095_s8 }
0x2fc1   :  { %v3229_v56 = vpop.permute.xlu1 %3228 }
0x2fc2   :  { %v3231_v36 = vadd.f32 %v3229_v56, %v3221_v55 }
0x2fc4   :  { %7865 = vtanh.f32 %v3231_v36 }
0x2fd1   :  { %v7866_v57 = vpop.eup %7865 }
0x2fd2   :  { %3234 = vrot.lane.b32.xlu0 %v7866_v57, %s8100_s0 }
0x3044   :  { %v3235_v59 = vpop.permute.xlu0 %3234 }
0x3045   :  { %v3237_v27 = vmul.f32 %v7864_v52, %v3235_v59 }
0x3047   :  { %3239 = vrot.lane.b32.xlu1 %v3237_v27, %s8095_s8 }
0x30b9   :  { %v8828_v62 = vpop.permute.xlu1 %3239 }
0x30ba   :  { %7309 = vmatmul.mubr.msk.f32.vlgmr.msra.gmra.mxu0 %vm85_vm1, %v8828_v62 }
0x30bb   :  { %7323 = vmatpush3.msra.mxu0 %v8652_v16  ;;  %7330 = vmatprep.mubr.msk.f32.mxu0 %vm8099_vm0, %v8098_v1 }
0x30bc   :  { %7324 = vmatprep.subr.mxu0 %v8098_v1 }
0x30bd   :  { %7325 = vmatpush3.msra.mxu0 %v8656_v19 }
0x30be   :  { %7326 = vmatprep.subr.mxu0 %v8098_v1 }
0x30bf   :  { %7327 = vmatpush3.msra.mxu0 %v8662_v20 }
0x30c0   :  { %7328 = vmatprep.subr.mxu0 %v8098_v1 }
0x30c1   :  { %7329 = vmatpush3.msra.mxu0 %v8670_v22 }
0x30c2   :  { %7344 = vmatprep.subr.mxu0 %v8098_v1 }
0x317a   :  { %v3309_v0 = vpop.f32.mrf.mxu0 }
0x317b   :  { %v3313_v7 = vadd.f32 %v3309_v0, %v2620_v39 }
0x317c   :  { %v7310_v10 = vpop.f32.mrf.mxu0 }
0x317d   :  { %7867 = vtanh.f32 %v3313_v7  ;;  %v6485_v13 = vmul.f32 -1.442695, %v3313_v7 }
0x317f   :  { %7869 = vpow2.f32 %v6485_v13 }
0x318a   :  { %v7868_v12 = vpop.eup %7867 }
0x318b   :  { %3323 = vrot.lane.b32.xlu0 %v7868_v12, %s8100_s0  ;;  %v8945_v12 = vld [vmem:[#allocation7 + $0x78] sm:$0xff] }
0x318c   :  { %v7870_v14 = vpop.eup %7869 }
0x318d   :  { %v3317_v15 = vadd.f32 1.0, %v7870_v14  ;;  %v8949_v14 = vld [vmem:[#allocation7 + $0x70] sm:$0xff] }
0x318f   :  { %7871 = vrcp.f32 %v3317_v15  ;;  %v8955_v15 = vld [vmem:[#allocation7 + $0x68] sm:$0xff] }
0x319c   :  { %v7872_v17 = vpop.eup %7871 }
0x319d   :  { %v3321_v18 = vmul.f32 %v7872_v17, %v3231_v36 }
0x31fd   :  { %v3324_v34 = vpop.permute.xlu0 %3323 }
0x31fe   :  { %v3326_v11 = vmul.f32 %v7872_v17, %v3324_v34 }
0x3200   :  { %3328 = vrot.lane.b32.xlu1 %v3326_v11, %s8095_s8 }
0x3272   :  { %v3329_v28 = vpop.permute.xlu1 %3328 }
0x3273   :  { %v3331_v58 = vadd.f32 %v3329_v28, %v3321_v18 }
0x3275   :  { %7873 = vtanh.f32 %v3331_v58 }
0x3282   :  { %v7874_v29 = vpop.eup %7873 }
0x3283   :  { %3334 = vrot.lane.b32.xlu0 %v7874_v29, %s8100_s0 }
0x32f5   :  { %v3335_v30 = vpop.permute.xlu0 %3334 }
0x32f6   :  { %v3337_v32 = vmul.f32 %v7872_v17, %v3335_v30  ;;  %v8963_v17 = vld [vmem:[#allocation7 + $0x60] sm:$0xff] }
0x32f8   :  { %3339 = vrot.lane.b32.xlu1 %v3337_v32, %s8095_s8 }
0x336a   :  { %v8848_v35 = vpop.permute.xlu1 %3339 }
0x336b   :  { %7320 = vmatmul.mubr.msk.f32.vlgmr.msra.gmra.mxu1 %vm85_vm1, %v8848_v35 }
0x336c   :  { %7334 = vmatpush3.msra.mxu1 %v8652_v16  ;;  %7341 = vmatprep.mubr.msk.f32.mxu1 %vm8099_vm0, %v8098_v1  ;;  %v2690_v16 = vadd.f32 %v8736_v6, %v8745_v38 }
0x336d   :  { %7335 = vmatprep.subr.mxu1 %v8098_v1 }
0x336e   :  { %7336 = vmatpush3.msra.mxu1 %v8656_v19 }
0x336f   :  { %7337 = vmatprep.subr.mxu1 %v8098_v1 }
0x3370   :  { %7338 = vmatpush3.msra.mxu1 %v8662_v20 }
0x3371   :  { %7339 = vmatprep.subr.mxu1 %v8098_v1 }
0x3372   :  { %7340 = vmatpush3.msra.mxu1 %v8670_v22 }
0x3373   :  { %7355 = vmatprep.subr.mxu1 %v8098_v1 }
0x342b   :  { %v3409_v31 = vpop.f32.mrf.mxu1 }
0x342c   :  { %v3413_v9 = vadd.f32 %v3409_v31, %v2690_v16 }
0x342d   :  { %v7321_v21 = vpop.f32.mrf.mxu1 }
0x342e   :  { %7875 = vtanh.f32 %v3413_v9  ;;  %v6487_v19 = vmul.f32 -1.442695, %v3413_v9 }
0x3430   :  { %7877 = vpow2.f32 %v6487_v19 }
0x343b   :  { %v7876_v37 = vpop.eup %7875 }
0x343c   :  { %3423 = vrot.lane.b32.xlu0 %v7876_v37, %s8100_s0 }
0x343d   :  { %v7878_v2 = vpop.eup %7877 }
0x343e   :  { %v3417_v20 = vadd.f32 1.0, %v7878_v2 }
0x3440   :  { %7879 = vrcp.f32 %v3417_v20 }
0x344d   :  { %v7880_v24 = vpop.eup %7879 }
0x344e   :  { %v3421_v25 = vmul.f32 %v7880_v24, %v3331_v58  ;;  %v9029_v58 = vld [vmem:[%s9460_s3 + $0x2] ss:$0 sm:$0xff] }
0x34ae   :  { %v3424_v42 = vpop.permute.xlu0 %3423 }
0x34af   :  { %v3426_v22 = vmul.f32 %v7880_v24, %v3424_v42 }
0x34b1   :  { %3428 = vrot.lane.b32.xlu1 %v3426_v22, %s8095_s8 }
0x3523   :  { %v3429_v43 = vpop.permute.xlu1 %3428 }
0x3524   :  { %v8866_v38 = vadd.f32 %v3429_v43, %v3421_v25 }
0x3526   :  { %7881 = vtanh.f32 %v8866_v38 }
0x3533   :  { %v7882_v3 = vpop.eup %7881 }
0x3534   :  { %3434 = vrot.lane.b32.xlu0 %v7882_v3, %s8100_s0 }
0x35a6   :  { %v3435_v26 = vpop.permute.xlu0 %3434 }
0x35a7   :  { %v3437_v44 = vmul.f32 %v7880_v24, %v3435_v26 }
0x35a9   :  { %3439 = vrot.lane.b32.xlu1 %v3437_v44, %s8095_s8 }
0x361b   :  { %v8873_v4 = vpop.permute.xlu1 %3439 }
0x361c   :  { %7331 = vmatmul.mubr.msk.f32.vlgmr.msra.gmra.mxu0 %vm85_vm1, %v8873_v4 }
0x361d   :  { %7345 = vmatpush3.msra.mxu0 %v8871_v23  ;;  %7352 = vmatprep.mubr.msk.f32.mxu0 %vm8099_vm0, %v8098_v1 }
0x361e   :  { %7346 = vmatprep.subr.mxu0 %v8098_v1 }
0x361f   :  { %7347 = vmatpush3.msra.mxu0 %v8877_v40 }
0x3620   :  { %7348 = vmatprep.subr.mxu0 %v8098_v1 }
0x3621   :  { %7349 = vmatpush3.msra.mxu0 %v8883_v45 }
0x3622   :  { %7350 = vmatprep.subr.mxu0 %v8098_v1 }
0x3623   :  { %7351 = vmatpush3.msra.mxu0 %v8887_v5 }
0x3624   :  { %7353 = vmatmul.mubr.msk.f32.vlgmr.msra.gmra.mxu0 %vm85_vm1, %v8766_v60  ;;  %7366 = vmatprep.subr.mxu0 %v8098_v1  ;;  %v2760_v60 = vadd.f32 %v8736_v6, %v8731_v41 }
0x3625   :  { %7367 = vmatpush3.msra.mxu0 %v8871_v23  ;;  %7374 = vmatprep.mubr.msk.f32.mxu0 %vm8099_vm0, %v8098_v1 }
0x3626   :  { %7368 = vmatprep.subr.mxu0 %v8098_v1 }
0x3627   :  { %7369 = vmatpush3.msra.mxu0 %v8877_v40 }
0x3628   :  { %7370 = vmatprep.subr.mxu0 %v8098_v1 }
0x3629   :  { %7371 = vmatpush3.msra.mxu0 %v8883_v45 }
0x362a   :  { %7372 = vmatprep.subr.mxu0 %v8098_v1 }
0x362b   :  { %7373 = vmatpush3.msra.mxu0 %v8887_v5 }
0x362c   :  { %7375 = vmatmul.mubr.msk.f32.vlgmr.msra.gmra.mxu0 %vm85_vm1, %v8808_v46  ;;  %7388 = vmatprep.subr.mxu0 %v8098_v1 }
0x362d   :  { %7389 = vmatpush3.msra.mxu0 %v8871_v23  ;;  %7396 = vmatprep.mubr.msk.f32.mxu0 %vm8099_vm0, %v8098_v1 }
0x362e   :  { %7390 = vmatprep.subr.mxu0 %v8098_v1 }
0x362f   :  { %7391 = vmatpush3.msra.mxu0 %v8877_v40 }
0x3630   :  { %7392 = vmatprep.subr.mxu0 %v8098_v1 }
0x3631   :  { %7393 = vmatpush3.msra.mxu0 %v8883_v45 }
0x3632   :  { %7394 = vmatprep.subr.mxu0 %v8098_v1 }
0x3633   :  { %7395 = vmatpush3.msra.mxu0 %v8887_v5 }
0x3634   :  { %7397 = vmatmul.mubr.msk.f32.vlgmr.msra.gmra.mxu0 %vm85_vm1, %v8848_v35  ;;  %7410 = vmatprep.subr.mxu0 %v8098_v1 }
0x3635   :  { %7411 = vmatpush3.msra.mxu0 %v8871_v23  ;;  %7418 = vmatprep.mubr.msk.f32.mxu0 %vm8099_vm0, %v8098_v1 }
0x3636   :  { %7412 = vmatprep.subr.mxu0 %v8098_v1 }
0x3637   :  { %7413 = vmatpush3.msra.mxu0 %v8877_v40 }
0x3638   :  { %7414 = vmatprep.subr.mxu0 %v8098_v1 }
0x3639   :  { %7415 = vmatpush3.msra.mxu0 %v8883_v45 }
0x363a   :  { %7416 = vmatprep.subr.mxu0 %v8098_v1 }
0x363b   :  { %7417 = vmatpush3.msra.mxu0 %v8887_v5 }
0x363c   :  { %7432 = vmatprep.subr.mxu0 %v8098_v1 }
0x36dc   :  { %v3509_v46 = vpop.f32.mrf.mxu0 }
0x36dd   :  { %v3513_v63 = vadd.f32 %v3509_v46, %v2760_v60 }
0x36de   :  { %v7332_v47 = vpop.f32.mrf.mxu0 }
0x36df   :  { %7883 = vtanh.f32 %v3513_v63  ;;  %v6489_v54 = vmul.f32 -1.442695, %v3513_v63 }
0x36e1   :  { %7885 = vpow2.f32 %v6489_v54 }
0x36e4   :  { %v8931_v48 = vpop.f32.mrf.mxu0 }
0x36e5   :  { %v3718_v29 = vadd.f32 %v9029_v58, %v8931_v48 }
0x36e6   :  { %v7354_v49 = vpop.f32.mrf.mxu0 }
0x36ec   :  { %v7884_v51 = vpop.eup %7883  ;;  %v8933_v8 = vpop.f32.mrf.mxu0 }
0x36ed   :  { %3523 = vrot.lane.b32.xlu0 %v7884_v51, %s8100_s0 }
0x36ee   :  { %v7376_v50 = vpop.f32.mrf.mxu0  ;;  %v7886_v55 = vpop.eup %7885 }
0x36ef   :  { %v3517_v41 = vadd.f32 1.0, %v7886_v55 }
0x36f1   :  { %7887 = vrcp.f32 %v3517_v41 }
0x36f4   :  { %v8936_v52 = vpop.f32.mrf.mxu0 }
0x36f6   :  { %v7398_v53 = vpop.f32.mrf.mxu0 }
0x36fe   :  { %v7888_v56 = vpop.eup %7887 }
0x36ff   :  { %v3521_v59 = vmul.f32 %v7888_v56, %v8866_v38 }
0x375f   :  { %v3524_v36 = vpop.permute.xlu0 %3523 }
0x3760   :  { %v3526_v57 = vmul.f32 %v7888_v56, %v3524_v36 }
0x3762   :  { %3528 = vrot.lane.b32.xlu1 %v3526_v57, %s8095_s8 }
0x37d4   :  { %v3529_v27 = vpop.permute.xlu1 %3528 }
0x37d5   :  { %v8940_v39 = vadd.f32 %v3529_v27, %v3521_v59 }
0x37d7   :  { %7889 = vtanh.f32 %v8940_v39 }
0x37e4   :  { %v7890_v0 = vpop.eup %7889 }
0x37e5   :  { %3534 = vrot.lane.b32.xlu0 %v7890_v0, %s8100_s0 }
0x3857   :  { %v3535_v7 = vpop.permute.xlu0 %3534 }
0x3858   :  { %v3537_v10 = vmul.f32 %v7888_v56, %v3535_v7 }
0x385a   :  { %3539 = vrot.lane.b32.xlu1 %v3537_v10, %s8095_s8 }
0x38cc   :  { %v3540_v13 = vpop.permute.xlu1 %3539 }
0x38cd   :  { %7342 = vmatmul.mubr.msk.f32.vlgmr.msra.gmra.mxu1 %vm85_vm1, %v3540_v13  ;;  %7419 = vmatmul.mubr.msk.f32.vlgmr.msra.gmra.mxu0 %vm85_vm1, %v3540_v13 }
0x38ce   :  { %7356 = vmatpush3.msra.mxu1 %v8871_v23  ;;  %7433 = vmatpush3.msra.mxu0 %v8945_v12 }
0x38cf   :  { %7357 = vmatprep.subr.mxu1 %v8098_v1  ;;  %7434 = vmatprep.subr.mxu0 %v8098_v1 }
0x38d0   :  { %7358 = vmatpush3.msra.mxu1 %v8877_v40  ;;  %7435 = vmatpush3.msra.mxu0 %v8949_v14 }
0x38d1   :  { %7359 = vmatprep.subr.mxu1 %v8098_v1  ;;  %7436 = vmatprep.subr.mxu0 %v8098_v1 }
0x38d2   :  { %7360 = vmatpush3.msra.mxu1 %v8883_v45  ;;  %7437 = vmatpush3.msra.mxu0 %v8955_v15 }
0x38d3   :  { %7361 = vmatprep.subr.mxu1 %v8098_v1  ;;  %7438 = vmatprep.subr.mxu0 %v8098_v1 }
0x38d4   :  { %7362 = vmatpush3.msra.mxu1 %v8887_v5  ;;  %7363 = vmatprep.mubr.msk.f32.mxu1 %vm8099_vm0, %v8098_v1 }
0x38d5   :  { %7439 = vmatpush3.msra.mxu0 %v8963_v17  ;;  %7440 = vmatprep.mubr.msk.f32.mxu0 %vm8099_vm0, %v8098_v1 }
0x38d6   :  { %7364 = vmatmul.mubr.msk.f32.vlgmr.msra.gmra.mxu1 %vm85_vm1, %v8788_v33  ;;  %7377 = vmatprep.subr.mxu1 %v8098_v1  ;;  %v2835_v33 = vadd.f32 %v8736_v6, %v8780_v61 }
0x38d7   :  { %7441 = vmatmul.mubr.f32.vlgmr.msra.gmra.mxu0 %v8098_v1  ;;  %7378 = vmatpush3.msra.mxu1 %v8871_v23 }
0x38d8   :  { %7379 = vmatprep.subr.mxu1 %v8098_v1  ;;  %7385 = vmatprep.mubr.msk.f32.mxu1 %vm8099_vm0, %v8098_v1 }
0x38d9   :  { %7380 = vmatpush3.msra.mxu1 %v8877_v40  ;;  %7454 = vmatprep.subr.mxu0 %v8098_v1 }
0x38da   :  { %7381 = vmatprep.subr.mxu1 %v8098_v1  ;;  %7455 = vmatpush3.msra.mxu0 %v8945_v12 }
0x38db   :  { %7382 = vmatpush3.msra.mxu1 %v8883_v45  ;;  %7456 = vmatprep.subr.mxu0 %v8098_v1 }
0x38dc   :  { %7383 = vmatprep.subr.mxu1 %v8098_v1  ;;  %7457 = vmatpush3.msra.mxu0 %v8949_v14 }
0x38dd   :  { %7384 = vmatpush3.msra.mxu1 %v8887_v5  ;;  %7458 = vmatprep.subr.mxu0 %v8098_v1 }
0x38de   :  { %7386 = vmatmul.mubr.msk.f32.vlgmr.msra.gmra.mxu1 %vm85_vm1, %v8828_v62  ;;  %7399 = vmatprep.subr.mxu1 %v8098_v1 }
0x38df   :  { %7400 = vmatpush3.msra.mxu1 %v8871_v23  ;;  %7407 = vmatprep.mubr.msk.f32.mxu1 %vm8099_vm0, %v8098_v1 }
0x38e0   :  { %7401 = vmatprep.subr.mxu1 %v8098_v1  ;;  %7459 = vmatpush3.msra.mxu0 %v8955_v15 }
0x38e1   :  { %7402 = vmatpush3.msra.mxu1 %v8877_v40  ;;  %7460 = vmatprep.subr.mxu0 %v8098_v1 }
0x38e2   :  { %7403 = vmatprep.subr.mxu1 %v8098_v1  ;;  %7461 = vmatpush3.msra.mxu0 %v8963_v17 }
0x38e3   :  { %7404 = vmatpush3.msra.mxu1 %v8883_v45  ;;  %7462 = vmatprep.mubr.msk.f32.mxu0 %vm8099_vm0, %v8098_v1 }
0x38e4   :  { %7405 = vmatprep.subr.mxu1 %v8098_v1  ;;  %7476 = vmatprep.subr.mxu0 %v8098_v1 }
0x38e5   :  { %7406 = vmatpush3.msra.mxu1 %v8887_v5 }
0x38e6   :  { %7408 = vmatmul.mubr.msk.f32.vlgmr.msra.gmra.mxu1 %vm85_vm1, %v8873_v4  ;;  %7421 = vmatprep.subr.mxu1 %v8098_v1 }
0x38e7   :  { %7422 = vmatpush3.msra.mxu1 %v8871_v23  ;;  %7429 = vmatprep.mubr.msk.f32.mxu1 %vm8099_vm0, %v8098_v1 }
0x38e8   :  { %7423 = vmatprep.subr.mxu1 %v8098_v1 }
0x38e9   :  { %7424 = vmatpush3.msra.mxu1 %v8877_v40 }
0x38ea   :  { %7425 = vmatprep.subr.mxu1 %v8098_v1 }
0x38eb   :  { %7426 = vmatpush3.msra.mxu1 %v8883_v45 }
0x38ec   :  { %7427 = vmatprep.subr.mxu1 %v8098_v1 }
0x38ed   :  { %7428 = vmatpush3.msra.mxu1 %v8887_v5 }
0x38ee   :  { %7443 = vmatprep.subr.mxu1 %v8098_v1 }
0x398d   :  { %v3609_v62 = vpop.f32.mrf.mxu1  ;;  %v9024_v34 = vpop.f32.mrf.mxu0 }
0x398e   :  { %v3613_v11 = vadd.f32 %v3609_v62, %v2835_v33 }
0x398f   :  { %v7343_v18 = vpop.f32.mrf.mxu1  ;;  %v7420_v28 = vpop.f32.mrf.mxu0 }
0x3990   :  { %7891 = vtanh.f32 %v3613_v11  ;;  %v6491_v2 = vmul.f32 -1.442695, %v3613_v11 }
0x3996   :  { %v9033_v30 = vpop.f32.mrf.mxu1 }
0x3997   :  { %v4287_v32 = vpop.f32.mrf.mxu0  ;;  %v3788_v56 = vadd.f32 %v9029_v58, %v9033_v30 }
0x3998   :  { %v4291_v35 = vadd.f32 %v4287_v32, %v3718_v29  ;;  %v7365_v6 = vpop.f32.mrf.mxu1 }
0x3999   :  { %v7442_v61 = vpop.f32.mrf.mxu0 }
0x399a   :  { %7893 = vtanh.f32 %v4291_v35  ;;  %v6502_v20 = vmul.f32 -1.442695, %v4291_v35  ;;  %v3858_v35 = vadd.f32 %v9029_v58, %v8933_v8 }
0x399b   :  { %7895 = vpow2.f32 %v6491_v2 }
0x399c   :  { %7897 = vpow2.f32 %v6502_v20 }
0x399d   :  { %v7892_v16 = vpop.eup %7891 }
0x399e   :  { %v9035_v31 = vpop.f32.mrf.mxu1  ;;  %3623 = vrot.lane.b32.xlu0 %v7892_v16, %s8100_s0 }
0x39a0   :  { %v7387_v9 = vpop.f32.mrf.mxu1 }
0x39a6   :  { %v9038_v21 = vpop.f32.mrf.mxu1 }
0x39a7   :  { %v7894_v37 = vpop.eup %7893 }
0x39a8   :  { %4301 = vrot.lane.b32.xlu1 %v7894_v37, %s8100_s0  ;;  %v7409_v19 = vpop.f32.mrf.mxu1  ;;  %v7896_v24 = vpop.eup %7895 }
0x39a9   :  { %v3617_v42 = vadd.f32 1.0, %v7896_v24  ;;  %v7898_v22 = vpop.eup %7897 }
0x39aa   :  { %v4295_v25 = vadd.f32 1.0, %v7898_v22 }
0x39ab   :  { %7899 = vrcp.f32 %v3617_v42 }
0x39ac   :  { %7901 = vrcp.f32 %v4295_v25 }
0x39b8   :  { %v7900_v43 = vpop.eup %7899 }
0x39b9   :  { %v7902_v26 = vpop.eup %7901  ;;  %v3621_v4 = vmul.f32 %v7900_v43, %v8940_v39 }
0x39ba   :  { %v4299_v5 = vmul.f32 0.0, %v7902_v26 }
0x3a10   :  { %v3624_v38 = vpop.permute.xlu0 %3623 }
0x3a11   :  { %v3626_v3 = vmul.f32 %v7900_v43, %v3624_v38 }
0x3a13   :  { %3628 = vrot.lane.b32.xlu0 %v3626_v3, %s8095_s8 }
0x3a1a   :  { %v4302_v44 = vpop.permute.xlu1 %4301 }
0x3a1b   :  { %v4304_v23 = vmul.f32 %v7902_v26, %v4302_v44  ;;  %v3928_v44 = vadd.f32 %v9029_v58, %v9035_v31 }
0x3a1d   :  { %4306 = vrot.lane.b32.xlu1 %v4304_v23, %s8095_s8 }
0x3a85   :  { %v3629_v40 = vpop.permute.xlu0 %3628 }
0x3a86   :  { %v3631_v45 = vadd.f32 %v3629_v40, %v3621_v4 }
0x3a88   :  { %7903 = vtanh.f32 %v3631_v45 }
0x3a8f   :  { %v4307_v60 = vpop.permute.xlu1 %4306 }
0x3a90   :  { %v4309_v46 = vadd.f32 %v4307_v60, %v4299_v5 }
0x3a92   :  { %7905 = vtanh.f32 %v4309_v46 }
0x3a95   :  { %v7904_v63 = vpop.eup %7903 }
0x3a96   :  { %3634 = vrot.lane.b32.xlu0 %v7904_v63, %s8100_s0 }
0x3a9f   :  { %v7906_v47 = vpop.eup %7905 }
0x3aa0   :  { %4312 = vrot.lane.b32.xlu1 %v7906_v47, %s8100_s0 }
0x3b08   :  { %v3635_v48 = vpop.permute.xlu0 %3634 }
0x3b09   :  { %v3637_v49 = vmul.f32 %v7900_v43, %v3635_v48 }
0x3b0b   :  { %4142 = vrot.lane.b32.xlu0 %v3637_v49, %s8095_s8 }
0x3b12   :  { %v4313_v51 = vpop.permute.xlu1 %4312 }
0x3b13   :  { %v4315_v50 = vmul.f32 %v7902_v26, %v4313_v51 }
0x3b15   :  { %4317 = vrot.lane.b32.xlu1 %v4315_v50, %s8095_s8 }
0x3b7d   :  { %v4143_v53 = vpop.permute.xlu0 %4142 }
0x3b7e   :  { %7430 = vmatmul.mubr.msk.f32.vlgmr.msra.gmra.mxu1 %vm85_vm1, %v4143_v53 }
0x3b7f   :  { %7444 = vmatpush3.msra.mxu1 %v8945_v12  ;;  %7451 = vmatprep.mubr.msk.f32.mxu1 %vm8099_vm0, %v8098_v1 }
0x3b80   :  { %7445 = vmatprep.subr.mxu1 %v8098_v1 }
0x3b81   :  { %7446 = vmatpush3.msra.mxu1 %v8949_v14 }
0x3b82   :  { %7447 = vmatprep.subr.mxu1 %v8098_v1 }
0x3b83   :  { %7448 = vmatpush3.msra.mxu1 %v8955_v15 }
0x3b84   :  { %7449 = vmatprep.subr.mxu1 %v8098_v1 }
0x3b85   :  { %7450 = vmatpush3.msra.mxu1 %v8963_v17 }
0x3b86   :  { %7465 = vmatprep.subr.mxu1 %v8098_v1 }
0x3b87   :  { %v9059_v54 = vpop.permute.xlu1 %4317 }
0x3b88   :  { %7452 = vmatmul.mubr.msk.f32.vlgmr.msra.gmra.mxu1 %vm85_vm1, %v9059_v54 }
0x3b89   :  { %7466 = vmatpush3.msra.mxu1 %v8945_v12  ;;  %7473 = vmatprep.mubr.msk.f32.mxu1 %vm8099_vm0, %v8098_v1 }
0x3b8a   :  { %7467 = vmatprep.subr.mxu1 %v8098_v1 }
0x3b8b   :  { %7468 = vmatpush3.msra.mxu1 %v8949_v14 }
0x3b8c   :  { %7469 = vmatprep.subr.mxu1 %v8098_v1 }
0x3b8d   :  { %7470 = vmatpush3.msra.mxu1 %v8955_v15 }
0x3b8e   :  { %7471 = vmatprep.subr.mxu1 %v8098_v1 }
0x3b8f   :  { %7472 = vmatpush3.msra.mxu1 %v8963_v17 }
0x3b90   :  { %7487 = vmatprep.subr.mxu1 %v8098_v1 }
0x3c3e   :  { %v9073_v55 = vpop.f32.mrf.mxu1 }
0x3c40   :  { %v7431_v41 = vpop.f32.mrf.mxu1 }
0x3c48   :  { %v4387_v36 = vpop.f32.mrf.mxu1 }
0x3c49   :  { %v4391_v57 = vadd.f32 %v4387_v36, %v3788_v56  ;;  %v3998_v36 = vadd.f32 %v9029_v58, %v8936_v52 }
0x3c4a   :  { %v7453_v59 = vpop.f32.mrf.mxu1 }
0x3c4b   :  { %7907 = vtanh.f32 %v4391_v57  ;;  %v6504_v39 = vmul.f32 -1.442695, %v4391_v57 }
0x3c4d   :  { %7909 = vpow2.f32 %v6504_v39 }
0x3c58   :  { %v7908_v27 = vpop.eup %7907 }
0x3c59   :  { %4401 = vrot.lane.b32.xlu0 %v7908_v27, %s8100_s0 }
0x3c5a   :  { %v7910_v0 = vpop.eup %7909 }
0x3c5b   :  { %v4395_v7 = vadd.f32 1.0, %v7910_v0 }
0x3c5d   :  { %7911 = vrcp.f32 %v4395_v7 }
0x3c6a   :  { %v7912_v10 = vpop.eup %7911 }
0x3c6b   :  { %v4399_v62 = vmul.f32 %v7912_v10, %v4309_v46 }
0x3ccb   :  { %v4402_v13 = vpop.permute.xlu0 %4401 }
0x3ccc   :  { %v4404_v33 = vmul.f32 %v7912_v10, %v4402_v13 }
0x3cce   :  { %4406 = vrot.lane.b32.xlu1 %v4404_v33, %s8095_s8 }
0x3d40   :  { %v4407_v11 = vpop.permute.xlu1 %4406 }
0x3d41   :  { %v4409_v18 = vadd.f32 %v4407_v11, %v4399_v62 }
0x3d43   :  { %7913 = vtanh.f32 %v4409_v18 }
0x3d50   :  { %v7914_v28 = vpop.eup %7913 }
0x3d51   :  { %4412 = vrot.lane.b32.xlu0 %v7914_v28, %s8100_s0 }
0x3dc3   :  { %v4413_v29 = vpop.permute.xlu0 %4412 }
0x3dc4   :  { %v4415_v30 = vmul.f32 %v7912_v10, %v4413_v29 }
0x3dc6   :  { %4417 = vrot.lane.b32.xlu1 %v4415_v30, %s8095_s8 }
0x3e38   :  { %v9081_v32 = vpop.permute.xlu1 %4417 }
0x3e39   :  { %7463 = vmatmul.mubr.msk.f32.vlgmr.msra.gmra.mxu0 %vm85_vm1, %v9081_v32 }
0x3e3a   :  { %7477 = vmatpush3.msra.mxu0 %v8945_v12  ;;  %7484 = vmatprep.mubr.msk.f32.mxu0 %vm8099_vm0, %v8098_v1 }
0x3e3b   :  { %7478 = vmatprep.subr.mxu0 %v8098_v1 }
0x3e3c   :  { %7479 = vmatpush3.msra.mxu0 %v8949_v14 }
0x3e3d   :  { %7480 = vmatprep.subr.mxu0 %v8098_v1 }
0x3e3e   :  { %7481 = vmatpush3.msra.mxu0 %v8955_v15 }
0x3e3f   :  { %7482 = vmatprep.subr.mxu0 %v8098_v1 }
0x3e40   :  { %7483 = vmatpush3.msra.mxu0 %v8963_v17 }
0x3e41   :  { %7498 = vmatprep.subr.mxu0 %v8098_v1 }
0x3ef9   :  { %v4487_v6 = vpop.f32.mrf.mxu0 }
0x3efa   :  { %v4491_v61 = vadd.f32 %v4487_v6, %v3858_v35 }
0x3efb   :  { %v7464_v16 = vpop.f32.mrf.mxu0 }
0x3efc   :  { %7915 = vtanh.f32 %v4491_v61  ;;  %v6506_v37 = vmul.f32 -1.442695, %v4491_v61 }
0x3efe   :  { %7917 = vpow2.f32 %v6506_v37 }
0x3f09   :  { %v7916_v9 = vpop.eup %7915 }
0x3f0a   :  { %4501 = vrot.lane.b32.xlu0 %v7916_v9, %s8100_s0 }
0x3f0b   :  { %v7918_v19 = vpop.eup %7917 }
0x3f0c   :  { %v4495_v2 = vadd.f32 1.0, %v7918_v19 }
0x3f0e   :  { %7919 = vrcp.f32 %v4495_v2 }
0x3f1b   :  { %v7920_v20 = vpop.eup %7919 }
0x3f1c   :  { %v4499_v22 = vmul.f32 %v7920_v20, %v4409_v18 }
0x3f7c   :  { %v4502_v24 = vpop.permute.xlu0 %4501 }
0x3f7d   :  { %v4504_v42 = vmul.f32 %v7920_v20, %v4502_v24 }
0x3f7f   :  { %4506 = vrot.lane.b32.xlu1 %v4504_v42, %s8095_s8 }
0x3ff1   :  { %v4507_v25 = vpop.permute.xlu1 %4506 }
0x3ff2   :  { %v4509_v8 = vadd.f32 %v4507_v25, %v4499_v22 }
0x3ff4   :  { %7921 = vtanh.f32 %v4509_v8 }
0x4001   :  { %v7922_v43 = vpop.eup %7921 }
0x4002   :  { %4512 = vrot.lane.b32.xlu0 %v7922_v43, %s8100_s0 }
0x4074   :  { %v4513_v38 = vpop.permute.xlu0 %4512 }
0x4075   :  { %v4515_v3 = vmul.f32 %v7920_v20, %v4513_v38  ;;  %v9170_v38 = vld [vmem:[#allocation5 + $0x70] sm:$0xff] }
0x4077   :  { %4517 = vrot.lane.b32.xlu1 %v4515_v3, %s8095_s8  ;;  %v9176_v3 = vld [vmem:[#allocation5 + $0x68] sm:$0xff] }
0x40e9   :  { %v9101_v26 = vpop.permute.xlu1 %4517 }
0x40ea   :  { %7474 = vmatmul.mubr.msk.f32.vlgmr.msra.gmra.mxu1 %vm85_vm1, %v9101_v26 }
0x40eb   :  { %7488 = vmatpush3.msra.mxu1 %v8945_v12  ;;  %7495 = vmatprep.mubr.msk.f32.mxu1 %vm8099_vm0, %v8098_v1 }
0x40ec   :  { %7489 = vmatprep.subr.mxu1 %v8098_v1 }
0x40ed   :  { %7490 = vmatpush3.msra.mxu1 %v8949_v14 }
0x40ee   :  { %7491 = vmatprep.subr.mxu1 %v8098_v1 }
0x40ef   :  { %7492 = vmatpush3.msra.mxu1 %v8955_v15 }
0x40f0   :  { %7493 = vmatprep.subr.mxu1 %v8098_v1 }
0x40f1   :  { %7494 = vmatpush3.msra.mxu1 %v8963_v17 }
0x40f2   :  { %7509 = vmatprep.subr.mxu1 %v8098_v1 }
0x41aa   :  { %v4587_v23 = vpop.f32.mrf.mxu1 }
0x41ab   :  { %v4591_v4 = vadd.f32 %v4587_v23, %v3928_v44  ;;  %v9180_v44 = vld [vmem:[#allocation5 + $0x60] sm:$0xff] }
0x41ac   :  { %v7475_v40 = vpop.f32.mrf.mxu1 }
0x41ad   :  { %7923 = vtanh.f32 %v4591_v4  ;;  %v6508_v5 = vmul.f32 -1.442695, %v4591_v4 }
0x41af   :  { %7925 = vpow2.f32 %v6508_v5 }
0x41ba   :  { %v7924_v45 = vpop.eup %7923 }
0x41bb   :  { %4601 = vrot.lane.b32.xlu0 %v7924_v45, %s8100_s0 }
0x41bc   :  { %v7926_v60 = vpop.eup %7925 }
0x41bd   :  { %v4595_v46 = vadd.f32 1.0, %v7926_v60 }
0x41bf   :  { %7927 = vrcp.f32 %v4595_v46 }
0x41cc   :  { %v7928_v63 = vpop.eup %7927 }
0x41cd   :  { %v4599_v49 = vmul.f32 %v7928_v63, %v4509_v8  ;;  %v9164_v8 = vld [vmem:[#allocation5 + $0x78] sm:$0xff] }
0x422d   :  { %v4602_v47 = vpop.permute.xlu0 %4601 }
0x422e   :  { %v4604_v48 = vmul.f32 %v7928_v63, %v4602_v47 }
0x4230   :  { %4606 = vrot.lane.b32.xlu1 %v4604_v48, %s8095_s8 }
0x42a2   :  { %v4607_v51 = vpop.permute.xlu1 %4606 }
0x42a3   :  { %v4609_v31 = vadd.f32 %v4607_v51, %v4599_v49 }
0x42a5   :  { %7929 = vtanh.f32 %v4609_v31 }
0x42b2   :  { %v7930_v50 = vpop.eup %7929 }
0x42b3   :  { %4612 = vrot.lane.b32.xlu0 %v7930_v50, %s8100_s0 }
0x4325   :  { %v4613_v53 = vpop.permute.xlu0 %4612 }
0x4326   :  { %v4615_v41 = vmul.f32 %v7928_v63, %v4613_v53 }
0x4328   :  { %4617 = vrot.lane.b32.xlu1 %v4615_v41, %s8095_s8 }
0x439a   :  { %v9121_v56 = vpop.permute.xlu1 %4617 }
0x439b   :  { %7485 = vmatmul.mubr.msk.f32.vlgmr.msra.gmra.mxu0 %vm85_vm1, %v9121_v56 }
0x439c   :  { %7499 = vmatpush3.msra.mxu0 %v8945_v12  ;;  %7506 = vmatprep.mubr.msk.f32.mxu0 %vm8099_vm0, %v8098_v1 }
0x439d   :  { %7500 = vmatprep.subr.mxu0 %v8098_v1 }
0x439e   :  { %7501 = vmatpush3.msra.mxu0 %v8949_v14 }
0x439f   :  { %7502 = vmatprep.subr.mxu0 %v8098_v1 }
0x43a0   :  { %7503 = vmatpush3.msra.mxu0 %v8955_v15 }
0x43a1   :  { %7504 = vmatprep.subr.mxu0 %v8098_v1 }
0x43a2   :  { %7505 = vmatpush3.msra.mxu0 %v8963_v17 }
0x43a3   :  { %7520 = vmatprep.subr.mxu0 %v8098_v1 }
0x445b   :  { %v4687_v57 = vpop.f32.mrf.mxu0 }
0x445c   :  { %v4691_v59 = vadd.f32 %v4687_v57, %v3998_v36 }
0x445d   :  { %v7486_v27 = vpop.f32.mrf.mxu0 }
0x445e   :  { %7931 = vtanh.f32 %v4691_v59  ;;  %v6510_v0 = vmul.f32 -1.442695, %v4691_v59 }
0x4460   :  { %7933 = vpow2.f32 %v6510_v0 }
0x446b   :  { %v7932_v39 = vpop.eup %7931 }
0x446c   :  { %4701 = vrot.lane.b32.xlu0 %v7932_v39, %s8100_s0  ;;  %v9238_v39 = vld [vmem:[#allocation7 + $0x98] sm:$0xff] }
0x446d   :  { %v7934_v7 = vpop.eup %7933 }
0x446e   :  { %v4695_v10 = vadd.f32 1.0, %v7934_v7  ;;  %v9242_v7 = vld [vmem:[#allocation7 + $0x90] sm:$0xff] }
0x4470   :  { %7935 = vrcp.f32 %v4695_v10  ;;  %v9248_v10 = vld [vmem:[#allocation7 + $0x88] sm:$0xff] }
0x447d   :  { %v7936_v13 = vpop.eup %7935 }
0x447e   :  { %v4699_v11 = vmul.f32 %v7936_v13, %v4609_v31 }
0x44de   :  { %v4702_v33 = vpop.permute.xlu0 %4701 }
0x44df   :  { %v4704_v62 = vmul.f32 %v7936_v13, %v4702_v33 }
0x44e1   :  { %4706 = vrot.lane.b32.xlu1 %v4704_v62, %s8095_s8 }
0x4553   :  { %v4707_v18 = vpop.permute.xlu1 %4706 }
0x4554   :  { %v4709_v52 = vadd.f32 %v4707_v18, %v4699_v11 }
0x4556   :  { %7937 = vtanh.f32 %v4709_v52 }
0x4563   :  { %v7938_v28 = vpop.eup %7937 }
0x4564   :  { %4712 = vrot.lane.b32.xlu0 %v7938_v28, %s8100_s0 }
0x45d6   :  { %v4713_v29 = vpop.permute.xlu0 %4712 }
0x45d7   :  { %v4715_v30 = vmul.f32 %v7936_v13, %v4713_v29  ;;  %v9256_v13 = vld [vmem:[#allocation7 + $0x80] sm:$0xff] }
0x45d9   :  { %4717 = vrot.lane.b32.xlu1 %v4715_v30, %s8095_s8 }
0x464b   :  { %v9141_v35 = vpop.permute.xlu1 %4717 }
0x464c   :  { %7496 = vmatmul.mubr.msk.f32.vlgmr.msra.gmra.mxu1 %vm85_vm1, %v9141_v35 }
0x464d   :  { %7510 = vmatpush3.msra.mxu1 %v8945_v12  ;;  %7517 = vmatprep.mubr.msk.f32.mxu1 %vm8099_vm0, %v8098_v1  ;;  %v4068_v12 = vadd.f32 %v9029_v58, %v9038_v21 }
0x464e   :  { %7511 = vmatprep.subr.mxu1 %v8098_v1 }
0x464f   :  { %7512 = vmatpush3.msra.mxu1 %v8949_v14 }
0x4650   :  { %7513 = vmatprep.subr.mxu1 %v8098_v1 }
0x4651   :  { %7514 = vmatpush3.msra.mxu1 %v8955_v15 }
0x4652   :  { %7515 = vmatprep.subr.mxu1 %v8098_v1 }
0x4653   :  { %7516 = vmatpush3.msra.mxu1 %v8963_v17 }
0x4654   :  { %7531 = vmatprep.subr.mxu1 %v8098_v1 }
0x470c   :  { %v4787_v6 = vpop.f32.mrf.mxu1 }
0x470d   :  { %v4791_v61 = vadd.f32 %v4787_v6, %v4068_v12 }
0x470e   :  { %v7497_v16 = vpop.f32.mrf.mxu1 }
0x470f   :  { %7939 = vtanh.f32 %v4791_v61  ;;  %v6512_v14 = vmul.f32 -1.442695, %v4791_v61 }
0x4711   :  { %7941 = vpow2.f32 %v6512_v14 }
0x471c   :  { %v7940_v9 = vpop.eup %7939 }
0x471d   :  { %4801 = vrot.lane.b32.xlu0 %v7940_v9, %s8100_s0 }
0x471e   :  { %v7942_v37 = vpop.eup %7941 }
0x471f   :  { %v4795_v15 = vadd.f32 1.0, %v7942_v37 }
0x4721   :  { %7943 = vrcp.f32 %v4795_v15 }
0x472e   :  { %v7944_v19 = vpop.eup %7943 }
0x472f   :  { %v4799_v20 = vmul.f32 %v7944_v19, %v4709_v52  ;;  %v9322_v52 = vld [vmem:[%s9460_s3 + $0x3] ss:$0 sm:$0xff] }
0x478f   :  { %v4802_v2 = vpop.permute.xlu0 %4801 }
0x4790   :  { %v4804_v17 = vmul.f32 %v7944_v19, %v4802_v2 }
0x4792   :  { %4806 = vrot.lane.b32.xlu1 %v4804_v17, %s8095_s8 }
0x4804   :  { %v4807_v24 = vpop.permute.xlu1 %4806 }
0x4805   :  { %v9159_v21 = vadd.f32 %v4807_v24, %v4799_v20 }
0x4807   :  { %7945 = vtanh.f32 %v9159_v21 }
0x4814   :  { %v7946_v42 = vpop.eup %7945 }
0x4815   :  { %4812 = vrot.lane.b32.xlu0 %v7946_v42, %s8100_s0 }
0x4887   :  { %v4813_v22 = vpop.permute.xlu0 %4812 }
0x4888   :  { %v4815_v25 = vmul.f32 %v7944_v19, %v4813_v22 }
0x488a   :  { %4817 = vrot.lane.b32.xlu1 %v4815_v25, %s8095_s8 }
0x48fc   :  { %v9166_v43 = vpop.permute.xlu1 %4817 }
0x48fd   :  { %7507 = vmatmul.mubr.msk.f32.vlgmr.msra.gmra.mxu0 %vm85_vm1, %v9166_v43 }
0x48fe   :  { %7521 = vmatpush3.msra.mxu0 %v9164_v8  ;;  %7528 = vmatprep.mubr.msk.f32.mxu0 %vm8099_vm0, %v8098_v1 }
0x48ff   :  { %7522 = vmatprep.subr.mxu0 %v8098_v1 }
0x4900   :  { %7523 = vmatpush3.msra.mxu0 %v9170_v38 }
0x4901   :  { %7524 = vmatprep.subr.mxu0 %v8098_v1 }
0x4902   :  { %7525 = vmatpush3.msra.mxu0 %v9176_v3 }
0x4903   :  { %7526 = vmatprep.subr.mxu0 %v8098_v1 }
0x4904   :  { %7527 = vmatpush3.msra.mxu0 %v9180_v44 }
0x4905   :  { %7529 = vmatmul.mubr.msk.f32.vlgmr.msra.gmra.mxu0 %vm85_vm1, %v9059_v54  ;;  %7542 = vmatprep.subr.mxu0 %v8098_v1  ;;  %v4138_v54 = vadd.f32 %v9029_v58, %v9024_v34 }
0x4906   :  { %7543 = vmatpush3.msra.mxu0 %v9164_v8  ;;  %7550 = vmatprep.mubr.msk.f32.mxu0 %vm8099_vm0, %v8098_v1 }
0x4907   :  { %7544 = vmatprep.subr.mxu0 %v8098_v1 }
0x4908   :  { %7545 = vmatpush3.msra.mxu0 %v9170_v38 }
0x4909   :  { %7546 = vmatprep.subr.mxu0 %v8098_v1 }
0x490a   :  { %7547 = vmatpush3.msra.mxu0 %v9176_v3 }
0x490b   :  { %7548 = vmatprep.subr.mxu0 %v8098_v1 }
0x490c   :  { %7549 = vmatpush3.msra.mxu0 %v9180_v44 }
0x490d   :  { %7551 = vmatmul.mubr.msk.f32.vlgmr.msra.gmra.mxu0 %vm85_vm1, %v9101_v26  ;;  %7564 = vmatprep.subr.mxu0 %v8098_v1 }
0x490e   :  { %7565 = vmatpush3.msra.mxu0 %v9164_v8  ;;  %7572 = vmatprep.mubr.msk.f32.mxu0 %vm8099_vm0, %v8098_v1 }
0x490f   :  { %7566 = vmatprep.subr.mxu0 %v8098_v1 }
0x4910   :  { %7567 = vmatpush3.msra.mxu0 %v9170_v38 }
0x4911   :  { %7568 = vmatprep.subr.mxu0 %v8098_v1 }
0x4912   :  { %7569 = vmatpush3.msra.mxu0 %v9176_v3 }
0x4913   :  { %7570 = vmatprep.subr.mxu0 %v8098_v1 }
0x4914   :  { %7571 = vmatpush3.msra.mxu0 %v9180_v44 }
0x4915   :  { %7573 = vmatmul.mubr.msk.f32.vlgmr.msra.gmra.mxu0 %vm85_vm1, %v9141_v35  ;;  %7586 = vmatprep.subr.mxu0 %v8098_v1 }
0x4916   :  { %7587 = vmatpush3.msra.mxu0 %v9164_v8  ;;  %7594 = vmatprep.mubr.msk.f32.mxu0 %vm8099_vm0, %v8098_v1 }
0x4917   :  { %7588 = vmatprep.subr.mxu0 %v8098_v1 }
0x4918   :  { %7589 = vmatpush3.msra.mxu0 %v9170_v38 }
0x4919   :  { %7590 = vmatprep.subr.mxu0 %v8098_v1 }
0x491a   :  { %7591 = vmatpush3.msra.mxu0 %v9176_v3 }
0x491b   :  { %7592 = vmatprep.subr.mxu0 %v8098_v1 }
0x491c   :  { %7593 = vmatpush3.msra.mxu0 %v9180_v44 }
0x491d   :  { %7608 = vmatprep.subr.mxu0 %v8098_v1 }
0x49bd   :  { %v4887_v26 = vpop.f32.mrf.mxu0 }
0x49be   :  { %v4891_v23 = vadd.f32 %v4887_v26, %v4138_v54 }
0x49bf   :  { %v7508_v4 = vpop.f32.mrf.mxu0 }
0x49c0   :  { %7947 = vtanh.f32 %v4891_v23  ;;  %v6514_v48 = vmul.f32 -1.442695, %v4891_v23 }
0x49c2   :  { %7949 = vpow2.f32 %v6514_v48 }
0x49c5   :  { %v9224_v40 = vpop.f32.mrf.mxu0 }
0x49c6   :  { %v5096_v28 = vadd.f32 %v9322_v52, %v9224_v40 }
0x49c7   :  { %v7530_v45 = vpop.f32.mrf.mxu0 }
0x49cd   :  { %v7948_v5 = vpop.eup %7947  ;;  %v9226_v60 = vpop.f32.mrf.mxu0 }
0x49ce   :  { %4901 = vrot.lane.b32.xlu0 %v7948_v5, %s8100_s0 }
0x49cf   :  { %v7552_v46 = vpop.f32.mrf.mxu0  ;;  %v7950_v49 = vpop.eup %7949 }
0x49d0   :  { %v4895_v34 = vadd.f32 1.0, %v7950_v49 }
0x49d2   :  { %7951 = vrcp.f32 %v4895_v34 }
0x49d5   :  { %v9229_v63 = vpop.f32.mrf.mxu0 }
0x49d7   :  { %v7574_v47 = vpop.f32.mrf.mxu0 }
0x49df   :  { %v7952_v51 = vpop.eup %7951 }
0x49e0   :  { %v4899_v53 = vmul.f32 %v7952_v51, %v9159_v21 }
0x4a40   :  { %v4902_v31 = vpop.permute.xlu0 %4901 }
0x4a41   :  { %v4904_v50 = vmul.f32 %v7952_v51, %v4902_v31 }
0x4a43   :  { %4906 = vrot.lane.b32.xlu1 %v4904_v50, %s8095_s8 }
0x4ab5   :  { %v4907_v41 = vpop.permute.xlu1 %4906 }
0x4ab6   :  { %v9233_v36 = vadd.f32 %v4907_v41, %v4899_v53 }
0x4ab8   :  { %7953 = vtanh.f32 %v9233_v36 }
0x4ac5   :  { %v7954_v57 = vpop.eup %7953 }
0x4ac6   :  { %4912 = vrot.lane.b32.xlu0 %v7954_v57, %s8100_s0 }
0x4b38   :  { %v4913_v59 = vpop.permute.xlu0 %4912 }
0x4b39   :  { %v4915_v27 = vmul.f32 %v7952_v51, %v4913_v59 }
0x4b3b   :  { %4917 = vrot.lane.b32.xlu1 %v4915_v27, %s8095_s8 }
0x4bad   :  { %v4918_v0 = vpop.permute.xlu1 %4917 }
0x4bae   :  { %7518 = vmatmul.mubr.msk.f32.vlgmr.msra.gmra.mxu1 %vm85_vm1, %v4918_v0  ;;  %7595 = vmatmul.mubr.msk.f32.vlgmr.msra.gmra.mxu0 %vm85_vm1, %v4918_v0 }
0x4baf   :  { %7532 = vmatpush3.msra.mxu1 %v9164_v8  ;;  %7609 = vmatpush3.msra.mxu0 %v9238_v39 }
0x4bb0   :  { %7533 = vmatprep.subr.mxu1 %v8098_v1  ;;  %7610 = vmatprep.subr.mxu0 %v8098_v1 }
0x4bb1   :  { %7534 = vmatpush3.msra.mxu1 %v9170_v38  ;;  %7611 = vmatpush3.msra.mxu0 %v9242_v7 }
0x4bb2   :  { %7535 = vmatprep.subr.mxu1 %v8098_v1  ;;  %7612 = vmatprep.subr.mxu0 %v8098_v1 }
0x4bb3   :  { %7536 = vmatpush3.msra.mxu1 %v9176_v3  ;;  %7613 = vmatpush3.msra.mxu0 %v9248_v10 }
0x4bb4   :  { %7537 = vmatprep.subr.mxu1 %v8098_v1  ;;  %7614 = vmatprep.subr.mxu0 %v8098_v1 }
0x4bb5   :  { %7538 = vmatpush3.msra.mxu1 %v9180_v44  ;;  %7539 = vmatprep.mubr.msk.f32.mxu1 %vm8099_vm0, %v8098_v1 }
0x4bb6   :  { %7615 = vmatpush3.msra.mxu0 %v9256_v13  ;;  %7616 = vmatprep.mubr.msk.f32.mxu0 %vm8099_vm0, %v8098_v1 }
0x4bb7   :  { %7540 = vmatmul.mubr.msk.f32.vlgmr.msra.gmra.mxu1 %vm85_vm1, %v9081_v32  ;;  %7553 = vmatprep.subr.mxu1 %v8098_v1  ;;  %v4213_v32 = vadd.f32 %v9029_v58, %v9073_v55 }
0x4bb8   :  { %7617 = vmatmul.mubr.f32.vlgmr.msra.gmra.mxu0 %v8098_v1  ;;  %7554 = vmatpush3.msra.mxu1 %v9164_v8 }
0x4bb9   :  { %7555 = vmatprep.subr.mxu1 %v8098_v1  ;;  %7561 = vmatprep.mubr.msk.f32.mxu1 %vm8099_vm0, %v8098_v1 }
0x4bba   :  { %7556 = vmatpush3.msra.mxu1 %v9170_v38  ;;  %7630 = vmatprep.subr.mxu0 %v8098_v1 }
0x4bbb   :  { %7557 = vmatprep.subr.mxu1 %v8098_v1  ;;  %7631 = vmatpush3.msra.mxu0 %v9238_v39 }
0x4bbc   :  { %7558 = vmatpush3.msra.mxu1 %v9176_v3  ;;  %7632 = vmatprep.subr.mxu0 %v8098_v1 }
0x4bbd   :  { %7559 = vmatprep.subr.mxu1 %v8098_v1  ;;  %7633 = vmatpush3.msra.mxu0 %v9242_v7 }
0x4bbe   :  { %7560 = vmatpush3.msra.mxu1 %v9180_v44  ;;  %7634 = vmatprep.subr.mxu0 %v8098_v1 }
0x4bbf   :  { %7562 = vmatmul.mubr.msk.f32.vlgmr.msra.gmra.mxu1 %vm85_vm1, %v9121_v56  ;;  %7575 = vmatprep.subr.mxu1 %v8098_v1 }
0x4bc0   :  { %7576 = vmatpush3.msra.mxu1 %v9164_v8  ;;  %7583 = vmatprep.mubr.msk.f32.mxu1 %vm8099_vm0, %v8098_v1 }
0x4bc1   :  { %7577 = vmatprep.subr.mxu1 %v8098_v1  ;;  %7635 = vmatpush3.msra.mxu0 %v9248_v10 }
0x4bc2   :  { %7578 = vmatpush3.msra.mxu1 %v9170_v38  ;;  %7636 = vmatprep.subr.mxu0 %v8098_v1 }
0x4bc3   :  { %7579 = vmatprep.subr.mxu1 %v8098_v1  ;;  %7637 = vmatpush3.msra.mxu0 %v9256_v13 }
0x4bc4   :  { %7580 = vmatpush3.msra.mxu1 %v9176_v3  ;;  %7638 = vmatprep.mubr.msk.f32.mxu0 %vm8099_vm0, %v8098_v1 }
0x4bc5   :  { %7581 = vmatprep.subr.mxu1 %v8098_v1  ;;  %7652 = vmatprep.subr.mxu0 %v8098_v1 }
0x4bc6   :  { %7582 = vmatpush3.msra.mxu1 %v9180_v44 }
0x4bc7   :  { %7584 = vmatmul.mubr.msk.f32.vlgmr.msra.gmra.mxu1 %vm85_vm1, %v9166_v43  ;;  %7597 = vmatprep.subr.mxu1 %v8098_v1 }
0x4bc8   :  { %7598 = vmatpush3.msra.mxu1 %v9164_v8  ;;  %7605 = vmatprep.mubr.msk.f32.mxu1 %vm8099_vm0, %v8098_v1 }
0x4bc9   :  { %7599 = vmatprep.subr.mxu1 %v8098_v1 }
0x4bca   :  { %7600 = vmatpush3.msra.mxu1 %v9170_v38 }
0x4bcb   :  { %7601 = vmatprep.subr.mxu1 %v8098_v1 }
0x4bcc   :  { %7602 = vmatpush3.msra.mxu1 %v9176_v3 }
0x4bcd   :  { %7603 = vmatprep.subr.mxu1 %v8098_v1 }
0x4bce   :  { %7604 = vmatpush3.msra.mxu1 %v9180_v44 }
0x4bcf   :  { %7619 = vmatprep.subr.mxu1 %v8098_v1 }
0x4c6e   :  { %v4987_v56 = vpop.f32.mrf.mxu1  ;;  %v9317_v33 = vpop.f32.mrf.mxu0 }
0x4c6f   :  { %v4991_v62 = vadd.f32 %v4987_v56, %v4213_v32 }
0x4c70   :  { %v7519_v11 = vpop.f32.mrf.mxu1  ;;  %v7596_v18 = vpop.f32.mrf.mxu0 }
0x4c71   :  { %7955 = vtanh.f32 %v4991_v62  ;;  %v6516_v37 = vmul.f32 -1.442695, %v4991_v62 }
0x4c77   :  { %v9326_v29 = vpop.f32.mrf.mxu1 }
0x4c78   :  { %v5665_v30 = vpop.f32.mrf.mxu0  ;;  %v5166_v51 = vadd.f32 %v9322_v52, %v9326_v29 }
0x4c79   :  { %v5669_v35 = vadd.f32 %v5665_v30, %v5096_v28  ;;  %v7541_v58 = vpop.f32.mrf.mxu1 }
0x4c7a   :  { %v7618_v55 = vpop.f32.mrf.mxu0 }
0x4c7b   :  { %7957 = vtanh.f32 %v5669_v35  ;;  %v6527_v15 = vmul.f32 -1.442695, %v5669_v35  ;;  %v5236_v35 = vadd.f32 %v9322_v52, %v9226_v60 }
0x4c7c   :  { %7959 = vpow2.f32 %v6516_v37 }
0x4c7d   :  { %7961 = vpow2.f32 %v6527_v15 }
0x4c7e   :  { %v7956_v12 = vpop.eup %7955 }
0x4c7f   :  { %v9328_v6 = vpop.f32.mrf.mxu1  ;;  %5001 = vrot.lane.b32.xlu0 %v7956_v12, %s8100_s0 }
0x4c81   :  { %v7563_v61 = vpop.f32.mrf.mxu1 }
0x4c87   :  { %v9331_v16 = vpop.f32.mrf.mxu1 }
0x4c88   :  { %v7958_v9 = vpop.eup %7957 }
0x4c89   :  { %5679 = vrot.lane.b32.xlu1 %v7958_v9, %s8100_s0  ;;  %v7585_v14 = vpop.f32.mrf.mxu1  ;;  %v7960_v19 = vpop.eup %7959 }
0x4c8a   :  { %v4995_v2 = vadd.f32 1.0, %v7960_v19  ;;  %v7962_v17 = vpop.eup %7961 }
0x4c8b   :  { %v5673_v20 = vadd.f32 1.0, %v7962_v17 }
0x4c8c   :  { %7963 = vrcp.f32 %v4995_v2 }
0x4c8d   :  { %7965 = vrcp.f32 %v5673_v20 }
0x4c99   :  { %v7964_v24 = vpop.eup %7963 }
0x4c9a   :  { %v7966_v22 = vpop.eup %7965  ;;  %v4999_v43 = vmul.f32 %v7964_v24, %v9233_v36 }
0x4c9b   :  { %v5677_v44 = vmul.f32 0.0, %v7966_v22 }
0x4cf1   :  { %v5002_v21 = vpop.permute.xlu0 %5001 }
0x4cf2   :  { %v5004_v42 = vmul.f32 %v7964_v24, %v5002_v21 }
0x4cf4   :  { %5006 = vrot.lane.b32.xlu0 %v5004_v42, %s8095_s8 }
0x4cfb   :  { %v5680_v25 = vpop.permute.xlu1 %5679 }
0x4cfc   :  { %v5682_v8 = vmul.f32 %v7966_v22, %v5680_v25  ;;  %v5306_v25 = vadd.f32 %v9322_v52, %v9328_v6 }
0x4cfe   :  { %5684 = vrot.lane.b32.xlu1 %v5682_v8, %s8095_s8 }
0x4d66   :  { %v5007_v38 = vpop.permute.xlu0 %5006 }
0x4d67   :  { %v5009_v3 = vadd.f32 %v5007_v38, %v4999_v43 }
0x4d69   :  { %7967 = vtanh.f32 %v5009_v3 }
0x4d70   :  { %v5685_v54 = vpop.permute.xlu1 %5684 }
0x4d71   :  { %v5687_v26 = vadd.f32 %v5685_v54, %v5677_v44 }
0x4d73   :  { %7969 = vtanh.f32 %v5687_v26 }
0x4d76   :  { %v7968_v23 = vpop.eup %7967 }
0x4d77   :  { %5012 = vrot.lane.b32.xlu0 %v7968_v23, %s8100_s0 }
0x4d80   :  { %v7970_v4 = vpop.eup %7969 }
0x4d81   :  { %5690 = vrot.lane.b32.xlu1 %v7970_v4, %s8100_s0 }
0x4de9   :  { %v5013_v40 = vpop.permute.xlu0 %5012 }
0x4dea   :  { %v5015_v45 = vmul.f32 %v7964_v24, %v5013_v40 }
0x4dec   :  { %5520 = vrot.lane.b32.xlu0 %v5015_v45, %s8095_s8 }
0x4df3   :  { %v5691_v5 = vpop.permute.xlu1 %5690 }
0x4df4   :  { %v5693_v46 = vmul.f32 %v7966_v22, %v5691_v5 }
0x4df6   :  { %5695 = vrot.lane.b32.xlu1 %v5693_v46, %s8095_s8 }
0x4e5e   :  { %v5521_v47 = vpop.permute.xlu0 %5520 }
0x4e5f   :  { %7606 = vmatmul.mubr.msk.f32.vlgmr.msra.gmra.mxu1 %vm85_vm1, %v5521_v47 }
0x4e60   :  { %7620 = vmatpush3.msra.mxu1 %v9238_v39  ;;  %7627 = vmatprep.mubr.msk.f32.mxu1 %vm8099_vm0, %v8098_v1 }
0x4e61   :  { %7621 = vmatprep.subr.mxu1 %v8098_v1 }
0x4e62   :  { %7622 = vmatpush3.msra.mxu1 %v9242_v7 }
0x4e63   :  { %7623 = vmatprep.subr.mxu1 %v8098_v1 }
0x4e64   :  { %7624 = vmatpush3.msra.mxu1 %v9248_v10 }
0x4e65   :  { %7625 = vmatprep.subr.mxu1 %v8098_v1 }
0x4e66   :  { %7626 = vmatpush3.msra.mxu1 %v9256_v13 }
0x4e67   :  { %7641 = vmatprep.subr.mxu1 %v8098_v1 }
0x4e68   :  { %v5696_v48 = vpop.permute.xlu1 %5695 }
0x4e69   :  { %7628 = vmatmul.mubr.msk.f32.vlgmr.msra.gmra.mxu1 %vm85_vm1, %v5696_v48 }
0x4e6a   :  { %7642 = vmatpush3.msra.mxu1 %v9238_v39  ;;  %7649 = vmatprep.mubr.msk.f32.mxu1 %vm8099_vm0, %v8098_v1 }
0x4e6b   :  { %7643 = vmatprep.subr.mxu1 %v8098_v1 }
0x4e6c   :  { %7644 = vmatpush3.msra.mxu1 %v9242_v7 }
0x4e6d   :  { %7645 = vmatprep.subr.mxu1 %v8098_v1 }
0x4e6e   :  { %7646 = vmatpush3.msra.mxu1 %v9248_v10 }
0x4e6f   :  { %7647 = vmatprep.subr.mxu1 %v8098_v1 }
0x4e70   :  { %7648 = vmatpush3.msra.mxu1 %v9256_v13 }
0x4e71   :  { %7663 = vmatprep.subr.mxu1 %v8098_v1 }
0x4f1f   :  { %v9363_v49 = vpop.f32.mrf.mxu1 }
0x4f21   :  { %v7607_v34 = vpop.f32.mrf.mxu1 }
0x4f29   :  { %v5765_v31 = vpop.f32.mrf.mxu1 }
0x4f2a   :  { %v5769_v50 = vadd.f32 %v5765_v31, %v5166_v51  ;;  %v5376_v51 = vadd.f32 %v9322_v52, %v9229_v63 }
0x4f2b   :  { %v7629_v53 = vpop.f32.mrf.mxu1 }
0x4f2c   :  { %7971 = vtanh.f32 %v5769_v50  ;;  %v6529_v36 = vmul.f32 -1.442695, %v5769_v50 }
0x4f2e   :  { %7973 = vpow2.f32 %v6529_v36 }
0x4f39   :  { %v7972_v41 = vpop.eup %7971 }
0x4f3a   :  { %5779 = vrot.lane.b32.xlu0 %v7972_v41, %s8100_s0 }
0x4f3b   :  { %v7974_v57 = vpop.eup %7973 }
0x4f3c   :  { %v5773_v59 = vadd.f32 1.0, %v7974_v57 }
0x4f3e   :  { %7975 = vrcp.f32 %v5773_v59 }
0x4f4b   :  { %v7976_v27 = vpop.eup %7975 }
0x4f4c   :  { %v5777_v56 = vmul.f32 %v7976_v27, %v5687_v26 }
0x4fac   :  { %v5780_v0 = vpop.permute.xlu0 %5779 }
0x4fad   :  { %v5782_v32 = vmul.f32 %v7976_v27, %v5780_v0 }
0x4faf   :  { %5784 = vrot.lane.b32.xlu1 %v5782_v32, %s8095_s8 }
0x5021   :  { %v5785_v62 = vpop.permute.xlu1 %5784 }
0x5022   :  { %v5787_v11 = vadd.f32 %v5785_v62, %v5777_v56 }
0x5024   :  { %7977 = vtanh.f32 %v5787_v11 }
0x5031   :  { %v7978_v18 = vpop.eup %7977 }
0x5032   :  { %5790 = vrot.lane.b32.xlu0 %v7978_v18, %s8100_s0 }
0x50a4   :  { %v5791_v28 = vpop.permute.xlu0 %5790 }
0x50a5   :  { %v5793_v29 = vmul.f32 %v7976_v27, %v5791_v28 }
0x50a7   :  { %5795 = vrot.lane.b32.xlu1 %v5793_v29, %s8095_s8 }
0x5119   :  { %v5796_v30 = vpop.permute.xlu1 %5795 }
0x511a   :  { %7639 = vmatmul.mubr.msk.f32.vlgmr.msra.gmra.mxu0 %vm85_vm1, %v5796_v30  ;;  %v5446_v30 = vadd.f32 %v9322_v52, %v9331_v16 }
0x511b   :  { %7653 = vmatpush3.msra.mxu0 %v9238_v39  ;;  %7660 = vmatprep.mubr.msk.f32.mxu0 %vm8099_vm0, %v8098_v1 }
0x511c   :  { %7654 = vmatprep.subr.mxu0 %v8098_v1 }
0x511d   :  { %7655 = vmatpush3.msra.mxu0 %v9242_v7 }
0x511e   :  { %7656 = vmatprep.subr.mxu0 %v8098_v1 }
0x511f   :  { %7657 = vmatpush3.msra.mxu0 %v9248_v10 }
0x5120   :  { %7658 = vmatprep.subr.mxu0 %v8098_v1 }
0x5121   :  { %7659 = vmatpush3.msra.mxu0 %v9256_v13 }
0x5122   :  { %7674 = vmatprep.subr.mxu0 %v8098_v1 }
0x51da   :  { %v5865_v58 = vpop.f32.mrf.mxu0 }
0x51db   :  { %v5869_v55 = vadd.f32 %v5865_v58, %v5236_v35 }
0x51dc   :  { %v7640_v12 = vpop.f32.mrf.mxu0 }
0x51dd   :  { %7979 = vtanh.f32 %v5869_v55  ;;  %v6531_v9 = vmul.f32 -1.442695, %v5869_v55 }
0x51df   :  { %7981 = vpow2.f32 %v6531_v9 }
0x51ea   :  { %v7980_v61 = vpop.eup %7979 }
0x51eb   :  { %5879 = vrot.lane.b32.xlu0 %v7980_v61, %s8100_s0 }
0x51ec   :  { %v7982_v14 = vpop.eup %7981 }
0x51ed   :  { %v5873_v37 = vadd.f32 1.0, %v7982_v14 }
0x51ef   :  { %7983 = vrcp.f32 %v5873_v37 }
0x51fc   :  { %v7984_v15 = vpop.eup %7983 }
0x51fd   :  { %v5877_v17 = vmul.f32 %v7984_v15, %v5787_v11 }
0x525d   :  { %v5880_v19 = vpop.permute.xlu0 %5879 }
0x525e   :  { %v5882_v2 = vmul.f32 %v7984_v15, %v5880_v19 }
0x5260   :  { %5884 = vrot.lane.b32.xlu1 %v5882_v2, %s8095_s8 }
0x52d2   :  { %v5885_v20 = vpop.permute.xlu1 %5884 }
0x52d3   :  { %v5887_v60 = vadd.f32 %v5885_v20, %v5877_v17  ;;  %v5516_v17 = vadd.f32 %v9322_v52, %v9317_v33 }
0x52d5   :  { %7985 = vtanh.f32 %v5887_v60 }
0x52e2   :  { %v7986_v24 = vpop.eup %7985 }
0x52e3   :  { %5890 = vrot.lane.b32.xlu0 %v7986_v24, %s8100_s0 }
0x5355   :  { %v5891_v21 = vpop.permute.xlu0 %5890 }
0x5356   :  { %v5893_v42 = vmul.f32 %v7984_v15, %v5891_v21 }
0x5358   :  { %5895 = vrot.lane.b32.xlu1 %v5893_v42, %s8095_s8 }
0x53ca   :  { %v5896_v22 = vpop.permute.xlu1 %5895 }
0x53cb   :  { %7650 = vmatmul.mubr.msk.f32.vlgmr.msra.gmra.mxu1 %vm85_vm1, %v5896_v22 }
0x53cc   :  { %7664 = vmatpush3.msra.mxu1 %v9238_v39  ;;  %7671 = vmatprep.mubr.msk.f32.mxu1 %vm8099_vm0, %v8098_v1 }
0x53cd   :  { %7665 = vmatprep.subr.mxu1 %v8098_v1 }
0x53ce   :  { %7666 = vmatpush3.msra.mxu1 %v9242_v7 }
0x53cf   :  { %7667 = vmatprep.subr.mxu1 %v8098_v1 }
0x53d0   :  { %7668 = vmatpush3.msra.mxu1 %v9248_v10 }
0x53d1   :  { %7669 = vmatprep.subr.mxu1 %v8098_v1 }
0x53d2   :  { %7670 = vmatpush3.msra.mxu1 %v9256_v13 }
0x53d3   :  { %7685 = vmatprep.subr.mxu1 %v8098_v1 }
0x548b   :  { %v5965_v8 = vpop.f32.mrf.mxu1 }
0x548c   :  { %v5969_v43 = vadd.f32 %v5965_v8, %v5306_v25 }
0x548d   :  { %v7651_v38 = vpop.f32.mrf.mxu1 }
0x548e   :  { %7987 = vtanh.f32 %v5969_v43  ;;  %v6533_v44 = vmul.f32 -1.442695, %v5969_v43 }
0x5490   :  { %7989 = vpow2.f32 %v6533_v44 }
0x549b   :  { %v7988_v3 = vpop.eup %7987 }
0x549c   :  { %5979 = vrot.lane.b32.xlu0 %v7988_v3, %s8100_s0 }
0x549d   :  { %v7990_v54 = vpop.eup %7989 }
0x549e   :  { %v5973_v26 = vadd.f32 1.0, %v7990_v54 }
0x54a0   :  { %7991 = vrcp.f32 %v5973_v26 }
0x54ad   :  { %v7992_v23 = vpop.eup %7991 }
0x54ae   :  { %v5977_v45 = vmul.f32 %v7992_v23, %v5887_v60 }
0x550e   :  { %v5980_v4 = vpop.permute.xlu0 %5979 }
0x550f   :  { %v5982_v40 = vmul.f32 %v7992_v23, %v5980_v4 }
0x5511   :  { %5984 = vrot.lane.b32.xlu1 %v5982_v40, %s8095_s8  ;;  %v5591_v40 = vadd.f32 %v9322_v52, %v9363_v49  ;;  %v6542_v52 = vld [vmem:[%s9461_s4] ss:$0 sm:$0xff] }
0x5583   :  { %v5985_v5 = vpop.permute.xlu1 %5984 }
0x5584   :  { %v5987_v6 = vadd.f32 %v5985_v5, %v5977_v45 }
0x5586   :  { %7993 = vtanh.f32 %v5987_v6 }
0x5593   :  { %v7994_v46 = vpop.eup %7993 }
0x5594   :  { %5990 = vrot.lane.b32.xlu0 %v7994_v46, %s8100_s0 }
0x5606   :  { %v5991_v47 = vpop.permute.xlu0 %5990 }
0x5607   :  { %v5993_v48 = vmul.f32 %v7992_v23, %v5991_v47 }
0x5609   :  { %5995 = vrot.lane.b32.xlu1 %v5993_v48, %s8095_s8 }
0x567b   :  { %v5996_v34 = vpop.permute.xlu1 %5995 }
0x567c   :  { %7661 = vmatmul.mubr.msk.f32.vlgmr.msra.gmra.mxu0 %vm85_vm1, %v5996_v34 }
0x567d   :  { %7675 = vmatpush3.msra.mxu0 %v9238_v39  ;;  %7682 = vmatprep.mubr.msk.f32.mxu0 %vm8099_vm0, %v8098_v1 }
0x567e   :  { %7676 = vmatprep.subr.mxu0 %v8098_v1 }
0x567f   :  { %7677 = vmatpush3.msra.mxu0 %v9242_v7 }
0x5680   :  { %7678 = vmatprep.subr.mxu0 %v8098_v1 }
0x5681   :  { %7679 = vmatpush3.msra.mxu0 %v9248_v10 }
0x5682   :  { %7680 = vmatprep.subr.mxu0 %v8098_v1 }
0x5683   :  { %7681 = vmatpush3.msra.mxu0 %v9256_v13 }
0x573c   :  { %v6065_v31 = vpop.f32.mrf.mxu0 }
0x573d   :  { %v6069_v50 = vadd.f32 %v6065_v31, %v5376_v51 }
0x573e   :  { %v7662_v53 = vpop.f32.mrf.mxu0 }
0x573f   :  { %7995 = vtanh.f32 %v6069_v50  ;;  %v6535_v36 = vmul.f32 -1.442695, %v6069_v50 }
0x5741   :  { %7997 = vpow2.f32 %v6535_v36 }
0x574c   :  { %v7996_v41 = vpop.eup %7995 }
0x574d   :  { %6079 = vrot.lane.b32.xlu0 %v7996_v41, %s8100_s0 }
0x574e   :  { %v7998_v57 = vpop.eup %7997 }
0x574f   :  { %v6073_v59 = vadd.f32 1.0, %v7998_v57 }
0x5751   :  { %7999 = vrcp.f32 %v6073_v59 }
0x575e   :  { %v8000_v27 = vpop.eup %7999 }
0x575f   :  { %v6077_v56 = vmul.f32 %v8000_v27, %v5987_v6 }
0x57bf   :  { %v6080_v0 = vpop.permute.xlu0 %6079 }
0x57c0   :  { %v6082_v32 = vmul.f32 %v8000_v27, %v6080_v0 }
0x57c2   :  { %6084 = vrot.lane.b32.xlu1 %v6082_v32, %s8095_s8 }
0x5834   :  { %v6085_v62 = vpop.permute.xlu1 %6084 }
0x5835   :  { %v6087_v63 = vadd.f32 %v6085_v62, %v6077_v56  ;;  %v6543_v62 = vld [vmem:[#allocation2] ss:$0 sm:$0xff] }
0x5837   :  { %8001 = vtanh.f32 %v6087_v63 }
0x5844   :  { %v8002_v11 = vpop.eup %8001 }
0x5845   :  { %6090 = vrot.lane.b32.xlu0 %v8002_v11, %s8100_s0 }
0x58b7   :  { %v6091_v18 = vpop.permute.xlu0 %6090 }
0x58b8   :  { %v6093_v28 = vmul.f32 %v8000_v27, %v6091_v18 }
0x58ba   :  { %6095 = vrot.lane.b32.xlu1 %v6093_v28, %s8095_s8 }
0x592c   :  { %v6096_v29 = vpop.permute.xlu1 %6095 }
0x592d   :  { %7672 = vmatmul.mubr.msk.f32.vlgmr.msra.gmra.mxu1 %vm85_vm1, %v6096_v29 }
0x592e   :  { %7686 = vmatpush3.msra.mxu1 %v9238_v39  ;;  %7693 = vmatprep.mubr.msk.f32.mxu1 %vm8099_vm0, %v8098_v1 }
0x592f   :  { %7687 = vmatprep.subr.mxu1 %v8098_v1 }
0x5930   :  { %7688 = vmatpush3.msra.mxu1 %v9242_v7 }
0x5931   :  { %7689 = vmatprep.subr.mxu1 %v8098_v1 }
0x5932   :  { %7690 = vmatpush3.msra.mxu1 %v9248_v10 }
0x5933   :  { %7691 = vmatprep.subr.mxu1 %v8098_v1 }
0x5934   :  { %7692 = vmatpush3.msra.mxu1 %v9256_v13 }
0x59ed   :  { %v6165_v35 = vpop.f32.mrf.mxu1 }
0x59ee   :  { %v6169_v39 = vadd.f32 %v6165_v35, %v5446_v30 }
0x59ef   :  { %v7673_v58 = vpop.f32.mrf.mxu1 }
0x59f0   :  { %8003 = vtanh.f32 %v6169_v39  ;;  %v6537_v12 = vmul.f32 -1.442695, %v6169_v39 }
0x59f2   :  { %8005 = vpow2.f32 %v6537_v12 }
0x59fd   :  { %v8004_v55 = vpop.eup %8003 }
0x59fe   :  { %6179 = vrot.lane.b32.xlu0 %v8004_v55, %s8100_s0 }
0x59ff   :  { %v8006_v7 = vpop.eup %8005 }
0x5a00   :  { %v6173_v61 = vadd.f32 1.0, %v8006_v7 }
0x5a02   :  { %8007 = vrcp.f32 %v6173_v61 }
0x5a0f   :  { %v8008_v10 = vpop.eup %8007 }
0x5a10   :  { %v6177_v13 = vmul.f32 %v8008_v10, %v6087_v63 }
0x5a70   :  { %v6180_v9 = vpop.permute.xlu0 %6179 }
0x5a71   :  { %v6182_v1 = vmul.f32 %v8008_v10, %v6180_v9 }
0x5a73   :  { %6184 = vrot.lane.b32.xlu1 %v6182_v1, %s8095_s8 }
0x5ae5   :  { %v6185_v14 = vpop.permute.xlu1 %6184 }
0x5ae6   :  { %v6187_v16 = vadd.f32 %v6185_v14, %v6177_v13 }
0x5ae8   :  { %8009 = vtanh.f32 %v6187_v16 }
0x5af5   :  { %v8010_v37 = vpop.eup %8009 }
0x5af6   :  { %6190 = vrot.lane.b32.xlu0 %v8010_v37, %s8100_s0 }
0x5b68   :  { %v6191_v15 = vpop.permute.xlu0 %6190 }
0x5b69   :  { %v6193_v19 = vmul.f32 %v8008_v10, %v6191_v15 }
0x5b6b   :  { %6195 = vrot.lane.b32.xlu1 %v6193_v19, %s8095_s8 }
0x5bdd   :  { %v6196_v2 = vpop.permute.xlu1 %6195 }
0x5bde   :  { %7683 = vmatmul.mubr.msk.f32.vlgmr.msra.gmra.mxu0 %vm85_vm1, %v6196_v2 }
0x5c9e   :  { %v6265_v20 = vpop.f32.mrf.mxu0 }
0x5c9f   :  { %v6269_v60 = vadd.f32 %v6265_v20, %v5516_v17 }
0x5ca0   :  { %v7684_v24 = vpop.f32.mrf.mxu0 }
0x5ca1   :  { %8011 = vtanh.f32 %v6269_v60  ;;  %v6539_v42 = vmul.f32 -1.442695, %v6269_v60 }
0x5ca3   :  { %8013 = vpow2.f32 %v6539_v42 }
0x5cae   :  { %v8012_v21 = vpop.eup %8011 }
0x5caf   :  { %6279 = vrot.lane.b32.xlu0 %v8012_v21, %s8100_s0 }
0x5cb0   :  { %v8014_v22 = vpop.eup %8013 }
0x5cb1   :  { %v6273_v25 = vadd.f32 1.0, %v8014_v22 }
0x5cb3   :  { %8015 = vrcp.f32 %v6273_v25 }
0x5cc0   :  { %v8016_v8 = vpop.eup %8015 }
0x5cc1   :  { %v6277_v3 = vmul.f32 %v8016_v8, %v6187_v16 }
0x5d21   :  { %v6280_v43 = vpop.permute.xlu0 %6279 }
0x5d22   :  { %v6282_v38 = vmul.f32 %v8016_v8, %v6280_v43 }
0x5d24   :  { %6284 = vrot.lane.b32.xlu1 %v6282_v38, %s8095_s8 }
0x5d96   :  { %v6285_v44 = vpop.permute.xlu1 %6284 }
0x5d97   :  { %v6287_v33 = vadd.f32 %v6285_v44, %v6277_v3 }
0x5d99   :  { %8017 = vtanh.f32 %v6287_v33 }
0x5da6   :  { %v8018_v54 = vpop.eup %8017 }
0x5da7   :  { %6290 = vrot.lane.b32.xlu0 %v8018_v54, %s8100_s0 }
0x5e19   :  { %v6291_v26 = vpop.permute.xlu0 %6290 }
0x5e1a   :  { %v6293_v23 = vmul.f32 %v8016_v8, %v6291_v26 }
0x5e1c   :  { %6295 = vrot.lane.b32.xlu1 %v6293_v23, %s8095_s8 }
0x5e8e   :  { %v6296_v4 = vpop.permute.xlu1 %6295 }
0x5e8f   :  { %7694 = vmatmul.mubr.msk.f32.vlgmr.msra.gmra.mxu1 %vm85_vm1, %v6296_v4 }
0x5f4f   :  { %v6365_v45 = vpop.f32.mrf.mxu1 }
0x5f50   :  { %v6369_v5 = vadd.f32 %v6365_v45, %v5591_v40 }
0x5f51   :  { %v7695_v6 = vpop.f32.mrf.mxu1 }
0x5f52   :  { %8019 = vtanh.f32 %v6369_v5  ;;  %v6541_v47 = vmul.f32 -1.442695, %v6369_v5 }
0x5f54   :  { %8021 = vpow2.f32 %v6541_v47 }
0x5f5f   :  { %v8020_v46 = vpop.eup %8019 }
0x5f60   :  { %6379 = vrot.lane.b32.xlu0 %v8020_v46, %s8100_s0 }
0x5f61   :  { %v8022_v48 = vpop.eup %8021 }
0x5f62   :  { %v6373_v34 = vadd.f32 1.0, %v8022_v48 }
0x5f64   :  { %8023 = vrcp.f32 %v6373_v34 }
0x5f71   :  { %v8024_v51 = vpop.eup %8023 }
0x5f72   :  { %v6377_v49 = vmul.f32 %v8024_v51, %v6287_v33 }
0x5fd2   :  { %v6380_v31 = vpop.permute.xlu0 %6379 }
0x5fd3   :  { %v6382_v50 = vmul.f32 %v8024_v51, %v6380_v31 }
0x5fd5   :  { %6384 = vrot.lane.b32.xlu1 %v6382_v50, %s8095_s8 }
0x5fd9   :  { %6400 = vrot.lane.b32.xlu1 %v6542_v52, %s8101_s24 }
0x6047   :  { %v6385_v53 = vpop.permute.xlu1 %6384 }
0x6048   :  { %v6387_v41 = vadd.f32 %v6385_v53, %v6377_v49 }
0x604a   :  { %8025 = vtanh.f32 %v6387_v41 }
0x604b   :  { %v6401_v59 = vpop.permute.xlu1 %6400 }
0x6057   :  { %v8026_v36 = vpop.eup %8025 }
0x6058   :  { %6390 = vrot.lane.b32.xlu0 %v8026_v36, %s8100_s0 }
0x60ca   :  { %v6391_v57 = vpop.permute.xlu0 %6390 }
0x60cb   :  { %v6393_v27 = vmul.f32 %v8024_v51, %v6391_v57 }
0x60cd   :  { %v6403_v0 = vmul.f32 %v6401_v59, %v6393_v27 }
0x60cf   :  { %6405 = vrot.lane.b32.xlu0 %v6403_v0, %s8095_s8 }
0x6141   :  { %v6406_v32 = vpop.permute.xlu0 %6405 }
0x6142   :  { %v6409_v56 = vsel %vm6408_vm2, %v6406_v32, 0.0 }
0x6143   :  { %6410 = vadd.xlane.f32.xlu1 %v6409_v56 }
0x61cc   :  { %v6411_v63 = vpop.xlane.xlu1 %6410 }
0x61cd   :  { %v6419_v11 = vadd.f32 %v6543_v62, %v6411_v63 }
0x61cf   :  { %6421 = vst.msk [vmem:[%s9463_s6] sm:$0x3] %vm6420_vm3, %v6419_v11 }
0x61d0   :  { %6426 = vsyncpa [#allocation4], 1 }
0x61d1   :  { %6427 = vsyncpa [#allocation6], 1 }

</bundles_post_ra>
